<compile_context>
chip_gen: v7x
topology: tpu7x:2x2x1
jax: 0.10.0
libtpu: 0.0.40
codegen_flags: <defaults>
</compile_context>

<pallas_src>
import functools

import jax
import jax.numpy as jnp
from jax import lax
from jax.experimental import pallas as pl
from jax.experimental.pallas import tpu as pltpu

INPUT_SIZE = 512     # DurationPredictor input channels
FILTER_SIZE = 256    # DurationPredictor hidden channels
LN_EPS = 1e-5
HALO = 2             # two stacked k=3 convs fused in one kernel -> 2-row halo


def _round_up(v, m):
    return ((v + m - 1) // m) * m


def _vmem_limit_bytes(tt):
    c, f = INPUT_SIZE, FILTER_SIZE
    per_tile = (2 * (tt * c * 2)               # double-buffered x tile (bf16)
                + 2 * (2 * HALO * c * 2)       # double-buffered halo rows
                + 2 * (tt * 4)                 # double-buffered output tile (f32)
                + (tt + 2 * HALO) * c * 2      # assembled window
                + (tt + 2) * 3 * c * 2         # fused conv-1 operand
                + 2 * (tt + 2) * f * 4         # conv-1 result + h1
                + tt * 3 * f * 2               # fused conv-2 operand
                + 2 * tt * f * 4)              # conv-2 result + h2
    weights = 2 * ((3 * c * f + 3 * f * f) * 2 + (8 * f + 1) * 4)
    est = int(1.5 * (per_tile + weights)) + (2 << 20)
    return max(min(est, 100 << 20), 32 << 20)  # never below the 32 MiB default


def _ln_relu(h, gamma, beta):
    """LayerNorm (biased variance, eps inside rsqrt) + ReLU, in f32."""
    mu = jnp.mean(h, axis=-1, keepdims=True)
    var = jnp.mean(jnp.square(h - mu), axis=-1, keepdims=True)
    hn = (h - mu) * lax.rsqrt(var + LN_EPS)
    return jnp.maximum(hn * gamma + beta, 0.0)


def _dp_kernel(x_ref, halo_ref, w1_ref, b1_ref, g1_ref, be1_ref,
               w2_ref, b2_ref, g2_ref, be2_ref, wl_ref, bl_ref,
               o_ref, *, nt, tt, seq_len):
    i = pl.program_id(0)
    t0 = (i % nt) * tt - 1                 # in-batch time of h1 window row 0

    xb = x_ref[0]                          # (TT, 512)  bf16
    halo = halo_ref[0]                     # (4, 512)   bf16: 2 rows left, 2 rows right

    # Tile window with a 2-row halo on each side: times [tile_start-2, tile_start+TT+2)
    win = jnp.concatenate([halo[0:HALO], xb, halo[HALO:2 * HALO]], axis=0)  # (TT+4, 512)

    # ---- Conv #1 (k=3, pad=1): three taps fused into one K=3*512 bf16 matmul ----
    a1 = jnp.concatenate([win[0:tt + 2], win[1:tt + 3], win[2:tt + 4]], axis=-1)
    y1 = jnp.dot(a1, w1_ref[...], preferred_element_type=jnp.float32) + b1_ref[...]
    h1 = _ln_relu(y1, g1_ref[...], be1_ref[...])                            # (TT+2, 256) f32

    # conv #2's zero padding: h1 rows whose time falls outside [0, seq_len) must be
    # exactly zero (they are NOT zero when computed from zero-padded x).  Only the
    # boundary rows can match -> one cheap select; no rolls / full-tensor masks.
    row_t = lax.broadcasted_iota(jnp.int32, (tt + 2, 1), 0) + t0
    h1 = jnp.where((row_t >= 0) & (row_t < seq_len), h1, 0.0)
    h1 = h1.astype(jnp.bfloat16)

    # ---- Conv #2 (k=3, pad=1): fused into one K=3*256 bf16 matmul ----
    a2 = jnp.concatenate([h1[0:tt], h1[1:tt + 1], h1[2:tt + 2]], axis=-1)
    y2 = jnp.dot(a2, w2_ref[...], preferred_element_type=jnp.float32) + b2_ref[...]
    h2 = _ln_relu(y2, g2_ref[...], be2_ref[...])                            # (TT, 256) f32

    # ---- Linear(256 -> 1) + ReLU on the VPU (multiply + lane reduce) ----
    proj = jnp.sum(h2 * wl_ref[...], axis=-1, keepdims=True) + bl_ref[...]  # (TT, 1)
    o_ref[...] = jnp.maximum(proj, 0.0).reshape(1, 1, tt)                   # lane-dense store


def duration_predictor_pallas(x, params, *, time_tile=512):
    """x: (B, T, 512) float32.  Returns (1, B, T) float32 (eval-mode forward).

    Note: only the channel dim is squeezed before the leading unsqueeze(0); the
    torch code's bare `.squeeze()` would additionally drop B==1 / T==1 dims.
    """
    B, T, C = x.shape
    assert C == INPUT_SIZE
    w1, b1, g1, be1, w2, b2, g2, be2, wl, bl = params

    # --- tiling ---
    tt = max(8, (int(time_tile) // 8) * 8)
    tt = min(tt, _round_up(T, 8))
    nt = -(-T // tt)
    t_pad = nt * tt

    # --- operand prep (cast + pad fuse into one pass over x under jit) ---
    xb = jnp.pad(x.astype(jnp.bfloat16), ((0, 0), (0, t_pad - T), (0, 0)))
    xt = xb.reshape(B, nt, tt, C)
    z2 = jnp.zeros((B, 1, HALO, C), xb.dtype)
    halo = jnp.concatenate(
        [jnp.concatenate([z2, xt[:, :-1, tt - HALO:, :]], axis=1),   # rows t*tt-2, t*tt-1
         jnp.concatenate([xt[:, 1:, :HALO, :], z2], axis=1)],        # rows (t+1)*tt, (t+1)*tt+1
        axis=2).reshape(B * nt, 2 * HALO, C)
    x_tiles = xt.reshape(B * nt, tt, C)

    w1f = w1.reshape(3 * INPUT_SIZE, FILTER_SIZE).astype(jnp.bfloat16)
    w2f = w2.reshape(3 * FILTER_SIZE, FILTER_SIZE).astype(jnp.bfloat16)
    wl_row = wl.reshape(1, FILTER_SIZE).astype(jnp.float32)

    kernel = functools.partial(_dp_kernel, nt=nt, tt=tt, seq_len=T)
    full = lambda i: (0, 0)

    out = pl.pallas_call(
        kernel,
        out_shape=jax.ShapeDtypeStruct((B * nt, 1, tt), jnp.float32),
        grid=(B * nt,),
        in_specs=[
            # NOTE(v5e): add pipeline_mode=pl.Buffered(3) here if the per-tile x
            # DMA is still exposed on low-HBM-bandwidth parts.
            pl.BlockSpec((1, tt, INPUT_SIZE), lambda i: (i, 0, 0)),
            pl.BlockSpec((1, 2 * HALO, INPUT_SIZE), lambda i: (i, 0, 0)),
            pl.BlockSpec((3 * INPUT_SIZE, FILTER_SIZE), full),
            pl.BlockSpec((1, FILTER_SIZE), full),
            pl.BlockSpec((1, FILTER_SIZE), full),
            pl.BlockSpec((1, FILTER_SIZE), full),
            pl.BlockSpec((3 * FILTER_SIZE, FILTER_SIZE), full),
            pl.BlockSpec((1, FILTER_SIZE), full),
            pl.BlockSpec((1, FILTER_SIZE), full),
            pl.BlockSpec((1, FILTER_SIZE), full),
            pl.BlockSpec((1, FILTER_SIZE), full),
            pl.BlockSpec((1, 1), full),
        ],
        out_specs=pl.BlockSpec((1, 1, tt), lambda i: (i, 0, 0)),
        compiler_params=pltpu.CompilerParams(
            dimension_semantics=("parallel",),
            vmem_limit_bytes=_vmem_limit_bytes(tt),
        ),
        cost_estimate=pl.CostEstimate(
            flops=2 * B * t_pad * (3 * INPUT_SIZE * FILTER_SIZE
                                   + 3 * FILTER_SIZE * FILTER_SIZE + FILTER_SIZE),
            transcendentals=2 * B * t_pad,
            bytes_accessed=(x_tiles.size + halo.size + w1f.size + w2f.size) * 2
                           + (8 * FILTER_SIZE + 1 + B * t_pad) * 4,
        ),
    )(x_tiles, halo, w1f, b1, g1, be1, w2f, b2, g2, be2, wl_row, bl)

    out = out.reshape(B, t_pad)[:, :T]      # (B, T): channel dim already squeezed
    return out[None]                        # (1, B, T)


def _xavier_uniform(key, fan_in, fan_out, shape):
    limit = jnp.sqrt(6.0 / (fan_in + fan_out))   # gain('linear') = 1.0
    return jax.random.uniform(key, shape, jnp.float32, -limit, limit)


def init_params(key):
    k1, k2, k3 = jax.random.split(key, 3)
    kernel = 3
    # Conv1d weight (Cout, Cin, K) with xavier; stored here as (K, Cin, Cout) so each
    # tap is a ready-to-use (Cin, Cout) matmul operand (fused to (3*Cin, Cout) later).
    fan_in1, fan_out1 = INPUT_SIZE * kernel, FILTER_SIZE * kernel
    w1 = _xavier_uniform(k1, fan_in1, fan_out1, (kernel, INPUT_SIZE, FILTER_SIZE))
    b1 = jnp.zeros((1, FILTER_SIZE), jnp.float32)
    g1 = jnp.ones((1, FILTER_SIZE), jnp.float32)
    be1 = jnp.zeros((1, FILTER_SIZE), jnp.float32)

    fan_in2, fan_out2 = FILTER_SIZE * kernel, FILTER_SIZE * kernel
    w2 = _xavier_uniform(k2, fan_in2, fan_out2, (kernel, FILTER_SIZE, FILTER_SIZE))
    b2 = jnp.zeros((1, FILTER_SIZE), jnp.float32)
    g2 = jnp.ones((1, FILTER_SIZE), jnp.float32)
    be2 = jnp.zeros((1, FILTER_SIZE), jnp.float32)

    wl = _xavier_uniform(k3, FILTER_SIZE, 1, (FILTER_SIZE, 1))
    bl = jnp.zeros((1, 1), jnp.float32)
    return (w1, b1, g1, be1, w2, b2, g2, be2, wl, bl)


def _ref_forward(x, params):
    """Pure-JAX reference (same bf16-operand / f32-accumulate matmuls, f32 LN)."""
    w1, b1, g1, be1, w2, b2, g2, be2, wl, bl = params

    def conv3(h, w, b):                      # h: (B, T, Cin) bf16, w: (3, Cin, Cout)
        hp = jnp.pad(h, ((0, 0), (1, 1), (0, 0)))
        wb = w.astype(jnp.bfloat16)
        out = sum(jnp.einsum("btc,cf->btf", hp[:, k:k + h.shape[1]], wb[k],
                             preferred_element_type=jnp.float32) for k in range(3))
        return out + b

    def ln_relu(h, g, be):
        mu = jnp.mean(h, axis=-1, keepdims=True)
        var = jnp.mean(jnp.square(h - mu), axis=-1, keepdims=True)
        return jnp.maximum((h - mu) * lax.rsqrt(var + LN_EPS) * g + be, 0.0)

    h = ln_relu(conv3(x.astype(jnp.bfloat16), w1, b1), g1, be1)
    h = ln_relu(conv3(h.astype(jnp.bfloat16), w2, b2), g2, be2)
    out = jnp.maximum(h @ wl + bl, 0.0)      # (B, T, 1) f32
    return out[..., 0][None]                 # (1, B, T)


if __name__ == "__main__":
    key = jax.random.PRNGKey(0)
    k_x, k_p = jax.random.split(key)

    B, T = 2, 136                            # 3 time tiles of 64: interior halos + ragged tail
    x = jax.random.normal(k_x, (B, T, INPUT_SIZE), jnp.float32)
    params = init_params(k_p)

    run = jax.jit(lambda xx, pp: duration_predictor_pallas(xx, pp, time_tile=64))
    out = jax.block_until_ready(run(x, params))

    ref = _ref_forward(x, params)
    assert out.shape == (1, B, T), out.shape
    err = float(jnp.max(jnp.abs(out - ref)))
    assert err < 5e-3, f"max abs err {err}"
    print("KERNEL_OK")
</pallas_src>

<mosaic_0001>
module attributes {stable_mosaic.version = 11 : i64} {
  func.func @_dp_kernel(%arg0: i32, %arg1: memref<1x64x512xbf16, #tpu.memory_space<vmem>>, %arg2: memref<1x4x512xbf16, #tpu.memory_space<vmem>>, %arg3: memref<1536x256xbf16, #tpu.memory_space<vmem>>, %arg4: memref<1x256xf32, #tpu.memory_space<vmem>>, %arg5: memref<1x256xf32, #tpu.memory_space<vmem>>, %arg6: memref<1x256xf32, #tpu.memory_space<vmem>>, %arg7: memref<768x256xbf16, #tpu.memory_space<vmem>>, %arg8: memref<1x256xf32, #tpu.memory_space<vmem>>, %arg9: memref<1x256xf32, #tpu.memory_space<vmem>>, %arg10: memref<1x256xf32, #tpu.memory_space<vmem>>, %arg11: memref<1x256xf32, #tpu.memory_space<vmem>>, %arg12: memref<1x1xf32, #tpu.memory_space<vmem>>, %arg13: memref<1x1x64xf32, #tpu.memory_space<vmem>>) attributes {dimension_semantics = [#tpu.dimension_semantics<parallel>], iteration_bounds = array<i64: 6>, scalar_prefetch = 0 : i64, scratch_operands = 0 : i64, tpu.core_type = #tpu.core_type<tc>, window_params = [{transform_indices = @transform_0, window_bounds = array<i64: 1, 64, 512>}, {transform_indices = @transform_1, window_bounds = array<i64: 1, 4, 512>}, {pipeline_mode = #tpu.pipeline_mode<synchronous>, transform_indices = @transform_2, window_bounds = array<i64: 1536, 256>}, {pipeline_mode = #tpu.pipeline_mode<synchronous>, transform_indices = @transform_3, window_bounds = array<i64: 1, 256>}, {pipeline_mode = #tpu.pipeline_mode<synchronous>, transform_indices = @transform_4, window_bounds = array<i64: 1, 256>}, {pipeline_mode = #tpu.pipeline_mode<synchronous>, transform_indices = @transform_5, window_bounds = array<i64: 1, 256>}, {pipeline_mode = #tpu.pipeline_mode<synchronous>, transform_indices = @transform_6, window_bounds = array<i64: 768, 256>}, {pipeline_mode = #tpu.pipeline_mode<synchronous>, transform_indices = @transform_7, window_bounds = array<i64: 1, 256>}, {pipeline_mode = #tpu.pipeline_mode<synchronous>, transform_indices = @transform_8, window_bounds = array<i64: 1, 256>}, {pipeline_mode = #tpu.pipeline_mode<synchronous>, transform_indices = @transform_9, window_bounds = array<i64: 1, 256>}, {pipeline_mode = #tpu.pipeline_mode<synchronous>, transform_indices = @transform_10, window_bounds = array<i64: 1, 256>}, {pipeline_mode = #tpu.pipeline_mode<synchronous>, transform_indices = @transform_11, window_bounds = array<i64: 1, 1>}, {transform_indices = @transform_12, window_bounds = array<i64: 1, 1, 64>}]} {
    %c3_i32 = arith.constant 3 : i32
    %c0_i32 = arith.constant 0 : i32
    %0 = arith.cmpi eq, %c3_i32, %c0_i32 : i32
    %c1_i32 = arith.constant 1 : i32
    %1 = arith.select %0, %c1_i32, %c3_i32 : i32
    %2 = arith.remsi %arg0, %1 : i32
    %c0_i32_0 = arith.constant 0 : i32
    %3 = arith.cmpi ne, %2, %c0_i32_0 : i32
    %c0_i32_1 = arith.constant 0 : i32
    %4 = arith.cmpi slt, %2, %c0_i32_1 : i32
    %c0_i32_2 = arith.constant 0 : i32
    %5 = arith.cmpi slt, %1, %c0_i32_2 : i32
    %6 = arith.xori %4, %5 : i1
    %7 = arith.andi %6, %3 : i1
    %8 = arith.addi %2, %1 : i32
    %9 = arith.select %7, %8, %2 : i32
    %c64_i32 = arith.constant 64 : i32
    %10 = arith.muli %9, %c64_i32 : i32
    %c1_i32_3 = arith.constant 1 : i32
    %11 = arith.subi %10, %c1_i32_3 : i32
    %c0 = arith.constant 0 : index
    %c0_4 = arith.constant 0 : index
    %c0_5 = arith.constant 0 : index
    %12 = vector.load %arg1[%c0, %c0_4, %c0_5] : memref<1x64x512xbf16, #tpu.memory_space<vmem>>, vector<1x64x512xbf16>
    %13 = vector.shape_cast %12 : vector<1x64x512xbf16> to vector<64x512xbf16>
    %c0_6 = arith.constant 0 : index
    %c0_7 = arith.constant 0 : index
    %c0_8 = arith.constant 0 : index
    %14 = vector.load %arg2[%c0_6, %c0_7, %c0_8] : memref<1x4x512xbf16, #tpu.memory_space<vmem>>, vector<1x4x512xbf16>
    %15 = vector.shape_cast %14 : vector<1x4x512xbf16> to vector<4x512xbf16>
    %16 = vector.extract_strided_slice %15 {offsets = [0, 0], sizes = [2, 512], strides = [1, 1]} : vector<4x512xbf16> to vector<2x512xbf16>
    %17 = vector.extract_strided_slice %15 {offsets = [2, 0], sizes = [2, 512], strides = [1, 1]} : vector<4x512xbf16> to vector<2x512xbf16>
    %18 = tpu.concatenate %16, %13, %17 in 0 : vector<2x512xbf16>, vector<64x512xbf16>, vector<2x512xbf16> -> vector<68x512xbf16>
    %19 = vector.extract_strided_slice %18 {offsets = [0, 0], sizes = [66, 512], strides = [1, 1]} : vector<68x512xbf16> to vector<66x512xbf16>
    %20 = vector.extract_strided_slice %18 {offsets = [1, 0], sizes = [66, 512], strides = [1, 1]} : vector<68x512xbf16> to vector<66x512xbf16>
    %21 = vector.extract_strided_slice %18 {offsets = [2, 0], sizes = [66, 512], strides = [1, 1]} : vector<68x512xbf16> to vector<66x512xbf16>
    %22 = tpu.concatenate %19, %20, %21 in 1 : vector<66x512xbf16>, vector<66x512xbf16>, vector<66x512xbf16> -> vector<66x1536xbf16>
    %c0_9 = arith.constant 0 : index
    %c0_10 = arith.constant 0 : index
    %23 = vector.load %arg3[%c0_9, %c0_10] : memref<1536x256xbf16, #tpu.memory_space<vmem>>, vector<1536x256xbf16>
    %cst = arith.constant dense<0.000000e+00> : vector<66x256xf32>
    %24 = tpu.matmul %22, %23, %cst {dimension_numbers = #tpu.dot_dimension_numbers<[1], [0], [0], [1], [0, 0, 1, 1], [], []>} : vector<66x1536xbf16>, vector<1536x256xbf16>, vector<66x256xf32> -> vector<66x256xf32>
    %c0_11 = arith.constant 0 : index
    %c0_12 = arith.constant 0 : index
    %25 = vector.load %arg4[%c0_11, %c0_12] : memref<1x256xf32, #tpu.memory_space<vmem>>, vector<1x256xf32>
    %26 = vector.broadcast %25 : vector<1x256xf32> to vector<66x256xf32>
    %27 = arith.addf %24, %26 : vector<66x256xf32>
    %c0_13 = arith.constant 0 : index
    %c0_14 = arith.constant 0 : index
    %28 = vector.load %arg5[%c0_13, %c0_14] : memref<1x256xf32, #tpu.memory_space<vmem>>, vector<1x256xf32>
    %c0_15 = arith.constant 0 : index
    %c0_16 = arith.constant 0 : index
    %29 = vector.load %arg6[%c0_15, %c0_16] : memref<1x256xf32, #tpu.memory_space<vmem>>, vector<1x256xf32>
    %cst_17 = arith.constant dense<0.000000e+00> : vector<66xf32>
    %30 = vector.multi_reduction <add>, %27, %cst_17 [1] : vector<66x256xf32> to vector<66xf32>
    %31 = vector.shape_cast %30 : vector<66xf32> to vector<66x1xf32>
    %cst_18 = arith.constant 2.560000e+02 : f32
    %32 = vector.broadcast %cst_18 : f32 to vector<66x1xf32>
    %33 = arith.divf %31, %32 : vector<66x1xf32>
    %34 = vector.broadcast %33 : vector<66x1xf32> to vector<66x256xf32>
    %35 = arith.subf %27, %34 : vector<66x256xf32>
    %36 = arith.mulf %35, %35 : vector<66x256xf32>
    %cst_19 = arith.constant dense<0.000000e+00> : vector<66xf32>
    %37 = vector.multi_reduction <add>, %36, %cst_19 [1] : vector<66x256xf32> to vector<66xf32>
    %38 = vector.shape_cast %37 : vector<66xf32> to vector<66x1xf32>
    %cst_20 = arith.constant 2.560000e+02 : f32
    %39 = vector.broadcast %cst_20 : f32 to vector<66x1xf32>
    %40 = arith.divf %38, %39 : vector<66x1xf32>
    %41 = vector.broadcast %33 : vector<66x1xf32> to vector<66x256xf32>
    %42 = arith.subf %27, %41 : vector<66x256xf32>
    %cst_21 = arith.constant 9.99999974E-6 : f32
    %43 = vector.broadcast %cst_21 : f32 to vector<66x1xf32>
    %44 = arith.addf %40, %43 : vector<66x1xf32>
    %45 = math.rsqrt %44 : vector<66x1xf32>
    %46 = vector.broadcast %45 : vector<66x1xf32> to vector<66x256xf32>
    %47 = arith.mulf %42, %46 : vector<66x256xf32>
    %48 = vector.broadcast %28 : vector<1x256xf32> to vector<66x256xf32>
    %49 = arith.mulf %47, %48 : vector<66x256xf32>
    %50 = vector.broadcast %29 : vector<1x256xf32> to vector<66x256xf32>
    %51 = arith.addf %49, %50 : vector<66x256xf32>
    %cst_22 = arith.constant 0.000000e+00 : f32
    %52 = vector.broadcast %cst_22 : f32 to vector<66x256xf32>
    %53 = arith.maximumf %51, %52 : vector<66x256xf32>
    %54 = tpu.iota {dimensions = array<i32: 0>} : vector<66x1xi32>
    %55 = vector.broadcast %11 : i32 to vector<66x1xi32>
    %56 = arith.addi %54, %55 : vector<66x1xi32>
    %c0_i32_23 = arith.constant 0 : i32
    %57 = vector.broadcast %c0_i32_23 : i32 to vector<66x1xi32>
    %58 = arith.cmpi sge, %56, %57 : vector<66x1xi32>
    %c136_i32 = arith.constant 136 : i32
    %59 = vector.broadcast %c136_i32 : i32 to vector<66x1xi32>
    %60 = arith.cmpi slt, %56, %59 : vector<66x1xi32>
    %61 = arith.andi %58, %60 : vector<66x1xi1>
    %cst_24 = arith.constant 0.000000e+00 : f32
    %62 = vector.shape_cast %61 : vector<66x1xi1> to vector<66x1xi1>
    %63 = vector.broadcast %62 : vector<66x1xi1> to vector<66x256xi1>
    %64 = vector.broadcast %cst_24 : f32 to vector<66x256xf32>
    %65 = arith.select %63, %53, %64 : vector<66x256xi1>, vector<66x256xf32>
    %66 = arith.truncf %65 : vector<66x256xf32> to vector<66x256xbf16>
    %67 = vector.extract_strided_slice %66 {offsets = [0, 0], sizes = [64, 256], strides = [1, 1]} : vector<66x256xbf16> to vector<64x256xbf16>
    %68 = vector.extract_strided_slice %66 {offsets = [1, 0], sizes = [64, 256], strides = [1, 1]} : vector<66x256xbf16> to vector<64x256xbf16>
    %69 = vector.extract_strided_slice %66 {offsets = [2, 0], sizes = [64, 256], strides = [1, 1]} : vector<66x256xbf16> to vector<64x256xbf16>
    %70 = tpu.concatenate %67, %68, %69 in 1 : vector<64x256xbf16>, vector<64x256xbf16>, vector<64x256xbf16> -> vector<64x768xbf16>
    %c0_25 = arith.constant 0 : index
    %c0_26 = arith.constant 0 : index
    %71 = vector.load %arg7[%c0_25, %c0_26] : memref<768x256xbf16, #tpu.memory_space<vmem>>, vector<768x256xbf16>
    %cst_27 = arith.constant dense<0.000000e+00> : vector<64x256xf32>
    %72 = tpu.matmul %70, %71, %cst_27 {dimension_numbers = #tpu.dot_dimension_numbers<[1], [0], [0], [1], [0, 0, 1, 1], [], []>} : vector<64x768xbf16>, vector<768x256xbf16>, vector<64x256xf32> -> vector<64x256xf32>
    %c0_28 = arith.constant 0 : index
    %c0_29 = arith.constant 0 : index
    %73 = vector.load %arg8[%c0_28, %c0_29] : memref<1x256xf32, #tpu.memory_space<vmem>>, vector<1x256xf32>
    %74 = vector.broadcast %73 : vector<1x256xf32> to vector<64x256xf32>
    %75 = arith.addf %72, %74 : vector<64x256xf32>
    %c0_30 = arith.constant 0 : index
    %c0_31 = arith.constant 0 : index
    %76 = vector.load %arg9[%c0_30, %c0_31] : memref<1x256xf32, #tpu.memory_space<vmem>>, vector<1x256xf32>
    %c0_32 = arith.constant 0 : index
    %c0_33 = arith.constant 0 : index
    %77 = vector.load %arg10[%c0_32, %c0_33] : memref<1x256xf32, #tpu.memory_space<vmem>>, vector<1x256xf32>
    %cst_34 = arith.constant dense<0.000000e+00> : vector<64xf32>
    %78 = vector.multi_reduction <add>, %75, %cst_34 [1] : vector<64x256xf32> to vector<64xf32>
    %79 = vector.shape_cast %78 : vector<64xf32> to vector<64x1xf32>
    %cst_35 = arith.constant 2.560000e+02 : f32
    %80 = vector.broadcast %cst_35 : f32 to vector<64x1xf32>
    %81 = arith.divf %79, %80 : vector<64x1xf32>
    %82 = vector.broadcast %81 : vector<64x1xf32> to vector<64x256xf32>
    %83 = arith.subf %75, %82 : vector<64x256xf32>
    %84 = arith.mulf %83, %83 : vector<64x256xf32>
    %cst_36 = arith.constant dense<0.000000e+00> : vector<64xf32>
    %85 = vector.multi_reduction <add>, %84, %cst_36 [1] : vector<64x256xf32> to vector<64xf32>
    %86 = vector.shape_cast %85 : vector<64xf32> to vector<64x1xf32>
    %cst_37 = arith.constant 2.560000e+02 : f32
    %87 = vector.broadcast %cst_37 : f32 to vector<64x1xf32>
    %88 = arith.divf %86, %87 : vector<64x1xf32>
    %89 = vector.broadcast %81 : vector<64x1xf32> to vector<64x256xf32>
    %90 = arith.subf %75, %89 : vector<64x256xf32>
    %cst_38 = arith.constant 9.99999974E-6 : f32
    %91 = vector.broadcast %cst_38 : f32 to vector<64x1xf32>
    %92 = arith.addf %88, %91 : vector<64x1xf32>
    %93 = math.rsqrt %92 : vector<64x1xf32>
    %94 = vector.broadcast %93 : vector<64x1xf32> to vector<64x256xf32>
    %95 = arith.mulf %90, %94 : vector<64x256xf32>
    %96 = vector.broadcast %76 : vector<1x256xf32> to vector<64x256xf32>
    %97 = arith.mulf %95, %96 : vector<64x256xf32>
    %98 = vector.broadcast %77 : vector<1x256xf32> to vector<64x256xf32>
    %99 = arith.addf %97, %98 : vector<64x256xf32>
    %cst_39 = arith.constant 0.000000e+00 : f32
    %100 = vector.broadcast %cst_39 : f32 to vector<64x256xf32>
    %101 = arith.maximumf %99, %100 : vector<64x256xf32>
    %c0_40 = arith.constant 0 : index
    %c0_41 = arith.constant 0 : index
    %102 = vector.load %arg11[%c0_40, %c0_41] : memref<1x256xf32, #tpu.memory_space<vmem>>, vector<1x256xf32>
    %103 = vector.broadcast %102 : vector<1x256xf32> to vector<64x256xf32>
    %104 = arith.mulf %101, %103 : vector<64x256xf32>
    %cst_42 = arith.constant dense<0.000000e+00> : vector<64xf32>
    %105 = vector.multi_reduction <add>, %104, %cst_42 [1] : vector<64x256xf32> to vector<64xf32>
    %106 = vector.shape_cast %105 : vector<64xf32> to vector<64x1xf32>
    %c0_43 = arith.constant 0 : index
    %c0_44 = arith.constant 0 : index
    %107 = vector.load %arg12[%c0_43, %c0_44] : memref<1x1xf32, #tpu.memory_space<vmem>>, vector<1x1xf32>
    %108 = vector.broadcast %107 : vector<1x1xf32> to vector<64x1xf32>
    %109 = arith.addf %106, %108 : vector<64x1xf32>
    %cst_45 = arith.constant 0.000000e+00 : f32
    %110 = vector.broadcast %cst_45 : f32 to vector<64x1xf32>
    %111 = arith.maximumf %109, %110 : vector<64x1xf32>
    %112 = vector.shape_cast %111 : vector<64x1xf32> to vector<1x1x64xf32>
    %c0_46 = arith.constant 0 : index
    %c0_47 = arith.constant 0 : index
    %c0_48 = arith.constant 0 : index
    %113 = vector.load %arg13[%c0_46, %c0_47, %c0_48] : memref<1x1x64xf32, #tpu.memory_space<vmem>>, vector<1x1x64xf32>
    tpu.vector_store %arg13[%c0_46, %c0_47, %c0_48], %112 {strides = array<i32>} : memref<1x1x64xf32, #tpu.memory_space<vmem>>, vector<1x1x64xf32>,
    return
  }
  func.func @transform_0(%arg0: i32) -> (i32, i32, i32) {
    %c0_i32 = arith.constant 0 : i32
    %c0_i32_0 = arith.constant 0 : i32
    %c0_i32_1 = arith.constant 0 : i32
    return %arg0, %c0_i32, %c0_i32_0 : i32, i32, i32
  }
  func.func @transform_1(%arg0: i32) -> (i32, i32, i32) {
    %c0_i32 = arith.constant 0 : i32
    %c0_i32_0 = arith.constant 0 : i32
    %c0_i32_1 = arith.constant 0 : i32
    return %arg0, %c0_i32, %c0_i32_0 : i32, i32, i32
  }
  func.func @transform_2(%arg0: i32) -> (i32, i32) {
    %c0_i32 = arith.constant 0 : i32
    %c0_i32_0 = arith.constant 0 : i32
    %c0_i32_1 = arith.constant 0 : i32
    return %c0_i32, %c0_i32_0 : i32, i32
  }
  func.func @transform_3(%arg0: i32) -> (i32, i32) {
    %c0_i32 = arith.constant 0 : i32
    %c0_i32_0 = arith.constant 0 : i32
    %c0_i32_1 = arith.constant 0 : i32
    return %c0_i32, %c0_i32_0 : i32, i32
  }
  func.func @transform_4(%arg0: i32) -> (i32, i32) {
    %c0_i32 = arith.constant 0 : i32
    %c0_i32_0 = arith.constant 0 : i32
    %c0_i32_1 = arith.constant 0 : i32
    return %c0_i32, %c0_i32_0 : i32, i32
  }
  func.func @transform_5(%arg0: i32) -> (i32, i32) {
    %c0_i32 = arith.constant 0 : i32
    %c0_i32_0 = arith.constant 0 : i32
    %c0_i32_1 = arith.constant 0 : i32
    return %c0_i32, %c0_i32_0 : i32, i32
  }
  func.func @transform_6(%arg0: i32) -> (i32, i32) {
    %c0_i32 = arith.constant 0 : i32
    %c0_i32_0 = arith.constant 0 : i32
    %c0_i32_1 = arith.constant 0 : i32
    return %c0_i32, %c0_i32_0 : i32, i32
  }
  func.func @transform_7(%arg0: i32) -> (i32, i32) {
    %c0_i32 = arith.constant 0 : i32
    %c0_i32_0 = arith.constant 0 : i32
    %c0_i32_1 = arith.constant 0 : i32
    return %c0_i32, %c0_i32_0 : i32, i32
  }
  func.func @transform_8(%arg0: i32) -> (i32, i32) {
    %c0_i32 = arith.constant 0 : i32
    %c0_i32_0 = arith.constant 0 : i32
    %c0_i32_1 = arith.constant 0 : i32
    return %c0_i32, %c0_i32_0 : i32, i32
  }
  func.func @transform_9(%arg0: i32) -> (i32, i32) {
    %c0_i32 = arith.constant 0 : i32
    %c0_i32_0 = arith.constant 0 : i32
    %c0_i32_1 = arith.constant 0 : i32
    return %c0_i32, %c0_i32_0 : i32, i32
  }
  func.func @transform_10(%arg0: i32) -> (i32, i32) {
    %c0_i32 = arith.constant 0 : i32
    %c0_i32_0 = arith.constant 0 : i32
    %c0_i32_1 = arith.constant 0 : i32
    return %c0_i32, %c0_i32_0 : i32, i32
  }
  func.func @transform_11(%arg0: i32) -> (i32, i32) {
    %c0_i32 = arith.constant 0 : i32
    %c0_i32_0 = arith.constant 0 : i32
    %c0_i32_1 = arith.constant 0 : i32
    return %c0_i32, %c0_i32_0 : i32, i32
  }
  func.func @transform_12(%arg0: i32) -> (i32, i32, i32) {
    %c0_i32 = arith.constant 0 : i32
    %c0_i32_0 = arith.constant 0 : i32
    %c0_i32_1 = arith.constant 0 : i32
    return %arg0, %c0_i32, %c0_i32_0 : i32, i32, i32
  }
}

</mosaic_0001>

<bundles_post_ra>
// kernel: _lambda_.1
= control target key start
LH: loop header
LB: loop body
LE: loop exit
PB: predicated region body
PF: predicated region fallthrough
CT: control target
= control target key end

     0   :  { %s5305_s23 = smov 0   ;;  %s7340_s0 = inlined_call_operand.vmem [shape: bf16[6,64,512], index: 0, kind: input, shape index: {}]   ;;  %s7341_s1 = inlined_call_operand.vmem [shape: bf16[6,4,512], index: 1, kind: input, shape index: {}]   ;;  %s7342_s2 = inlined_call_operand.vmem [shape: bf16[1536,256], index: 2, kind: input, shape index: {}]   ;;  %s7343_s3 = inlined_call_operand.vmem [shape: f32[1,256], index: 3, kind: input, shape index: {}]   ;;  %s7344_s4 = inlined_call_operand.vmem [shape: f32[1,256], index: 4, kind: input, shape index: {}]   ;;  %s7345_s5 = inlined_call_operand.vmem [shape: f32[1,256], index: 5, kind: input, shape index: {}]   ;;  %s7346_s6 = inlined_call_operand.vmem [shape: bf16[768,256], index: 6, kind: input, shape index: {}]   ;;  %s7347_s7 = inlined_call_operand.vmem [shape: f32[1,256], index: 7, kind: input, shape index: {}]   ;;  %s7348_s8 = inlined_call_operand.vmem [shape: f32[1,256], index: 8, kind: input, shape index: {}]   ;;  %s7349_s9 = inlined_call_operand.vmem [shape: f32[1,256], index: 9, kind: input, shape index: {}]   ;;  %s7350_s10 = inlined_call_operand.vmem [shape: f32[1,256], index: 10, kind: input, shape index: {}]   ;;  %s7351_s11 = inlined_call_operand.<no memory space> [shape: f32[1,1], index: 11, kind: input, shape index: {}]   ;;  %s7352_s12 = inlined_call_operand.vmem [shape: f32[6,1,64], index: 12, kind: output, shape index: {}]  }
   0x1   :  { %v17_v0 = vstv %s7351_s11 }
   0x2   :  { %18 = vst [vmem:[#allocation2] sm:$0x1] %v17_v0 }
   0x3 LB: > { %s5311_s24 = sadd.s32 4294967295, %s5233_s23   ;;  %p4172_p0 = scmp.ge.s32.totalorder %s5233_s23, 1  ;;  %s5233_s23 = sphi %s5305_s23, %s24_s23  }
   0x4   : > { %p374_p1 = scmp.lt.s32.totalorder %s5233_s23, 7 }
   0x6   : > { %p375_p2 = pnand %p4172_p0, %p374_p1 }
   0x8   : > { %378 = sbr.rel (%p375_p2) target bundleno = 1803 (0x70b), region = 68 }
   0xf   : > { %v4724_v1 = vld [vmem:[%s7342_s2 + $0x204] ss:$8 sps:$4 sm:$0xff]   ;;  %v4726_v2 = vld [vmem:[%s7342_s2 + $0x200] ss:$8 sps:$4 sm:$0xff]   ;;  %v4727_v3 = vld [vmem:[%s7342_s2 + $0x214] ss:$8 sps:$4 sm:$0xff]   ;;  %v7353_v12 = vlaneseq }
  0x10   : > { %2176 = vmatprep.subr.bf16.mxu0 %v4724_v1  ;;  %v4729_v4 = vld [vmem:[%s7342_s2 + $0x210] ss:$8 sps:$4 sm:$0xff]   ;;  %v4730_v5 = vld [vmem:[%s7342_s2 + $0x224] ss:$8 sps:$4 sm:$0xff]   ;;  %v4732_v6 = vld [vmem:[%s7342_s2 + $0x220] ss:$8 sps:$4 sm:$0xff]  }
  0x11   : > { %2177 = vmatpush1.bf16.msra.mxu0 %v4726_v2  ;;  %v4733_v7 = vld [vmem:[%s7342_s2 + $0x234] ss:$8 sps:$4 sm:$0xff]   ;;  %p419_p3 = scmp.lt.s32.totalorder %s5311_s24, 5  ;;  %v4735_v8 = vld [vmem:[%s7342_s2 + $0x230] ss:$8 sps:$4 sm:$0xff]   ;;  %v5354_v16 = vshrl.u32 %v7353_v12, 7 }
  0x12   : > { %2178 = vmatprep.subr.bf16.mxu0 %v4727_v3  ;;  %v4736_v9 = vld [vmem:[%s7342_s2 + $0x244] ss:$8 sps:$4 sm:$0xff]   ;;  %v5235_v10 = vmov 1983009808   ;;  %v4738_v13 = vld [vmem:[%s7342_s2 + $0x240] ss:$8 sps:$4 sm:$0xff]  }
  0x13   : > { %s5344_s26 = scalar_select %p419_p3, %s5311_s24, 5  ;;  %v467_v11 = vunpack.c.l.s4 %v5235_v10  ;;  %v4739_v14 = vld [vmem:[%s7342_s2 + $0x254] ss:$8 sps:$4 sm:$0xff]   ;;  %v4741_v17 = vld [vmem:[%s7342_s2 + $0x250] ss:$8 sps:$4 sm:$0xff]   ;;  %vm546_vm0 = vcmask 1040384  }
  0x14   : > { %v4742_v18 = vld [vmem:[%s7342_s2 + $0x264] ss:$8 sps:$4 sm:$0xff]   ;;  %v4744_v20 = vld [vmem:[%s7342_s2 + $0x260] ss:$8 sps:$4 sm:$0xff]   ;;  %v4745_v21 = vld [vmem:[%s7342_s2 + $0x274] ss:$8 sps:$4 sm:$0xff]  }
  0x15   : > { %2179 = vmatpush1.bf16.msra.mxu0 %v4729_v4  ;;  %s4513_s30 = sshll.u32 %s5344_s26, 7  ;;  %v468_v15 = vunpack.c.0.s8 %v467_v11  ;;  %s4514_s17 = sshll.u32 %s5344_s26, 3  ;;  %v4769_v19 = vld [vmem:[%s7342_s2 + $0x4] ss:$8 sps:$4 sm:$0xff]   ;;  %v4773_v22 = vld [vmem:[%s7342_s2] ss:$8 sps:$4 sm:$0xff]  }
  0x16   : > { %2180 = vmatprep.subr.bf16.mxu0 %v4730_v5  ;;  %2014 = vmatprep.subr.bf16.mxu1 %v4769_v19  ;;  %s5378_s13 = scalar_lea.vmem %s7340_s0, %s4513_s30  ;;  %s428_s16 = scalar_lea.vmem %s7341_s1, %s4514_s17  ;;  %v4775_v24 = vld [vmem:[%s7342_s2 + $0x14] ss:$8 sps:$4 sm:$0xff]   ;;  %v4747_v29 = vld [vmem:[%s7342_s2 + $0x270] ss:$8 sps:$4 sm:$0xff]   ;;  %v4748_v33 = vld [vmem:[%s7342_s2 + $0x284] ss:$8 sps:$4 sm:$0xff]  }
  0x17   : > { %v5384_v23 = vsub.s32 %v468_v15, %v5354_v16  ;;  %2015 = vmatpush1.bf16.msra.mxu1 %v4773_v22  ;;  %v5389_v25 = vld [vmem:[%s428_s16] sm:$0xff]  ;;  %v4785_v32 = vld [vmem:[%s7342_s2 + $0x10] ss:$8 sps:$4 sm:$0xff]   ;;  %v4751_v40 = vld [vmem:[%s7342_s2 + $0x294] ss:$8 sps:$4 sm:$0xff]   ;;  %vm793_vm2 = vcmask 1046528   ;;  %s431_s18 = scalar_lea.vmem %s7352_s12, %s5344_s26 }
  0x18   : > { %2016 = vmatprep.subr.bf16.mxu1 %v4775_v24  ;;  %v4778_v26 = vld [vmem:[%s5378_s13 + $0x4] ss:$16 sps:$4 sm:$0xff]   ;;  %v4750_v37 = vld [vmem:[%s7342_s2 + $0x280] ss:$8 sps:$4 sm:$0xff]   ;;  %v4753_v47 = vld [vmem:[%s7342_s2 + $0x290] ss:$8 sps:$4 sm:$0xff]  }
  0x19   : > { %2181 = vmatpush1.bf16.msra.mxu0 %v4732_v6  ;;  %v5393_v27 = vld [vmem:[%s5378_s13 + $0x24] ss:$16 sps:$4 sm:$0xff]   ;;  %v5397_v28 = vrot.slane %v5389_v25, %v5384_v23  ;;  %v548_v30 = vrot.slane %v4778_v26, 7  ;;  %v4793_v43 = vld [vmem:[%s7342_s2 + $0x20] ss:$8 sps:$4 sm:$0xff]   ;;  %vm2526_vm3 = vcmask 1041408  }
  0x1a   : > { %2182 = vmatprep.subr.bf16.mxu0 %v4733_v7  ;;  %v553_v31 = vrot.slane %v5393_v27, 7  ;;  %v4788_v36 = vld [vmem:[%s7342_s2 + $0x24] ss:$8 sps:$4 sm:$0xff]   ;;  %v4794_v44 = vld [vmem:[%s7342_s2 + $0x34] ss:$8 sps:$4 sm:$0xff]   ;;  %s433_s27 = ssub.s32 0, %s5311_s24 }
  0x1b   : > { %v5411_v34 = vcombine.high %v5397_v28, %v5397_v28  ;;  %2017 = vmatpush1.bf16.msra.mxu1 %v4785_v32  ;;  %vm616_vm1 = vsmask.f32 7424  ;;  %v4799_v48 = vld [vmem:[%s7342_s2 + $0x30] ss:$8 sps:$4 sm:$0xff]   ;;  %v4800_v50 = vld [vmem:[%s7342_s2 + $0x44] ss:$8 sps:$4 sm:$0xff]   ;;  %s4177_s28 = smin.u32 %s5311_s24, %s433_s27 }
  0x1c   : > { %v5416_v35 = vsel %vm546_vm0, %v548_v30, %v553_v31  ;;  %2018 = vmatprep.subr.bf16.mxu1 %v4788_v36  ;;  %v4754_v51 = vld [vmem:[%s7342_s2 + $0x2a4] ss:$8 sps:$4 sm:$0xff]   ;;  %v4805_v53 = vld [vmem:[%s7342_s2 + $0x40] ss:$8 sps:$4 sm:$0xff]   ;;  %v4806_v54 = vld [vmem:[%s7342_s2 + $0x54] ss:$8 sps:$4 sm:$0xff]  }
  0x1d   : > { %2183 = vmatpush1.bf16.msra.mxu0 %v4735_v8  ;;  %v5426_v38 = vsel %vm546_vm0, %v5411_v34, %v548_v30  ;;  %v635_v39 = vshll.u32 %v5416_v35, 16  ;;  %v4756_v55 = vld [vmem:[%s7342_s2 + $0x2a0] ss:$8 sps:$4 sm:$0xff]   ;;  %v4757_v56 = vld [vmem:[%s7342_s2 + $0x2b4] ss:$8 sps:$4 sm:$0xff]   ;;  %5181 = sdivrem.u32 %s4177_s28, 3 }
  0x1e   : > { %2184 = vmatprep.subr.bf16.mxu0 %v4736_v9  ;;  %v628_v41 = vshrl.u32 %v5426_v38, 16  ;;  %v630_v42 = vshll.u32 %v5426_v38, 16  ;;  %2046 = vmatprep.mubr.bf16.mxu1 %v5426_v38  ;;  %v4786_v57 = vld [vmem:[%s5378_s13] ss:$16 sps:$4 sm:$0xff]   ;;  %v4812_v60 = vld [vmem:[%s7342_s2 + $0x64] ss:$8 sps:$4 sm:$0xff]  }
  0x1f   : > { %v5441_v46 = vrot.slane %v635_v39, 1  ;;  %2019 = vmatpush1.bf16.msra.mxu1 %v4793_v43  ;;  %v4811_v58 = vld [vmem:[%s7342_s2 + $0x50] ss:$8 sps:$4 sm:$0xff]   ;;  %v4760_v61 = vld [vmem:[%s7342_s2 + $0x2c4] ss:$8 sps:$4 sm:$0xff]   ;;  %v547_v63 = vrot.slane %v4786_v57, 7 }
  0x20   : > { %v632_v45 = vrot.slane %v630_v42, 1  ;;  %2020 = vmatprep.subr.bf16.mxu1 %v4794_v44  ;;  %v4759_v59 = vld [vmem:[%s7342_s2 + $0x2b0] ss:$8 sps:$4 sm:$0xff]   ;;  %v4817_v0 = vld [vmem:[%s7342_s2 + $0x60] ss:$8 sps:$4 sm:$0xff]   ;;  %p432_p4 = scmp.lt.s32.totalorder %s5311_s24, 0 }
  0x21   : > { %2185 = vmatpush1.bf16.msra.mxu0 %v4738_v13  ;;  %v4787_v62 = vld [vmem:[%s5378_s13 + $0x20] ss:$16 sps:$4 sm:$0xff]   ;;  %v4818_v1 = vld [vmem:[%s7342_s2 + $0x74] ss:$8 sps:$4 sm:$0xff]   ;;  %v5497_v5 = vsel %vm546_vm0, %v5397_v28, %v547_v63  ;;  %v4824_v7 = vld [vmem:[%s7342_s2 + $0x84] ss:$8 sps:$4 sm:$0xff]  }
  0x22   : > { %2186 = vmatprep.subr.bf16.mxu0 %v4739_v14  ;;  %v633_v49 = vor.u32 %v632_v45, %v628_v41  ;;  %v4762_v2 = vld [vmem:[%s7342_s2 + $0x2c0] ss:$8 sps:$4 sm:$0xff]   ;;  %v4763_v3 = vld [vmem:[%s7342_s2 + $0x2d4] ss:$8 sps:$4 sm:$0xff]   ;;  %v551_v4 = vrot.slane %v4787_v62, 7  ;;  %v619_v11 = vshll.u32 %v5497_v5, 16 }
  0x23   : > { %2021 = vmatpush1.bf16.msra.mxu1 %v4799_v48  ;;  %v4823_v6 = vld [vmem:[%s7342_s2 + $0x70] ss:$8 sps:$4 sm:$0xff]   ;;  %v4832_v8 = vld [vmem:[%s5378_s13 + $0x44] ss:$16 sps:$4 sm:$0xff]   ;;  %v617_v22 = vshrl.u32 %v5497_v5, 16 }
  0x24   : > { %v638_v52 = vsel %vm616_vm1, %v633_v49, %v5441_v46  ;;  %2022 = vmatprep.subr.bf16.mxu1 %v4800_v50  ;;  %v4765_v9 = vld [vmem:[%s7342_s2 + $0x2d0] ss:$8 sps:$4 sm:$0xff]   ;;  %v4766_v10 = vld [vmem:[%s7342_s2 + $0x2e4] ss:$8 sps:$4 sm:$0xff]   ;;  %v5514_v13 = vsel %vm546_vm0, %v547_v63, %v551_v4  ;;  %v561_v14 = vrot.slane %v4832_v8, 7  ;;  %v621_v24 = vrot.slane %v619_v11, 1 }
  0x25   : > { %2187 = vmatpush1.bf16.msra.mxu0 %v4741_v17  ;;  %2208 = vmatprep.mubr.bf16.mxu0 %v638_v52  ;;  %v5517_v15 = vld [vmem:[%s5378_s13 + $0x40] ss:$16 sps:$4 sm:$0xff]   ;;  %v4771_v19 = vld [vmem:[%s7342_s2 + $0x2f4] ss:$8 sps:$4 sm:$0xff]   ;;  %v624_v26 = vshll.u32 %v5514_v13, 16  ;;  %v798_v8 = vrot.slane %v5416_v35, 1 }
  0x26   : > { %2188 = vmatprep.subr.bf16.mxu0 %v4742_v18  ;;  %v4768_v17 = vld [vmem:[%s7342_s2 + $0x2e0] ss:$8 sps:$4 sm:$0xff]   ;;  %v559_v32 = vrot.slane %v5517_v15, 7  ;;  %v4837_v27 = vld [vmem:[%s7342_s2 + $0x90] ss:$8 sps:$4 sm:$0xff]   ;;  %v795_v15 = vrot.slane %v5514_v13, 1  ;;  %s5182_s19 = spop.drf %5181 }
  0x27   : > { %2023 = vmatpush1.bf16.msra.mxu1 %v4805_v53  ;;  %v4829_v18 = vld [vmem:[%s7342_s2 + $0x80] ss:$8 sps:$4 sm:$0xff]   ;;  %v4839_v36 = vld [vmem:[%s7342_s2 + $0xa4] ss:$8 sps:$4 sm:$0xff]   ;;  %v626_v41 = vrot.slane %v624_v26, 1  ;;  %s437_s30 = ssub.s32 0, %s5182_s19 }
  0x28   : > { %2024 = vmatprep.subr.bf16.mxu1 %v4806_v54  ;;  %v4784_v39 = vld [vmem:[%s7342_s2 + $0x304] ss:$8 sps:$4 sm:$0xff]   ;;  %v5556_v44 = vsel %vm546_vm0, %v551_v4, %v559_v32  ;;  %v5559_v45 = vld [vmem:[%s5378_s13 + $0x60] ss:$16 sps:$4 sm:$0xff]   ;;  %v4845_v49 = vld [vmem:[%s7342_s2 + $0xb4] ss:$8 sps:$4 sm:$0xff]   ;;  %s7386_s30 = smov (!%p432_p4, %s437_s30), %s5182_s19 }
  0x29   : > { %2189 = vmatpush1.bf16.msra.mxu0 %v4744_v20  ;;  %v4830_v20 = vld [vmem:[%s7342_s2 + $0x94] ss:$8 sps:$4 sm:$0xff]   ;;  %v665_v52 = vshll.u32 %v5556_v44, 16  ;;  %v567_v57 = vrot.slane %v5559_v45, 7  ;;  %v4798_v63 = vld [vmem:[%s7342_s2 + $0x324] ss:$8 sps:$4 sm:$0xff]  }
  0x2a   : > { %2190 = vmatprep.subr.bf16.mxu0 %v4745_v21  ;;  %v5534_v21 = vsel %vm546_vm0, %v553_v31, %v561_v14  ;;  %v4774_v31 = vld [vmem:[%s7342_s2 + $0x2f0] ss:$8 sps:$4 sm:$0xff]   ;;  %v4792_v53 = vld [vmem:[%s7342_s2 + $0x314] ss:$8 sps:$4 sm:$0xff]   ;;  %v4859_v4 = vld [vmem:[%s7342_s2 + $0xc0] ss:$8 sps:$4 sm:$0xff]  }
  0x2b   : > { %2025 = vmatpush1.bf16.msra.mxu1 %v4811_v58  ;;  %v673_v30 = vshll.u32 %v5534_v21, 16  ;;  %v4852_v58 = vld [vmem:[%s7342_s2 + $0xb0] ss:$8 sps:$4 sm:$0xff]   ;;  %v667_v62 = vrot.slane %v665_v52, 1  ;;  %v4796_v11 = vld [vmem:[%s7342_s2 + $0x320] ss:$8 sps:$4 sm:$0xff]  }
  0x2c   : > { %2026 = vmatprep.subr.bf16.mxu1 %v4812_v60  ;;  %v4790_v60 = vld [vmem:[%s7342_s2 + $0x310] ss:$8 sps:$4 sm:$0xff]   ;;  %p4179_p5 = scmp.lt.s32.totalorder %s7386_s30, 0  ;;  %s443_s17 = sadd.s32 3, %s7386_s30 }
  0x2d   : > { %2191 = vmatpush1.bf16.msra.mxu0 %v4747_v29  ;;  %v669_v29 = vshrl.u32 %v5416_v35, 16  ;;  %v675_v43 = vrot.slane %v673_v30, 1  ;;  %v4810_v30 = vld [vmem:[%s7342_s2 + $0x344] ss:$8 sps:$4 sm:$0xff]  }
  0x2e   : > { %2192 = vmatprep.subr.bf16.mxu0 %v4748_v33  ;;  %v4847_v33 = vld [vmem:[%s5378_s13 + $0x64] ss:$16 sps:$4 sm:$0xff]   ;;  %s7388_s17 = smov (!%p4179_p5, %s443_s17), %s7386_s30 }
  0x2f   : > { %2027 = vmatpush1.bf16.msra.mxu1 %v4817_v0  ;;  %v671_v42 = vor.u32 %v669_v29, %v5441_v46  ;;  %v4782_v46 = vld [vmem:[%s7342_s2 + $0x300] ss:$8 sps:$4 sm:$0xff]   ;;  %s4180_s20 = sshll.u32 %s7388_s17, 6 }
  0x30   : > { %2028 = vmatprep.subr.bf16.mxu1 %v4818_v1  ;;  %s4181_s21 = sadd.s32 4294967295, %s4180_s20 }
  0x31   : > { %2193 = vmatpush1.bf16.msra.mxu0 %v4750_v37  ;;  %v569_v37 = vrot.slane %v4847_v33, 7  ;;  %v676_v54 = vsel %vm616_vm1, %v671_v42, %v675_v43  ;;  %v4872_v42 = vld [vmem:[%s7342_s2 + $0xf4] ss:$8 sps:$4 sm:$0xff]  }
  0x32   : > { %2194 = vmatprep.subr.bf16.mxu0 %v4751_v40  ;;  %v622_v40 = vor.u32 %v621_v24, %v617_v22  ;;  %v4802_v22 = vld [vmem:[%s7342_s2 + $0x330] ss:$8 sps:$4 sm:$0xff]  }
  0x33   : > { %2029 = vmatpush1.bf16.msra.mxu1 %v4823_v6  ;;  %v5565_v48 = vsel %vm546_vm0, %v561_v14, %v569_v37  ;;  %v5605_v6 = vsel %vm546_vm0, %v569_v37, %v5411_v34  ;;  %v4865_v24 = vld [vmem:[%s7342_s2 + $0xd0] ss:$8 sps:$4 sm:$0xff]   ;;  %v4871_v37 = vld [vmem:[%s7342_s2 + $0xe0] ss:$8 sps:$4 sm:$0xff]  }
  0x34   : > { %2030 = vmatprep.subr.bf16.mxu1 %v4824_v7  ;;  %v627_v50 = vsel %vm616_vm1, %v622_v40, %v626_v41  ;;  %v797_v7 = vrot.slane %v5426_v38, 1 }
  0x35   : > { %2195 = vmatpush1.bf16.msra.mxu0 %v4753_v47  ;;  %v4844_v47 = vld [vmem:[%s7342_s2 + $0xa0] ss:$8 sps:$4 sm:$0xff]  }
  0x36   : > { %2196 = vmatprep.subr.bf16.mxu0 %v4754_v51  ;;  %v661_v51 = vshrl.u32 %v5514_v13, 16  ;;  %v5622_v14 = vsel %vm793_vm2, %v797_v7, %v798_v8 }
  0x37   : > { %2031 = vmatpush1.bf16.msra.mxu1 %v4829_v18 }
  0x38   : > { %2032 = vmatprep.subr.bf16.mxu1 %v4830_v20  ;;  %v735_v20 = vshll.u32 %v5605_v6, 16 }
  0x39   : > { %2197 = vmatpush1.bf16.msra.mxu0 %v4756_v55  ;;  %v701_v55 = vshrl.u32 %v5534_v21, 16 }
  0x3a   : > { %2198 = vmatprep.subr.bf16.mxu0 %v4757_v56  ;;  %v705_v56 = vshll.u32 %v5565_v48, 16 }
  0x3b   : > { %2033 = vmatpush1.bf16.msra.mxu1 %v4837_v27  ;;  %v703_v0 = vor.u32 %v701_v55, %v675_v43  ;;  %v4814_v55 = vld [vmem:[%s7342_s2 + $0x350] ss:$8 sps:$4 sm:$0xff]  }
  0x3c   : > { %2034 = vmatprep.subr.bf16.mxu1 %v4839_v36  ;;  %v707_v1 = vrot.slane %v705_v56, 1  ;;  %v5653_v36 = vsel %vm546_vm0, %v567_v57, %v5397_v28  ;;  %v4808_v28 = vld [vmem:[%s7342_s2 + $0x340] ss:$8 sps:$4 sm:$0xff]  }
  0x3d   : > { %2199 = vmatpush1.bf16.msra.mxu0 %v4759_v59  ;;  %v4854_v59 = vld [vmem:[%s7342_s2 + $0xc4] ss:$8 sps:$4 sm:$0xff]  }
  0x3e   : > { %2200 = vmatprep.subr.bf16.mxu0 %v4760_v61  ;;  %v663_v61 = vor.u32 %v661_v51, %v626_v41  ;;  %v708_v18 = vsel %vm616_vm1, %v703_v0, %v707_v1  ;;  %v5664_v41 = vld [vmem:[%s5378_s13 + $0x2c] ss:$16 sps:$4 sm:$0xff]   ;;  %v4877_v51 = vld [vmem:[%s7342_s2 + $0xf0] ss:$8 sps:$4 sm:$0xff]   ;;  %v4820_v0 = vld [vmem:[%s7342_s2 + $0x360] ss:$8 sps:$4 sm:$0xff]  }
  0x3f   : > { %2035 = vmatpush1.bf16.msra.mxu1 %v4844_v47  ;;  %v557_v52 = vrot.slane %v5664_v41, 7 }
  0x40   : > { %2036 = vmatprep.subr.bf16.mxu1 %v4845_v49  ;;  %v668_v34 = vsel %vm616_vm1, %v663_v61, %v667_v62  ;;  %v728_v49 = vshll.u32 %v5653_v36, 16  ;;  %v4878_v61 = vld [vmem:[%s7342_s2 + $0x100] ss:$8 sps:$4 sm:$0xff]  }
  0x41   : > { %2201 = vmatpush1.bf16.msra.mxu0 %v4762_v2  ;;  %v5596_v2 = vsel %vm546_vm0, %v559_v32, %v567_v57  ;;  %v4866_v32 = vld [vmem:[%s7342_s2 + $0xe4] ss:$8 sps:$4 sm:$0xff]  }
  0x42   : > { %2202 = vmatprep.subr.bf16.mxu0 %v4763_v3  ;;  %v465_v3 = vcombine.high %v5389_v25, %v5389_v25  ;;  %v4860_v25 = vld [vmem:[%s7342_s2 + $0xd4] ss:$8 sps:$4 sm:$0xff]   ;;  %v697_v38 = vshll.u32 %v5596_v2, 16  ;;  %v725_v47 = vshrl.u32 %v5596_v2, 16  ;;  %v730_v57 = vrot.slane %v728_v49, 1 }
  0x43   : > { %2037 = vmatpush1.bf16.msra.mxu1 %v4852_v58  ;;  %v756_v58 = vshrl.u32 %v5605_v6, 16 }
  0x44   : > { %2038 = vmatprep.subr.bf16.mxu1 %v4854_v59  ;;  %v5638_v26 = vrot.slane %v465_v3, %v5384_v23  ;;  %v699_v33 = vrot.slane %v697_v38, 1  ;;  %v4822_v59 = vld [vmem:[%s7342_s2 + $0x364] ss:$8 sps:$4 sm:$0xff]  }
  0x45   : > { %2203 = vmatpush1.bf16.msra.mxu0 %v4765_v9  ;;  %v693_v9 = vshrl.u32 %v5556_v44, 16  ;;  %v4836_v38 = vld [vmem:[%s7342_s2 + $0x384] ss:$8 sps:$4 sm:$0xff]  }
  0x46   : > { %2204 = vmatprep.subr.bf16.mxu0 %v4766_v10  ;;  %v794_v10 = vrot.slane %v5497_v5, 1  ;;  %v5661_v40 = vcombine.high %v5638_v26, %v5638_v26  ;;  %v727_v56 = vor.u32 %v725_v47, %v699_v33  ;;  %v4914_v47 = vld [vmem:[%s7342_s2 + $0x150] ss:$8 sps:$4 sm:$0xff]  }
  0x47   : > { %2039 = vmatpush1.bf16.msra.mxu1 %v4859_v4  ;;  %v695_v23 = vor.u32 %v693_v9, %v667_v62 }
  0x48   : > { %v5643_v29 = vsel %vm793_vm2, %v794_v10, %v795_v15  ;;  %2040 = vmatprep.subr.bf16.mxu1 %v4860_v25  ;;  %v731_v3 = vsel %vm616_vm1, %v727_v56, %v730_v57  ;;  %v4884_v10 = vld [vmem:[%s7342_s2 + $0x110] ss:$8 sps:$4 sm:$0xff]   ;;  %v5819_v56 = vld [vmem:[%s5378_s13 + $0x4c] ss:$16 sps:$4 sm:$0xff]  }
  0x49   : > { %2205 = vmatpush1.bf16.msra.mxu0 %v4768_v17  ;;  %v4804_v17 = vld [vmem:[%s7342_s2 + $0x334] ss:$8 sps:$4 sm:$0xff]   ;;  %v700_v45 = vsel %vm616_vm1, %v695_v23, %v699_v33 }
  0x4a   : > { %2206 = vmatprep.subr.bf16.mxu0 %v4771_v19  ;;  %v732_v19 = vshrl.u32 %v5565_v48, 16  ;;  %v4843_v23 = vld [vmem:[%s7342_s2 + $0x394] ss:$8 sps:$4 sm:$0xff]  }
  0x4b   : > { %2041 = vmatpush1.bf16.msra.mxu1 %v4865_v24  ;;  %v808_v24 = vrot.slane %v5534_v21, 1 }
  0x4c   : > { %v734_v27 = vor.u32 %v732_v19, %v707_v1  ;;  %2042 = vmatprep.subr.bf16.mxu1 %v4866_v32  ;;  %v4828_v1 = vld [vmem:[%s7342_s2 + $0x374] ss:$8 sps:$4 sm:$0xff]   ;;  %v4896_v19 = vld [vmem:[%s7342_s2 + $0x120] ss:$8 sps:$4 sm:$0xff]   ;;  %v806_v32 = vrot.slane %v5556_v44, 1 }
  0x4d   : > { %2207 = vmatpush1.bf16.msra.mxu0 %v4774_v31  ;;  %v737_v31 = vrot.slane %v735_v20, 1 }
  0x4e   : > { %2257 = vmatprep.subr.bf16.mxu0 %v4784_v39  ;;  %v4889_v39 = vld [vmem:[%s5378_s13 + $0xc] ss:$16 sps:$4 sm:$0xff]  }
  0x4f   : > { %v550_v43 = vrot.slane %v4889_v39, 7  ;;  %2043 = vmatpush1.bf16.msra.mxu1 %v4871_v37  ;;  %v758_v4 = vor.u32 %v756_v58, %v737_v31  ;;  %v5764_v37 = vsel %vm793_vm2, %v795_v15, %v806_v32  ;;  %v4916_v15 = vld [vmem:[%s7342_s2 + $0x154] ss:$8 sps:$4 sm:$0xff]   ;;  %v4849_v39 = vld [vmem:[%s7342_s2 + $0x3a0] ss:$8 sps:$4 sm:$0xff]   ;;  %v824_v58 = vrot.slane %v5605_v6, 1 }
  0x50   : > { %2209 = vmatmul.mubr.bf16.vlgmr.msra.gmra.mrb[0].mxu0 %v627_v50  ;;  %v738_v50 = vsel %vm616_vm1, %v734_v27, %v737_v31  ;;  %2044 = vmatprep.subr.bf16.mxu1 %v4872_v42  ;;  %v5755_v27 = vsel %vm793_vm2, %v798_v8, %v808_v24  ;;  %v4902_v31 = vld [vmem:[%s7342_s2 + $0x130] ss:$8 sps:$4 sm:$0xff]   ;;  %v4858_v42 = vld [vmem:[%s7342_s2 + $0x3b4] ss:$8 sps:$4 sm:$0xff]  }
  0x51   : > { %2258 = vmatpush1.bf16.msra.mxu0 %v4782_v46  ;;  %2218 = vmatprep.mubr.bf16.mxu0 %v676_v54  ;;  %v4816_v46 = vld [vmem:[%s7342_s2 + $0x354] ss:$8 sps:$4 sm:$0xff]   ;;  %v4880_v54 = vld [vmem:[%s7342_s2 + $0x104] ss:$8 sps:$4 sm:$0xff]   ;;  %v5704_v62 = vsel %vm546_vm0, %v550_v43, %v557_v52  ;;  %v4841_v8 = vld [vmem:[%s7342_s2 + $0x390] ss:$8 sps:$4 sm:$0xff]  }
  0x52   : > { %2259 = vmatprep.subr.bf16.mxu0 %v4792_v53  ;;  %v5685_v53 = vsel %vm546_vm0, %v5661_v40, %v550_v43  ;;  %v657_v25 = vshll.u32 %v5704_v62, 16  ;;  %v816_v43 = vrot.slane %v5565_v48, 1 }
  0x53   : > { %2045 = vmatpush1.bf16.msra.mxu1 %v4877_v51  ;;  %v650_v7 = vshrl.u32 %v5685_v53, 16  ;;  %v5813_v51 = vld [vmem:[%s5378_s13 + $0x28] ss:$16 sps:$4 sm:$0xff]  }
  0x54   : > { %2095 = vmatprep.subr.bf16.mxu1 %v4880_v54  ;;  %v5796_v49 = vsel %vm793_vm2, %v808_v24, %v816_v43 }
  0x55   : > { %2260 = vmatpush1.bf16.msra.mxu0 %v4790_v60  ;;  %v652_v60 = vshll.u32 %v5685_v53, 16 }
  0x56   : > { %2261 = vmatprep.subr.bf16.mxu0 %v4798_v63  ;;  %v4886_v63 = vld [vmem:[%s7342_s2 + $0x114] ss:$8 sps:$4 sm:$0xff]   ;;  %2047 = vmatmul.mubr.bf16.vlgmr.msra.gmra.mrb[0].mxu1 %v5497_v5  ;;  %v4898_v5 = vld [vmem:[%s7342_s2 + $0x124] ss:$8 sps:$4 sm:$0xff]  }
  0x57   : > { %v654_v9 = vrot.slane %v652_v60, 1  ;;  %2096 = vmatpush1.bf16.msra.mxu1 %v4878_v61  ;;  %2056 = vmatprep.mubr.bf16.mxu1 %v5416_v35  ;;  %v4910_v35 = vld [vmem:[%s7342_s2 + $0x144] ss:$8 sps:$4 sm:$0xff]   ;;  %v4870_v60 = vld [vmem:[%s7342_s2 + $0x3d4] ss:$8 sps:$4 sm:$0xff]   ;;  %v555_v61 = vrot.slane %v5813_v51, 7 }
  0x58   : > { %2219 = vmatmul.mubr.bf16.gmra.mrb[4].mxu0 %v668_v34  ;;  %2097 = vmatprep.subr.bf16.mxu1 %v4886_v63  ;;  %v4826_v34 = vld [vmem:[%s7342_s2 + $0x370] ss:$8 sps:$4 sm:$0xff]  }
  0x59   : > { %2262 = vmatpush1.bf16.msra.mxu0 %v4796_v11  ;;  %2228 = vmatprep.mubr.bf16.mxu0 %v708_v18  ;;  %v753_v11 = vshrl.u32 %v5653_v36, 16  ;;  %v5733_v18 = vrot.slane %v657_v25, 1  ;;  %v4876_v25 = vld [vmem:[%s7342_s2 + $0x3e4] ss:$8 sps:$4 sm:$0xff]  }
  0x5a   : > { %2263 = vmatprep.subr.bf16.mxu0 %v4804_v17  ;;  %v655_v17 = vor.u32 %v654_v9, %v650_v7  ;;  %v4934_v7 = vld [vmem:[%s7342_s2 + $0x184] ss:$8 sps:$4 sm:$0xff]  }
  0x5b   : > { %2098 = vmatpush1.bf16.msra.mxu1 %v4884_v10  ;;  %v755_v20 = vor.u32 %v753_v11, %v730_v57  ;;  %v4928_v57 = vld [vmem:[%s7342_s2 + $0x174] ss:$8 sps:$4 sm:$0xff]   ;;  %v5861_v11 = vld [vmem:[%s5378_s13 + $0x48] ss:$16 sps:$4 sm:$0xff]  }
  0x5c   : > { %2099 = vmatprep.subr.bf16.mxu1 %v4898_v5  ;;  %v660_v33 = vsel %vm616_vm1, %v655_v17, %v5733_v18  ;;  %v4874_v5 = vld [vmem:[%s7342_s2 + $0x3e0] ss:$8 sps:$4 sm:$0xff]   ;;  %v5875_v17 = vld [vmem:[%s5378_s13 + $0x6c] ss:$16 sps:$4 sm:$0xff]  }
  0x5d   : > { %2264 = vmatpush1.bf16.msra.mxu0 %v4802_v22  ;;  %v4904_v22 = vld [vmem:[%s7342_s2 + $0x134] ss:$8 sps:$4 sm:$0xff]  }
  0x5e   : > { %2265 = vmatprep.subr.bf16.mxu0 %v4810_v30  ;;  %v4834_v30 = vld [vmem:[%s7342_s2 + $0x380] ss:$8 sps:$4 sm:$0xff]   ;;  %2057 = vmatmul.mubr.bf16.gmra.mrb[4].mxu1 %v5514_v13  ;;  %v4851_v13 = vld [vmem:[%s7342_s2 + $0x3a4] ss:$8 sps:$4 sm:$0xff]  }
  0x5f   : > { %2100 = vmatpush1.bf16.msra.mxu1 %v4896_v19  ;;  %2066 = vmatprep.mubr.bf16.mxu1 %v5534_v21  ;;  %v4908_v21 = vld [vmem:[%s7342_s2 + $0x140] ss:$8 sps:$4 sm:$0xff]   ;;  %v4883_v19 = vld [vmem:[%s7342_s2 + $0x3f4] ss:$8 sps:$4 sm:$0xff]  }
  0x60   : > { %2229 = vmatmul.mubr.bf16.gmra.mrb[8].mxu0 %v700_v45  ;;  %2101 = vmatprep.subr.bf16.mxu1 %v4904_v22  ;;  %v814_v45 = vrot.slane %v5596_v2, 1 }
  0x61   : > { %2266 = vmatpush1.bf16.msra.mxu0 %v4808_v28  ;;  %2238 = vmatprep.mubr.bf16.mxu0 %v738_v50  ;;  %v4887_v28 = vld [vmem:[%s5378_s13 + $0x8] ss:$16 sps:$4 sm:$0xff]  }
  0x62   : > { %2267 = vmatprep.subr.bf16.mxu0 %v4816_v46  ;;  %v4856_v46 = vld [vmem:[%s7342_s2 + $0x3b0] ss:$8 sps:$4 sm:$0xff]   ;;  %v5807_v50 = vsel %vm793_vm2, %v806_v32, %v814_v45  ;;  %v549_v54 = vrot.slane %v4887_v28, 7 }
  0x63   : > { %2102 = vmatpush1.bf16.msra.mxu1 %v4902_v31  ;;  %v573_v31 = vrot.slane %v5875_v17, 7  ;;  %v5916_v28 = vld [vmem:[%s5378_s13 + $0x68] ss:$16 sps:$4 sm:$0xff]   ;;  %v4970_v17 = vld [vmem:[%s7342_s2 + $0x1d4] ss:$8 sps:$4 sm:$0xff]  }
  0x64   : > { %2103 = vmatprep.subr.bf16.mxu1 %v4910_v35  ;;  %v5834_v63 = vsel %vm546_vm0, %v5638_v26, %v549_v54  ;;  %v5858_v10 = vsel %vm546_vm0, %v549_v54, %v555_v61 }
  0x65   : > { %2268 = vmatpush1.bf16.msra.mxu0 %v4814_v55  ;;  %v4920_v55 = vld [vmem:[%s7342_s2 + $0x160] ss:$8 sps:$4 sm:$0xff]   ;;  %v641_v9 = vshll.u32 %v5834_v63, 16  ;;  %v639_v22 = vshrl.u32 %v5834_v63, 16  ;;  %v646_v41 = vshll.u32 %v5858_v10, 16  ;;  %v677_v51 = vshrl.u32 %v5858_v10, 16 }
  0x66   : > { %2269 = vmatprep.subr.bf16.mxu0 %v4822_v59  ;;  %2067 = vmatmul.mubr.bf16.gmra.mrb[8].mxu1 %v5556_v44  ;;  %v4922_v44 = vld [vmem:[%s7342_s2 + $0x164] ss:$8 sps:$4 sm:$0xff]   ;;  %v4862_v59 = vld [vmem:[%s7342_s2 + $0x3c0] ss:$8 sps:$4 sm:$0xff]  }
  0x67   : > { %2104 = vmatpush1.bf16.msra.mxu1 %v4908_v21  ;;  %2076 = vmatprep.mubr.bf16.mxu1 %v5565_v48  ;;  %v4864_v48 = vld [vmem:[%s7342_s2 + $0x3c4] ss:$8 sps:$4 sm:$0xff]   ;;  %v643_v24 = vrot.slane %v641_v9, 1 }
  0x68   : > { %2239 = vmatmul.mubr.bf16.gmra.mrb[12].mxu0 %v731_v3  ;;  %2105 = vmatprep.subr.bf16.mxu1 %v4916_v15  ;;  %v565_v3 = vrot.slane %v5819_v56, 7  ;;  %v4895_v21 = vld [vmem:[%s7342_s2 + $0x404] ss:$8 sps:$4 sm:$0xff]  }
  0x69   : > { %2270 = vmatpush1.bf16.msra.mxu0 %v4820_v0  ;;  %2248 = vmatprep.mubr.bf16.mxu0 %v758_v4  ;;  %v5840_v0 = vsel %vm793_vm2, %v816_v43, %v824_v58  ;;  %v4868_v4 = vld [vmem:[%s7342_s2 + $0x3d0] ss:$8 sps:$4 sm:$0xff]   ;;  %v644_v15 = vor.u32 %v643_v24, %v639_v22 }
  0x6a   : > { %2271 = vmatprep.subr.bf16.mxu0 %v4828_v1  ;;  %v4926_v1 = vld [vmem:[%s7342_s2 + $0x170] ss:$8 sps:$4 sm:$0xff]  }
  0x6b   : > { %2106 = vmatpush1.bf16.msra.mxu1 %v4914_v47  ;;  %v5922_v47 = vsel %vm546_vm0, %v565_v3, %v573_v31 }
  0x6c   : > { %2107 = vmatprep.subr.bf16.mxu1 %v4922_v44 }
  0x6d   : > { %2272 = vmatpush1.bf16.msra.mxu0 %v4826_v34  ;;  %v4932_v34 = vld [vmem:[%s7342_s2 + $0x180] ss:$8 sps:$4 sm:$0xff]  }
  0x6e   : > { %2273 = vmatprep.subr.bf16.mxu0 %v4836_v38  ;;  %2077 = vmatmul.mubr.bf16.gmra.mrb[12].mxu1 %v5596_v2  ;;  %v5872_v38 = vsel %vm546_vm0, %v557_v52, %v565_v3  ;;  %v822_v52 = vrot.slane %v5653_v36, 1 }
  0x6f   : > { %2108 = vmatpush1.bf16.msra.mxu1 %v4920_v55  ;;  %2086 = vmatprep.mubr.bf16.mxu1 %v5605_v6  ;;  %v689_v32 = vshll.u32 %v5872_v38, 16  ;;  %v717_v56 = vshrl.u32 %v5872_v38, 16  ;;  %v5018_v6 = vld [vmem:[%s7342_s2 + $0x594] ss:$8 sps:$4 sm:$0xff]  }
  0x70   : > { %2249 = vmatmul.mubr.bf16.gmra.mrb[16].mxu0 %v755_v20  ;;  %2109 = vmatprep.subr.bf16.mxu1 %v4928_v57  ;;  %v4940_v20 = vld [vmem:[%s7342_s2 + $0x194] ss:$8 sps:$4 sm:$0xff]   ;;  %v5900_v35 = vsel %vm793_vm2, %v814_v45, %v822_v52  ;;  %v4947_v45 = vld [vmem:[%s7342_s2 + $0x1a0] ss:$8 sps:$4 sm:$0xff]   ;;  %v721_v57 = vshll.u32 %v5922_v47, 16 }
  0x71   : > { %2274 = vmatpush1.bf16.msra.mxu0 %v4834_v30  ;;  %2289 = vmatprep.mubr.bf16.mxu0 %v660_v33  ;;  %v685_v30 = vshrl.u32 %v5704_v62, 16  ;;  %v4938_v33 = vld [vmem:[%s7342_s2 + $0x190] ss:$8 sps:$4 sm:$0xff]  }
  0x72   : > { %2275 = vmatprep.subr.bf16.mxu0 %v4843_v23  ;;  %v563_v23 = vrot.slane %v5861_v11, 7 }
  0x73   : > { %2110 = vmatpush1.bf16.msra.mxu1 %v4926_v1  ;;  %v687_v2 = vor.u32 %v685_v30, %v5733_v18  ;;  %v4955_v18 = vld [vmem:[%s7342_s2 + $0x1b4] ss:$8 sps:$4 sm:$0xff]   ;;  %v4899_v1 = vld [vmem:[%s7342_s2 + $0x410] ss:$8 sps:$4 sm:$0xff]   ;;  %v746_v30 = vshrl.u32 %v5922_v47, 16 }
  0x74   : > { %2111 = vmatprep.subr.bf16.mxu1 %v4934_v7  ;;  %v5913_v43 = vsel %vm546_vm0, %v555_v61, %v563_v23  ;;  %v4964_v61 = vld [vmem:[%s7342_s2 + $0x1c4] ss:$8 sps:$4 sm:$0xff]  }
  0x75   : > { %2276 = vmatpush1.bf16.msra.mxu0 %v4841_v8  ;;  %v4881_v8 = vld [vmem:[%s7342_s2 + $0x3f0] ss:$8 sps:$4 sm:$0xff]   ;;  %v681_v54 = vshll.u32 %v5913_v43, 16  ;;  %v4907_v7 = vld [vmem:[%s7342_s2 + $0x424] ss:$8 sps:$4 sm:$0xff]   ;;  %v709_v22 = vshrl.u32 %v5913_v43, 16 }
  0x76   : > { %2277 = vmatprep.subr.bf16.mxu0 %v4851_v13  ;;  %2087 = vmatmul.mubr.bf16.gmra.mrb[16].mxu1 %v5653_v36  ;;  %v4949_v13 = vld [vmem:[%s7342_s2 + $0x1a4] ss:$8 sps:$4 sm:$0xff]   ;;  %v5024_v36 = vld [vmem:[%s7342_s2 + $0x5b4] ss:$8 sps:$4 sm:$0xff]  }
  0x77   : > { %2112 = vmatpush1.bf16.msra.mxu1 %v4932_v34  ;;  %2127 = vmatprep.mubr.bf16.mxu1 %v5685_v53  ;;  %v5960_v34 = vsel %vm546_vm0, %v573_v31, %v5661_v40  ;;  %v4913_v40 = vld [vmem:[%s7342_s2 + $0x434] ss:$8 sps:$4 sm:$0xff]   ;;  %v4976_v31 = vld [vmem:[%s7342_s2 + $0x1e4] ss:$8 sps:$4 sm:$0xff]  }
  0x78   : > { %2113 = vmatprep.subr.bf16.mxu1 %v4940_v20 }
  0x79   : > { %2278 = vmatpush1.bf16.msra.mxu0 %v4849_v39  ;;  %v648_v39 = vrot.slane %v646_v41, 1 }
  0x7a   : > { %2279 = vmatprep.subr.bf16.mxu0 %v4858_v42  ;;  %v691_v42 = vrot.slane %v689_v32, 1  ;;  %v749_v32 = vshll.u32 %v5960_v34, 16 }
  0x7b   : > { %2114 = vmatpush1.bf16.msra.mxu1 %v4938_v33  ;;  %v649_v44 = vsel %vm616_vm1, %v644_v15, %v648_v39  ;;  %v679_v3 = vor.u32 %v677_v51, %v648_v39  ;;  %v4968_v33 = vld [vmem:[%s7342_s2 + $0x1d0] ss:$8 sps:$4 sm:$0xff]   ;;  %v810_v39 = vrot.slane %v5913_v43, 1  ;;  %v4925_v51 = vld [vmem:[%s7342_s2 + $0x454] ss:$8 sps:$4 sm:$0xff]  }
  0x7c   : > { %2115 = vmatprep.subr.bf16.mxu1 %v4949_v13  ;;  %v692_v55 = vsel %vm616_vm1, %v687_v2, %v691_v42  ;;  %v719_v9 = vor.u32 %v717_v56, %v691_v42  ;;  %v820_v13 = vrot.slane %v5922_v47, 1  ;;  %v4919_v42 = vld [vmem:[%s7342_s2 + $0x444] ss:$8 sps:$4 sm:$0xff]  }
  0x7d   : > { %2280 = vmatpush1.bf16.msra.mxu0 %v4856_v46  ;;  %v4893_v46 = vld [vmem:[%s7342_s2 + $0x400] ss:$8 sps:$4 sm:$0xff]  }
  0x7e   : > { %2281 = vmatprep.subr.bf16.mxu0 %v4864_v48  ;;  %v4901_v48 = vld [vmem:[%s7342_s2 + $0x414] ss:$8 sps:$4 sm:$0xff]  }
  0x7f   : > { %2116 = vmatpush1.bf16.msra.mxu1 %v4947_v45  ;;  %v751_v45 = vrot.slane %v749_v32, 1 }
  0x80   : > { %2117 = vmatprep.subr.bf16.mxu1 %v4955_v18 }
  0x81   : > { %2282 = vmatpush1.bf16.msra.mxu0 %v4862_v59  ;;  %v571_v59 = vrot.slane %v5916_v28, 7 }
  0x82   : > { %2283 = vmatprep.subr.bf16.mxu0 %v4870_v60  ;;  %v4953_v60 = vld [vmem:[%s7342_s2 + $0x1b0] ss:$8 sps:$4 sm:$0xff]  }
  0x83   : > { %v5953_v11 = vsel %vm546_vm0, %v563_v23, %v571_v59  ;;  %2118 = vmatpush1.bf16.msra.mxu1 %v4953_v60  ;;  %v4911_v23 = vld [vmem:[%s7342_s2 + $0x430] ss:$8 sps:$4 sm:$0xff]  }
  0x84   : > { %2119 = vmatprep.subr.bf16.mxu1 %v4964_v61  ;;  %v713_v24 = vshll.u32 %v5953_v11, 16  ;;  %v818_v2 = vrot.slane %v5953_v11, 1  ;;  %v739_v56 = vshrl.u32 %v5953_v11, 16  ;;  %v4923_v61 = vld [vmem:[%s7342_s2 + $0x450] ss:$8 sps:$4 sm:$0xff]  }
  0x85   : > { %2284 = vmatpush1.bf16.msra.mxu0 %v4868_v4  ;;  %v683_v4 = vrot.slane %v681_v54, 1  ;;  %v4982_v54 = vld [vmem:[%s7342_s2 + $0x1f4] ss:$8 sps:$4 sm:$0xff]  }
  0x86   : > { %2285 = vmatprep.subr.bf16.mxu0 %v4876_v25  ;;  %v723_v25 = vrot.slane %v721_v57, 1  ;;  %v715_v15 = vrot.slane %v713_v24, 1  ;;  %v4945_v24 = vld [vmem:[%s7342_s2 + $0x484] ss:$8 sps:$4 sm:$0xff]  }
  0x87   : > { %v684_v20 = vsel %vm616_vm1, %v679_v3, %v683_v4  ;;  %v828_v3 = vrot.slane %v5960_v34, 1 }
  0x88   : > { %v724_v41 = vsel %vm616_vm1, %v719_v9, %v723_v25  ;;  %v748_v28 = vor.u32 %v746_v30, %v723_v25  ;;  %v762_v9 = vshrl.u32 %v5960_v34, 16  ;;  %v4952_v30 = vld [vmem:[%s7342_s2 + $0x494] ss:$8 sps:$4 sm:$0xff]  }
  0x89   : > { %2286 = vmatpush1.bf16.msra.mxu0 %v4874_v5  ;;  %v4962_v5 = vld [vmem:[%s7342_s2 + $0x1c0] ss:$8 sps:$4 sm:$0xff]   ;;  %v6039_v25 = vsel %vm793_vm2, %v820_v13, %v828_v3 }
  0x8a   : > { %2287 = vmatprep.subr.bf16.mxu0 %v4883_v19  ;;  %v4905_v19 = vld [vmem:[%s7342_s2 + $0x420] ss:$8 sps:$4 sm:$0xff]   ;;  %2120 = vmatpush1.bf16.msra.mxu1 %v4962_v5  ;;  %v752_v60 = vsel %vm616_vm1, %v748_v28, %v751_v45  ;;  %v4985_v28 = vld [vmem:[%s7342_s2 + $0x4e4] ss:$8 sps:$4 sm:$0xff]  }
  0x8b   : > { %2121 = vmatprep.subr.bf16.mxu1 %v4970_v17  ;;  %v4929_v5 = vld [vmem:[%s7342_s2 + $0x460] ss:$8 sps:$4 sm:$0xff]   ;;  %v4937_v17 = vld [vmem:[%s7342_s2 + $0x474] ss:$8 sps:$4 sm:$0xff]  }
  0x8d   : > { %2288 = vmatpush1.bf16.msra.mxu0 %v4881_v8  ;;  %v812_v8 = vrot.slane %v5872_v38, 1 }
  0x8e   : > { %2338 = vmatprep.subr.bf16.mxu0 %v4895_v21  ;;  %v711_v21 = vor.u32 %v709_v22, %v683_v4  ;;  %2122 = vmatpush1.bf16.msra.mxu1 %v4968_v33  ;;  %v741_v4 = vor.u32 %v739_v56, %v715_v15  ;;  %v4935_v22 = vld [vmem:[%s7342_s2 + $0x470] ss:$8 sps:$4 sm:$0xff]   ;;  %v4960_v33 = vld [vmem:[%s7342_s2 + $0x4a4] ss:$8 sps:$4 sm:$0xff]  }
  0x8f   : > { %v6000_v18 = vsel %vm793_vm2, %v812_v8, %v820_v13  ;;  %2123 = vmatprep.subr.bf16.mxu1 %v4976_v31  ;;  %v4958_v31 = vld [vmem:[%s7342_s2 + $0x4a0] ss:$8 sps:$4 sm:$0xff]   ;;  %v4967_v13 = vld [vmem:[%s7342_s2 + $0x4b4] ss:$8 sps:$4 sm:$0xff]   ;;  %v4992_v56 = vld [vmem:[%s7342_s2 + $0x510] ss:$8 sps:$4 sm:$0xff]  }
  0x90   : > { %2290 = vmatmul.mubr.bf16.vlgmr.msra.gmra.mrb[0].mxu0 %v649_v44  ;;  %v4917_v44 = vld [vmem:[%s7342_s2 + $0x440] ss:$8 sps:$4 sm:$0xff]  }
  0x91   : > { %2339 = vmatpush1.bf16.msra.mxu0 %v4893_v46  ;;  %2299 = vmatprep.mubr.bf16.mxu0 %v692_v55  ;;  %v5995_v46 = vsel %vm546_vm0, %v571_v59, %v5638_v26  ;;  %v6013_v26 = vsel %vm793_vm2, %v810_v39, %v818_v2  ;;  %v716_v55 = vsel %vm616_vm1, %v711_v21, %v715_v15  ;;  %v4980_v59 = vld [vmem:[%s7342_s2 + $0x1f0] ss:$8 sps:$4 sm:$0xff]   ;;  %v4971_v15 = vld [vmem:[%s7342_s2 + $0x4c0] ss:$8 sps:$4 sm:$0xff]  }
  0x92   : > { %2340 = vmatprep.subr.bf16.mxu0 %v4901_v48  ;;  %v4974_v48 = vld [vmem:[%s7342_s2 + $0x1e0] ss:$8 sps:$4 sm:$0xff]   ;;  %v742_v57 = vshll.u32 %v5995_v46, 16  ;;  %v4965_v21 = vld [vmem:[%s7342_s2 + $0x4b0] ss:$8 sps:$4 sm:$0xff]  }
  0x93   : > { %2124 = vmatpush1.bf16.msra.mxu1 %v4974_v48  ;;  %v4986_v48 = vld [vmem:[%s7342_s2 + $0x4f0] ss:$8 sps:$4 sm:$0xff]  }
  0x94   : > { %2125 = vmatprep.subr.bf16.mxu1 %v4982_v54  ;;  %v4989_v54 = vld [vmem:[%s7342_s2 + $0x500] ss:$8 sps:$4 sm:$0xff]  }
  0x95   : > { %2341 = vmatpush1.bf16.msra.mxu0 %v4899_v1  ;;  %v4931_v1 = vld [vmem:[%s7342_s2 + $0x464] ss:$8 sps:$4 sm:$0xff]  }
  0x96   : > { %2342 = vmatprep.subr.bf16.mxu0 %v4907_v7  ;;  %v744_v7 = vrot.slane %v742_v57, 1  ;;  %v4997_v57 = vld [vmem:[%s7342_s2 + $0x524] ss:$8 sps:$4 sm:$0xff]  }
  0x97   : > { %2126 = vmatpush1.bf16.msra.mxu1 %v4980_v59  ;;  %v4995_v59 = vld [vmem:[%s7342_s2 + $0x520] ss:$8 sps:$4 sm:$0xff]  }
  0x98   : > { %2300 = vmatmul.mubr.bf16.gmra.mrb[4].mxu0 %v684_v20  ;;  %v764_v20 = vor.u32 %v762_v9, %v751_v45  ;;  %v4983_v45 = vld [vmem:[%s7342_s2 + $0x4e0] ss:$8 sps:$4 sm:$0xff]   ;;  %v803_v9 = vrot.slane %v5685_v53, 1  ;;  %v5016_v53 = vld [vmem:[%s7342_s2 + $0x590] ss:$8 sps:$4 sm:$0xff]  }
  0x99   : > { %2343 = vmatpush1.bf16.msra.mxu0 %v4905_v19  ;;  %2309 = vmatprep.mubr.bf16.mxu0 %v724_v41  ;;  %v745_v19 = vsel %vm616_vm1, %v741_v4, %v744_v7  ;;  %v4943_v41 = vld [vmem:[%s7342_s2 + $0x480] ss:$8 sps:$4 sm:$0xff]  }
  0x9a   : > { %2344 = vmatprep.subr.bf16.mxu0 %v4913_v40  ;;  %2128 = vmatmul.mubr.bf16.vlgmr.msra.gmra.mrb[0].mxu1 %v5834_v63  ;;  %v759_v40 = vshrl.u32 %v5995_v46, 16  ;;  %v5007_v4 = vld [vmem:[%s7342_s2 + $0x560] ss:$8 sps:$4 sm:$0xff]  }
  0x9b   : > { %2137 = vmatprep.mubr.bf16.mxu1 %v5704_v62 }
  0x9c   : > { %v761_v32 = vor.u32 %v759_v40, %v744_v7  ;;  %v5015_v7 = vld [vmem:[%s7342_s2 + $0x584] ss:$8 sps:$4 sm:$0xff]  }
  0x9d   : > { %2345 = vmatpush1.bf16.msra.mxu0 %v4911_v23  ;;  %v4950_v23 = vld [vmem:[%s7342_s2 + $0x490] ss:$8 sps:$4 sm:$0xff]   ;;  %v5033_v40 = vld [vmem:[%s7342_s2 + $0x5e4] ss:$8 sps:$4 sm:$0xff]  }
  0x9e   : > { %2346 = vmatprep.subr.bf16.mxu0 %v4919_v42  ;;  %v4979_v42 = vld [vmem:[%s7342_s2 + $0x4d4] ss:$8 sps:$4 sm:$0xff]  }
  0xa0   : > { %2310 = vmatmul.mubr.bf16.gmra.mrb[8].mxu0 %v716_v55  ;;  %v4994_v55 = vld [vmem:[%s7342_s2 + $0x514] ss:$8 sps:$4 sm:$0xff]  }
  0xa1   : > { %2347 = vmatpush1.bf16.msra.mxu0 %v4917_v44  ;;  %2319 = vmatprep.mubr.bf16.mxu0 %v752_v60  ;;  %v4988_v44 = vld [vmem:[%s7342_s2 + $0x4f4] ss:$8 sps:$4 sm:$0xff]   ;;  %v5003_v60 = vld [vmem:[%s7342_s2 + $0x544] ss:$8 sps:$4 sm:$0xff]  }
  0xa2   : > { %2348 = vmatprep.subr.bf16.mxu0 %v4925_v51  ;;  %2138 = vmatmul.mubr.bf16.gmra.mrb[4].mxu1 %v5858_v10  ;;  %v4991_v51 = vld [vmem:[%s7342_s2 + $0x504] ss:$8 sps:$4 sm:$0xff]  }
  0xa3   : > { %2147 = vmatprep.mubr.bf16.mxu1 %v5872_v38 }
  0xa5   : > { %2349 = vmatpush1.bf16.msra.mxu0 %v4923_v61  ;;  %v5001_v61 = vld [vmem:[%s7342_s2 + $0x540] ss:$8 sps:$4 sm:$0xff]  }
  0xa6   : > { %2350 = vmatprep.subr.bf16.mxu0 %v4931_v1  ;;  %v5009_v1 = vld [vmem:[%s7342_s2 + $0x564] ss:$8 sps:$4 sm:$0xff]  }
  0xa8   : > { %2320 = vmatmul.mubr.bf16.gmra.mrb[12].mxu0 %v745_v19  ;;  %v5027_v19 = vld [vmem:[%s7342_s2 + $0x5c4] ss:$8 sps:$4 sm:$0xff]  }
  0xa9   : > { %2351 = vmatpush1.bf16.msra.mxu0 %v4929_v5  ;;  %2329 = vmatprep.mubr.bf16.mxu0 %v764_v20  ;;  %v804_v5 = vrot.slane %v5704_v62, 1  ;;  %v5021_v62 = vld [vmem:[%s7342_s2 + $0x5a4] ss:$8 sps:$4 sm:$0xff]   ;;  %v5025_v20 = vld [vmem:[%s7342_s2 + $0x5c0] ss:$8 sps:$4 sm:$0xff]  }
  0xaa   : > { %2352 = vmatprep.subr.bf16.mxu0 %v4937_v17  ;;  %2148 = vmatmul.mubr.bf16.gmra.mrb[8].mxu1 %v5913_v43  ;;  %v5019_v17 = vld [vmem:[%s7342_s2 + $0x5a0] ss:$8 sps:$4 sm:$0xff]  }
  0xab   : > { %2157 = vmatprep.mubr.bf16.mxu1 %v5922_v47  ;;  %v4977_v47 = vld [vmem:[%s7342_s2 + $0x4d0] ss:$8 sps:$4 sm:$0xff]  }
  0xad   : > { %2353 = vmatpush1.bf16.msra.mxu0 %v4935_v22  ;;  %v5030_v22 = vld [vmem:[%s7342_s2 + $0x5d4] ss:$8 sps:$4 sm:$0xff]  }
  0xae   : > { %2354 = vmatprep.subr.bf16.mxu0 %v4945_v24  ;;  %v5028_v24 = vld [vmem:[%s7342_s2 + $0x5d0] ss:$8 sps:$4 sm:$0xff]  }
  0xb0   : > { %2330 = vmatmul.mubr.bf16.gmra.mrb[16].mxu0 %v761_v32  ;;  %v5034_v32 = vld [vmem:[%s7342_s2 + $0x5f0] ss:$8 sps:$4 sm:$0xff]  }
  0xb1   : > { %2355 = vmatpush1.bf16.msra.mxu0 %v4943_v41  ;;  %2370 = vmatprep.mubr.bf16.mxu0 %v5622_v14  ;;  %v4973_v14 = vld [vmem:[%s7342_s2 + $0x4c4] ss:$8 sps:$4 sm:$0xff]   ;;  %v5031_v41 = vld [vmem:[%s7342_s2 + $0x5e0] ss:$8 sps:$4 sm:$0xff]  }
  0xb2   : > { %2356 = vmatprep.subr.bf16.mxu0 %v4952_v30  ;;  %2158 = vmatmul.mubr.bf16.gmra.mrb[12].mxu1 %v5953_v11  ;;  %v5036_v30 = vld [vmem:[%s7342_s2 + $0x5f4] ss:$8 sps:$4 sm:$0xff]  }
  0xb3   : > { %2167 = vmatprep.mubr.bf16.mxu1 %v5960_v34  ;;  %v6241_v34 = vsub.s32 0, %v5354_v16 }
  0xb5   : > { %2357 = vmatpush1.bf16.msra.mxu0 %v4950_v23  ;;  %v800_v23 = vrot.slane %v5834_v63, 1  ;;  %v826_v63 = vrot.slane %v5995_v46, 1  ;;  %7360 = vst [vmem:[#allocation3_spill] sm:$0xff] %v6241_v34 }
  0xb6   : > { %2358 = vmatprep.subr.bf16.mxu0 %v4960_v33  ;;  %v801_v33 = vrot.slane %v5858_v10, 1 }
  0xb7   : > { %v827_v10 = vsel %vm793_vm2, %v818_v2, %v826_v63 }
  0xb9   : > { %2359 = vmatpush1.bf16.msra.mxu0 %v4958_v31  ;;  %v802_v31 = vsel %vm793_vm2, %v800_v23, %v801_v33 }
  0xba   : > { %2360 = vmatprep.subr.bf16.mxu0 %v4967_v13  ;;  %2168 = vmatmul.mubr.bf16.gmra.mrb[16].mxu1 %v5995_v46  ;;  %v813_v13 = vsel %vm793_vm2, %v804_v5, %v812_v8 }
  0xbd   : > { %2361 = vmatpush1.bf16.msra.mxu0 %v4965_v21  ;;  %v811_v21 = vsel %vm793_vm2, %v801_v33, %v810_v39 }
  0xbe   : > { %2362 = vmatprep.subr.bf16.mxu0 %v4973_v14 }
  0xc1   : > { %2363 = vmatpush1.bf16.msra.mxu0 %v4971_v15 }
  0xc2   : > { %2364 = vmatprep.subr.bf16.mxu0 %v4979_v42 }
  0xc5   : > { %2365 = vmatpush1.bf16.msra.mxu0 %v4977_v47 }
  0xc6   : > { %2366 = vmatprep.subr.bf16.mxu0 %v4985_v28 }
  0xc9   : > { %2367 = vmatpush1.bf16.msra.mxu0 %v4983_v45  ;;  %v1042_v45 = vld [vmem:[%s7343_s3] sm:$0x3] }
  0xca   : > { %2368 = vmatprep.subr.bf16.mxu0 %v4988_v44  ;;  %v6249_v44 = vsub.s32 1, %v5354_v16 }
  0xcc   : > { %7361 = vst [vmem:[#allocation4_spill] sm:$0xff] %v6249_v44 }
  0xcd   : > { %2369 = vmatpush1.bf16.msra.mxu0 %v4986_v48  ;;  %v1047_v48 = vrot.slane %v1042_v45, %v6241_v34 }
  0xce   : > { %2419 = vmatprep.subr.bf16.mxu0 %v4991_v51  ;;  %v1051_v51 = vrot.slane %v1042_v45, %v6249_v44 }
  0xd0   : > { %2371 = vmatmul.mubr.bf16.vlgmr.msra.gmra.mrb[0].mxu0 %v5643_v29  ;;  %v5000_v29 = vld [vmem:[%s7342_s2 + $0x534] ss:$8 sps:$4 sm:$0xff]  }
  0xd1   : > { %2420 = vmatpush1.bf16.msra.mxu0 %v4989_v54  ;;  %2380 = vmatprep.mubr.bf16.mxu0 %v5755_v27  ;;  %v4998_v27 = vld [vmem:[%s7342_s2 + $0x530] ss:$8 sps:$4 sm:$0xff]  }
  0xd2   : > { %2421 = vmatprep.subr.bf16.mxu0 %v4994_v55 }
  0xd5   : > { %2422 = vmatpush1.bf16.msra.mxu0 %v4992_v56 }
  0xd6   : > { %2423 = vmatprep.subr.bf16.mxu0 %v4997_v57 }
  0xd8   : > { %2381 = vmatmul.mubr.bf16.gmra.mrb[4].mxu0 %v5764_v37  ;;  %v5006_v37 = vld [vmem:[%s7342_s2 + $0x554] ss:$8 sps:$4 sm:$0xff]  }
  0xd9   : > { %2424 = vmatpush1.bf16.msra.mxu0 %v4995_v59  ;;  %2390 = vmatprep.mubr.bf16.mxu0 %v5796_v49  ;;  %v5004_v49 = vld [vmem:[%s7342_s2 + $0x550] ss:$8 sps:$4 sm:$0xff]  }
  0xda   : > { %2425 = vmatprep.subr.bf16.mxu0 %v5000_v29 }
  0xdd   : > { %2426 = vmatpush1.bf16.msra.mxu0 %v4998_v27 }
  0xde   : > { %2427 = vmatprep.subr.bf16.mxu0 %v5003_v60 }
  0xe0   : > { %2391 = vmatmul.mubr.bf16.gmra.mrb[8].mxu0 %v5807_v50  ;;  %v5012_v50 = vld [vmem:[%s7342_s2 + $0x574] ss:$8 sps:$4 sm:$0xff]  }
  0xe1   : > { %2428 = vmatpush1.bf16.msra.mxu0 %v5001_v61  ;;  %2400 = vmatprep.mubr.bf16.mxu0 %v5840_v0  ;;  %v5010_v0 = vld [vmem:[%s7342_s2 + $0x570] ss:$8 sps:$4 sm:$0xff]  }
  0xe2   : > { %2429 = vmatprep.subr.bf16.mxu0 %v5006_v37 }
  0xe5   : > { %2430 = vmatpush1.bf16.msra.mxu0 %v5004_v49 }
  0xe6   : > { %2431 = vmatprep.subr.bf16.mxu0 %v5009_v1 }
  0xe8   : > { %2401 = vmatmul.mubr.bf16.gmra.mrb[12].mxu0 %v5900_v35  ;;  %v5013_v35 = vld [vmem:[%s7342_s2 + $0x580] ss:$8 sps:$4 sm:$0xff]  }
  0xe9   : > { %2432 = vmatpush1.bf16.msra.mxu0 %v5007_v4  ;;  %2410 = vmatprep.mubr.bf16.mxu0 %v824_v58  ;;  %v805_v58 = vsel %vm793_vm2, %v803_v9, %v804_v5 }
  0xea   : > { %2433 = vmatprep.subr.bf16.mxu0 %v5012_v50 }
  0xed   : > { %2434 = vmatpush1.bf16.msra.mxu0 %v5010_v0 }
  0xee   : > { %2435 = vmatprep.subr.bf16.mxu0 %v5015_v7 }
  0xf0   : > { %2411 = vmatmul.mubr.bf16.gmra.mrb[16].mxu0 %v822_v52  ;;  %v5022_v52 = vld [vmem:[%s7342_s2 + $0x5b0] ss:$8 sps:$4 sm:$0xff]  }
  0xf1   : > { %2436 = vmatpush1.bf16.msra.mxu0 %v5013_v35  ;;  %2451 = vmatprep.mubr.bf16.mxu0 %v805_v58 }
  0xf2   : > { %2437 = vmatprep.subr.bf16.mxu0 %v5018_v6 }
  0xf5   : > { %2438 = vmatpush1.bf16.msra.mxu0 %v5016_v53 }
  0xf6   : > { %2439 = vmatprep.subr.bf16.mxu0 %v5021_v62 }
  0xf9   : > { %2440 = vmatpush1.bf16.msra.mxu0 %v5019_v17 }
  0xfa   : > { %2441 = vmatprep.subr.bf16.mxu0 %v5024_v36 }
  0xfd   : > { %2442 = vmatpush1.bf16.msra.mxu0 %v5022_v52 }
  0xfe   : > { %2443 = vmatprep.subr.bf16.mxu0 %v5027_v19 }
 0x101   : > { %2444 = vmatpush1.bf16.msra.mxu0 %v5025_v20 }
 0x102   : > { %2445 = vmatprep.subr.bf16.mxu0 %v5030_v22 }
 0x105   : > { %2446 = vmatpush1.bf16.msra.mxu0 %v5028_v24 }
 0x106   : > { %2447 = vmatprep.subr.bf16.mxu0 %v5033_v40 }
 0x109   : > { %2448 = vmatpush1.bf16.msra.mxu0 %v5031_v41 }
 0x10a   : > { %2449 = vmatprep.subr.bf16.mxu0 %v5036_v30 }
 0x10d   : > { %2450 = vmatpush1.bf16.msra.mxu0 %v5034_v32 }
 0x110   : > { %2452 = vmatmul.mubr.bf16.vlgmr.msra.gmra.mrb[0].mxu0 %v802_v31 }
 0x111   : > { %2461 = vmatprep.mubr.bf16.mxu0 %v813_v13 }
 0x118   : > { %2462 = vmatmul.mubr.bf16.gmra.mrb[4].mxu0 %v811_v21 }
 0x119   : > { %2471 = vmatprep.mubr.bf16.mxu0 %v6000_v18 }
 0x120   : > { %2472 = vmatmul.mubr.bf16.gmra.mrb[8].mxu0 %v6013_v26 }
 0x121   : > { %2481 = vmatprep.mubr.bf16.mxu0 %v6039_v25 }
 0x128   : > { %2482 = vmatmul.mubr.bf16.gmra.mrb[12].mxu0 %v827_v10 }
 0x129   : > { %2491 = vmatprep.mubr.bf16.mxu0 %v828_v3 }
 0x130   : > { %2492 = vmatmul.mubr.bf16.gmra.mrb[16].mxu0 %v826_v63 }
 0x16d   : > { %v2129_v38 = vpop.f32.mrb[0].mxu1 }
 0x16e   : > { %v2131_v43 = vpop.f32.mrb[1].mxu1  ;;  %v4547_v27 = vadd.f32 %v2129_v38, %v1047_v48 }
 0x16f   : > { %v2133_v8 = vpop.f32.mrb[2].mxu1  ;;  %v4549_v60 = vadd.f32 %v2131_v43, %v1051_v51 }
 0x170   : > { %v2135_v39 = vpop.f32.mrb[3].mxu1  ;;  %v4551_v37 = vadd.f32 %v2133_v8, %v1047_v48 }
 0x171   : > { %v4553_v4 = vadd.f32 %v2135_v39, %v1051_v51 }
 0x175   : > { %v2139_v18 = vpop.f32.mrb[4].mxu1 }
 0x176   : > { %v2141_v14 = vpop.f32.mrb[5].mxu1  ;;  %v4555_v6 = vadd.f32 %v2139_v18, %v1047_v48 }
 0x177   : > { %v2143_v26 = vpop.f32.mrb[6].mxu1  ;;  %v4557_v58 = vadd.f32 %v2141_v14, %v1051_v51 }
 0x178   : > { %v2145_v15 = vpop.f32.mrb[7].mxu1  ;;  %v4559_v17 = vadd.f32 %v2143_v26, %v1047_v48 }
 0x179   : > { %v4561_v19 = vadd.f32 %v2145_v15, %v1051_v51 }
 0x17d   : > { %v2149_v25 = vpop.f32.mrb[8].mxu1 }
 0x17e   : > { %v2151_v42 = vpop.f32.mrb[9].mxu1  ;;  %v4563_v32 = vadd.f32 %v2149_v25, %v1047_v48 }
 0x17f   : > { %v2153_v46 = vpop.f32.mrb[10].mxu1  ;;  %v4565_v23 = vadd.f32 %v2151_v42, %v1051_v51 }
 0x180   : > { %v2155_v47 = vpop.f32.mrb[11].mxu1  ;;  %v4567_v13 = vadd.f32 %v2153_v46, %v1047_v48 }
 0x181   : > { %v4569_v10 = vadd.f32 %v2155_v47, %v1051_v51 }
 0x185   : > { %v2159_v11 = vpop.f32.mrb[12].mxu1 }
 0x186   : > { %v2161_v28 = vpop.f32.mrb[13].mxu1  ;;  %v4571_v15 = vadd.f32 %v2159_v11, %v1047_v48 }
 0x187   : > { %v6238_v2 = vpop.f32.mrb[14].mxu1  ;;  %v4573_v25 = vadd.f32 %v2161_v28, %v1051_v51 }
 0x188   : > { %v6243_v3 = vpop.f32.mrb[15].mxu1  ;;  %v4575_v46 = vadd.f32 %v6238_v2, %v1047_v48 }
 0x18d   : > { %v2169_v54 = vpop.f32.mrb[16].mxu1 }
 0x18e   : > { %v6253_v55 = vadd.f32 %v2169_v54, %v1047_v48  ;;  %v2171_v56 = vpop.f32.mrb[17].mxu1  ;;  %v4577_v54 = vadd.f32 %v6243_v3, %v1051_v51 }
 0x18f   : > { %v6255_v57 = vadd.f32 %v2171_v56, %v1051_v51  ;;  %v2173_v59 = vpop.f32.mrb[18].mxu1 }
 0x190   : > { %v2174_v29 = vpop.f32.mrb[19].mxu1 }
 0x1e3   : > { %v2453_v61 = vpop.f32.mrb[0].mxu0 }
 0x1e4   : > { %v6257_v49 = vadd.f32 %v4547_v27, %v2453_v61  ;;  %v2455_v1 = vpop.f32.mrb[1].mxu0 }
 0x1e5   : > { %v6259_v50 = vadd.f32 %v4549_v60, %v2455_v1  ;;  %v2457_v0 = vpop.f32.mrb[2].mxu0  ;;  %v5037_v1 = vld [vmem:[%s7346_s6] ss:$8 sps:$4 sm:$0xff]  }
 0x1e6   : > { %v6261_v7 = vadd.f32 %v4551_v37, %v2457_v0  ;;  %v2459_v9 = vpop.f32.mrb[3].mxu0  ;;  %v5042_v0 = vld [vmem:[%s7346_s6 + $0x14] ss:$8 sps:$4 sm:$0xff]  }
 0x1e7   : > { %v6263_v5 = vadd.f32 %v4553_v4, %v2459_v9  ;;  %v2502_v35 = vadd.f32 %v6259_v50, %v6257_v49  ;;  %v5039_v4 = vld [vmem:[%s7346_s6 + $0x4] ss:$8 sps:$4 sm:$0xff]  }
 0x1e8   : > { %3525 = vmatprep.subr.bf16.mxu1 %v5039_v4  ;;  %v5051_v9 = vld [vmem:[%s7346_s6 + $0x204] ss:$8 sps:$4 sm:$0xff]  }
 0x1e9   : > { %2503 = vadd.xlane.f32.xlu0 %v2502_v35  ;;  %v2505_v62 = vadd.f32 %v6263_v5, %v6261_v7  ;;  %3526 = vmatpush1.bf16.msra.mxu1 %v5037_v1  ;;  %v5045_v35 = vld [vmem:[%s7346_s6 + $0x24] ss:$8 sps:$4 sm:$0xff]  }
 0x1ea   : > { %3527 = vmatprep.subr.bf16.mxu1 %v5042_v0  ;;  %3671 = vmatprep.subr.bf16.mxu0 %v5051_v9 }
 0x1eb   : > { %v2463_v53 = vpop.f32.mrb[4].mxu0 }
 0x1ec   : > { %v6269_v36 = vadd.f32 %v4555_v6, %v2463_v53  ;;  %v2465_v52 = vpop.f32.mrb[5].mxu0  ;;  %v5057_v6 = vld [vmem:[%s7346_s6 + $0x214] ss:$8 sps:$4 sm:$0xff]   ;;  %v5043_v53 = vld [vmem:[%s7346_s6 + $0x20] ss:$8 sps:$4 sm:$0xff]  }
 0x1ed   : > { %v6271_v20 = vadd.f32 %v4557_v58, %v2465_v52  ;;  %v2467_v22 = vpop.f32.mrb[6].mxu0  ;;  %2506 = vadd.xlane.f32.xlu0 %v2505_v62  ;;  %v5055_v58 = vld [vmem:[%s7346_s6 + $0x210] ss:$8 sps:$4 sm:$0xff]   ;;  %v5063_v62 = vld [vmem:[%s7346_s6 + $0x224] ss:$8 sps:$4 sm:$0xff]  }
 0x1ee   : > { %v6273_v24 = vadd.f32 %v4559_v17, %v2467_v22  ;;  %v2469_v40 = vpop.f32.mrb[7].mxu0  ;;  %v5048_v17 = vld [vmem:[%s7346_s6 + $0x34] ss:$8 sps:$4 sm:$0xff]   ;;  %v5061_v52 = vld [vmem:[%s7346_s6 + $0x220] ss:$8 sps:$4 sm:$0xff]  }
 0x1ef   : > { %v6275_v41 = vadd.f32 %v4561_v19, %v2469_v40  ;;  %v2508_v30 = vadd.f32 %v6271_v20, %v6269_v36  ;;  %v5046_v19 = vld [vmem:[%s7346_s6 + $0x30] ss:$8 sps:$4 sm:$0xff]   ;;  %v5069_v22 = vld [vmem:[%s7346_s6 + $0x234] ss:$8 sps:$4 sm:$0xff]   ;;  %v5054_v40 = vld [vmem:[%s7346_s6 + $0x44] ss:$8 sps:$4 sm:$0xff]  }
 0x1f1   : > { %2509 = vadd.xlane.f32.xlu1 %v2508_v30  ;;  %v2511_v31 = vadd.f32 %v6275_v41, %v6273_v24  ;;  %v5067_v30 = vld [vmem:[%s7346_s6 + $0x230] ss:$8 sps:$4 sm:$0xff]  }
 0x1f3   : > { %v2473_v33 = vpop.f32.mrb[8].mxu0 }
 0x1f4   : > { %v6281_v21 = vadd.f32 %v4563_v32, %v2473_v33  ;;  %v2475_v63 = vpop.f32.mrb[9].mxu0  ;;  %v5052_v32 = vld [vmem:[%s7346_s6 + $0x40] ss:$8 sps:$4 sm:$0xff]   ;;  %v5060_v33 = vld [vmem:[%s7346_s6 + $0x54] ss:$8 sps:$4 sm:$0xff]  }
 0x1f5   : > { %v6283_v38 = vadd.f32 %v4565_v23, %v2475_v63  ;;  %v2477_v43 = vpop.f32.mrb[10].mxu0  ;;  %2512 = vadd.xlane.f32.xlu1 %v2511_v31  ;;  %v5075_v23 = vld [vmem:[%s7346_s6 + $0x244] ss:$8 sps:$4 sm:$0xff]   ;;  %v5073_v31 = vld [vmem:[%s7346_s6 + $0x240] ss:$8 sps:$4 sm:$0xff]  }
 0x1f6   : > { %v6285_v8 = vadd.f32 %v4567_v13, %v2477_v43  ;;  %v2479_v39 = vpop.f32.mrb[11].mxu0  ;;  %v5058_v13 = vld [vmem:[%s7346_s6 + $0x50] ss:$8 sps:$4 sm:$0xff]   ;;  %v6382_v63 = vld [vmem:[%s7346_s6 + $0x254] ss:$8 sps:$4 sm:$0xff]  }
 0x1f7   : > { %v6287_v18 = vadd.f32 %v4569_v10, %v2479_v39  ;;  %v2514_v14 = vadd.f32 %v6283_v38, %v6281_v21  ;;  %v5066_v10 = vld [vmem:[%s7346_s6 + $0x64] ss:$8 sps:$4 sm:$0xff]   ;;  %v6390_v43 = vld [vmem:[%s7346_s6 + $0x250] ss:$8 sps:$4 sm:$0xff]   ;;  %v5064_v39 = vld [vmem:[%s7346_s6 + $0x60] ss:$8 sps:$4 sm:$0xff]  }
 0x1f9   : > { %2515 = vadd.xlane.f32.xlu0 %v2514_v14  ;;  %v2517_v26 = vadd.f32 %v6287_v18, %v6285_v8  ;;  %v5072_v14 = vld [vmem:[%s7346_s6 + $0x74] ss:$8 sps:$4 sm:$0xff]  }
 0x1fb   : > { %v2483_v42 = vpop.f32.mrb[12].mxu0  ;;  %2518 = vadd.xlane.f32.xlu1 %v2517_v26  ;;  %v5070_v26 = vld [vmem:[%s7346_s6 + $0x70] ss:$8 sps:$4 sm:$0xff]  }
 0x1fc   : > { %v6294_v47 = vadd.f32 %v4571_v15, %v2483_v42  ;;  %v2485_v45 = vpop.f32.mrb[13].mxu0  ;;  %v5078_v15 = vld [vmem:[%s7346_s6 + $0x84] ss:$8 sps:$4 sm:$0xff]  }
 0x1fd   : > { %v6297_v56 = vadd.f32 %v4573_v25, %v2485_v45  ;;  %v2487_v59 = vpop.f32.mrb[14].mxu0  ;;  %v5076_v25 = vld [vmem:[%s7346_s6 + $0x80] ss:$8 sps:$4 sm:$0xff]  }
 0x1fe   : > { %v6299_v29 = vadd.f32 %v4575_v46, %v2487_v59  ;;  %v2489_v27 = vpop.f32.mrb[15].mxu0 }
 0x1ff   : > { %v6301_v60 = vadd.f32 %v4577_v54, %v2489_v27  ;;  %v2520_v11 = vadd.f32 %v6297_v56, %v6294_v47 }
 0x201   : > { %2521 = vadd.xlane.f32.xlu0 %v2520_v11  ;;  %v2523_v28 = vadd.f32 %v6301_v60, %v6299_v29 }
 0x203   : > { %v2493_v2 = vpop.f32.mrb[16].mxu0  ;;  %2524 = vadd.xlane.f32.xlu1 %v2523_v28 }
 0x204   : > { %v6308_v48 = vadd.f32 %v6253_v55, %v2493_v2  ;;  %v2495_v3 = vpop.f32.mrb[17].mxu0  ;;  %v5049_v55 = vld [vmem:[%s7346_s6 + $0x200] ss:$8 sps:$4 sm:$0xff]  }
 0x205   : > { %v6311_v51 = vadd.f32 %v6255_v57, %v2495_v3  ;;  %v2497_v61 = vpop.f32.mrb[18].mxu0  ;;  %v5040_v57 = vld [vmem:[%s7346_s6 + $0x10] ss:$8 sps:$4 sm:$0xff]   ;;  %3672 = vmatpush1.bf16.msra.mxu0 %v5049_v55 }
 0x206   : > { %v2498_v37 = vpop.f32.mrb[19].mxu0  ;;  %3528 = vmatpush1.bf16.msra.mxu1 %v5040_v57  ;;  %3673 = vmatprep.subr.bf16.mxu0 %v5057_v6 }
 0x207   : > { %3529 = vmatprep.subr.bf16.mxu1 %v5045_v35  ;;  %v2528_v37 = vsel %vm2526_vm3, %v6311_v51, 0.0 }
 0x209   : > { %3674 = vmatpush1.bf16.msra.mxu0 %v5055_v58 }
 0x20a   : > { %3530 = vmatpush1.bf16.msra.mxu1 %v5043_v53  ;;  %3675 = vmatprep.subr.bf16.mxu0 %v5063_v62 }
 0x20b   : > { %3531 = vmatprep.subr.bf16.mxu1 %v5048_v17 }
 0x20d   : > { %3676 = vmatpush1.bf16.msra.mxu0 %v5061_v52 }
 0x20e   : > { %3532 = vmatpush1.bf16.msra.mxu1 %v5046_v19  ;;  %3677 = vmatprep.subr.bf16.mxu0 %v5069_v22 }
 0x20f   : > { %3533 = vmatprep.subr.bf16.mxu1 %v5054_v40 }
 0x211   : > { %3678 = vmatpush1.bf16.msra.mxu0 %v5067_v30 }
 0x212   : > { %3534 = vmatpush1.bf16.msra.mxu1 %v5052_v32  ;;  %3679 = vmatprep.subr.bf16.mxu0 %v5075_v23 }
 0x213   : > { %3535 = vmatprep.subr.bf16.mxu1 %v5060_v33 }
 0x215   : > { %3680 = vmatpush1.bf16.msra.mxu0 %v5073_v31 }
 0x216   : > { %3536 = vmatpush1.bf16.msra.mxu1 %v5058_v13  ;;  %3681 = vmatprep.subr.bf16.mxu0 %v6382_v63  ;;  %v5082_v13 = vld [vmem:[%s7346_s6 + $0x90] ss:$8 sps:$4 sm:$0xff]  }
 0x217   : > { %3537 = vmatprep.subr.bf16.mxu1 %v5066_v10  ;;  %v6484_v10 = vld [vmem:[%s7346_s6 + $0x264] ss:$8 sps:$4 sm:$0xff]  }
 0x219   : > { %3682 = vmatpush1.bf16.msra.mxu0 %v6390_v43 }
 0x21a   : > { %3538 = vmatpush1.bf16.msra.mxu1 %v5064_v39  ;;  %3683 = vmatprep.subr.bf16.mxu0 %v6484_v10 }
 0x21b   : > { %3539 = vmatprep.subr.bf16.mxu1 %v5072_v14  ;;  %v6489_v14 = vld [vmem:[%s7346_s6 + $0x260] ss:$8 sps:$4 sm:$0xff]  }
 0x21d   : > { %3684 = vmatpush1.bf16.msra.mxu0 %v6489_v14 }
 0x21e   : > { %3540 = vmatpush1.bf16.msra.mxu1 %v5070_v26 }
 0x21f   : > { %3541 = vmatprep.subr.bf16.mxu1 %v5078_v15 }
 0x222   : > { %3542 = vmatpush1.bf16.msra.mxu1 %v5076_v25 }
 0x276   : > { %v2504_v42 = vpop.xlane.xlu0 %2503 }
 0x277   : > { %v2533_v46 = vmul.f32 0.00390625, %v2504_v42  ;;  %v5090_v42 = vld [vmem:[%s7346_s6 + $0xa4] ss:$8 sps:$4 sm:$0xff]  }
 0x279   : > { %v6410_v45 = vsub.f32 %v6257_v49, %v2533_v46  ;;  %v6413_v54 = vsub.f32 %v6259_v50, %v2533_v46  ;;  %v2527_v50 = vsel %vm2526_vm3, %v6308_v48, 0.0 }
 0x27a   : > { %v2507_v59 = vpop.xlane.xlu0 %2506  ;;  %v2529_v55 = vadd.f32 %v2528_v37, %v2527_v50  ;;  %v5096_v37 = vld [vmem:[%s7346_s6 + $0xb4] ss:$8 sps:$4 sm:$0xff]  }
 0x27b   : > { %v2534_v27 = vmul.f32 0.00390625, %v2507_v59  ;;  %v2560_v11 = vmul.f32 %v6410_v45, %v6410_v45  ;;  %v2561_v28 = vmul.f32 %v6413_v54, %v6413_v54 }
 0x27d   : > { %v6420_v2 = vsub.f32 %v6261_v7, %v2534_v27  ;;  %v6423_v3 = vsub.f32 %v6263_v5, %v2534_v27  ;;  %v2578_v49 = vadd.f32 %v2561_v28, %v2560_v11  ;;  %v5088_v11 = vld [vmem:[%s7346_s6 + $0xa0] ss:$8 sps:$4 sm:$0xff]   ;;  %v6508_v28 = vld [vmem:[%s7346_s6 + $0x274] ss:$8 sps:$4 sm:$0xff]  }
 0x27e   : > { %v2510_v61 = vpop.xlane.xlu1 %2509  ;;  %3685 = vmatprep.subr.bf16.mxu0 %v6508_v28 }
 0x27f   : > { %v2535_v1 = vmul.f32 0.00390625, %v2510_v61  ;;  %2579 = vadd.xlane.f32.xlu0 %v2578_v49  ;;  %v2562_v4 = vmul.f32 %v6420_v2, %v6420_v2  ;;  %v2563_v7 = vmul.f32 %v6423_v3, %v6423_v3 }
 0x281   : > { %v6434_v0 = vsub.f32 %v6269_v36, %v2535_v1  ;;  %v6437_v5 = vsub.f32 %v6271_v20, %v2535_v1  ;;  %v2581_v57 = vadd.f32 %v2563_v7, %v2562_v4  ;;  %v5094_v4 = vld [vmem:[%s7346_s6 + $0xb0] ss:$8 sps:$4 sm:$0xff]   ;;  %v6540_v7 = vld [vmem:[%s7346_s6 + $0x284] ss:$8 sps:$4 sm:$0xff]  }
 0x282   : > { %v2513_v9 = vpop.xlane.xlu1 %2512 }
 0x283   : > { %v2536_v35 = vmul.f32 0.00390625, %v2513_v9  ;;  %2530 = vadd.xlane.f32.xlu0 %v2529_v55  ;;  %2582 = vadd.xlane.f32.xlu1 %v2581_v57  ;;  %v2564_v6 = vmul.f32 %v6434_v0, %v6434_v0  ;;  %v2565_v58 = vmul.f32 %v6437_v5, %v6437_v5  ;;  %v6545_v55 = vld [vmem:[%s7346_s6 + $0x280] ss:$8 sps:$4 sm:$0xff]   ;;  %v5102_v9 = vld [vmem:[%s7346_s6 + $0xc4] ss:$8 sps:$4 sm:$0xff]  }
 0x285   : > { %v6444_v53 = vsub.f32 %v6273_v24, %v2536_v35  ;;  %v6447_v36 = vsub.f32 %v6275_v41, %v2536_v35  ;;  %v2584_v20 = vadd.f32 %v2565_v58, %v2564_v6  ;;  %v5100_v35 = vld [vmem:[%s7346_s6 + $0xc0] ss:$8 sps:$4 sm:$0xff]   ;;  %v6558_v6 = vld [vmem:[%s7346_s6 + $0x294] ss:$8 sps:$4 sm:$0xff]   ;;  %v6563_v58 = vld [vmem:[%s7346_s6 + $0x290] ss:$8 sps:$4 sm:$0xff]  }
 0x286   : > { %v2516_v62 = vpop.xlane.xlu0 %2515 }
 0x287   : > { %v2537_v17 = vmul.f32 0.00390625, %v2516_v62  ;;  %2585 = vadd.xlane.f32.xlu1 %v2584_v20  ;;  %v2566_v52 = vmul.f32 %v6444_v53, %v6444_v53  ;;  %v2567_v19 = vmul.f32 %v6447_v36, %v6447_v36  ;;  %v5108_v20 = vld [vmem:[%s7346_s6 + $0xd4] ss:$8 sps:$4 sm:$0xff]   ;;  %v5106_v62 = vld [vmem:[%s7346_s6 + $0xd0] ss:$8 sps:$4 sm:$0xff]  }
 0x288   : > { %v2519_v22 = vpop.xlane.xlu1 %2518 }
 0x289   : > { %v6454_v40 = vsub.f32 %v6281_v21, %v2537_v17  ;;  %v6457_v24 = vsub.f32 %v6283_v38, %v2537_v17  ;;  %v2538_v41 = vmul.f32 0.00390625, %v2519_v22  ;;  %v2587_v30 = vadd.f32 %v2567_v19, %v2566_v52  ;;  %v5084_v38 = vld [vmem:[%s7346_s6 + $0x94] ss:$8 sps:$4 sm:$0xff]   ;;  %v6576_v17 = vld [vmem:[%s7346_s6 + $0x2a4] ss:$8 sps:$4 sm:$0xff]  }
 0x28a   : > { %3543 = vmatprep.subr.bf16.mxu1 %v5084_v38  ;;  %v6581_v52 = vld [vmem:[%s7346_s6 + $0x2a0] ss:$8 sps:$4 sm:$0xff]   ;;  %v5114_v19 = vld [vmem:[%s7346_s6 + $0xe4] ss:$8 sps:$4 sm:$0xff]  }
 0x28b   : > { %v6461_v32 = vsub.f32 %v6285_v8, %v2538_v41  ;;  %v6464_v23 = vsub.f32 %v6287_v18, %v2538_v41  ;;  %2588 = vadd.xlane.f32.xlu0 %v2587_v30  ;;  %v2568_v33 = vmul.f32 %v6454_v40, %v6454_v40  ;;  %v2569_v21 = vmul.f32 %v6457_v24, %v6457_v24  ;;  %v5112_v22 = vld [vmem:[%s7346_s6 + $0xe0] ss:$8 sps:$4 sm:$0xff]   ;;  %v6594_v41 = vld [vmem:[%s7346_s6 + $0x2b4] ss:$8 sps:$4 sm:$0xff]   ;;  %v6599_v30 = vld [vmem:[%s7346_s6 + $0x2b0] ss:$8 sps:$4 sm:$0xff]  }
 0x28c   : > { %3544 = vmatpush1.bf16.msra.mxu1 %v5082_v13  ;;  %v6612_v38 = vld [vmem:[%s7346_s6 + $0x2c4] ss:$8 sps:$4 sm:$0xff]   ;;  %v6632_v13 = vld [vmem:[%s7346_s6 + $0x2d0] ss:$8 sps:$4 sm:$0xff]  }
 0x28d   : > { %v2590_v31 = vadd.f32 %v2569_v21, %v2568_v33  ;;  %v2570_v8 = vmul.f32 %v6461_v32, %v6461_v32  ;;  %v2571_v18 = vmul.f32 %v6464_v23, %v6464_v23  ;;  %3545 = vmatprep.subr.bf16.mxu1 %v5090_v42  ;;  %v5120_v33 = vld [vmem:[%s7346_s6 + $0xf4] ss:$8 sps:$4 sm:$0xff]   ;;  %v5118_v21 = vld [vmem:[%s7346_s6 + $0xf0] ss:$8 sps:$4 sm:$0xff]  }
 0x28e   : > { %v2522_v39 = vpop.xlane.xlu0 %2521 }
 0x28f   : > { %v2539_v26 = vmul.f32 0.00390625, %v2522_v39  ;;  %2591 = vadd.xlane.f32.xlu1 %v2590_v31  ;;  %v2593_v15 = vadd.f32 %v2571_v18, %v2570_v8  ;;  %v6617_v31 = vld [vmem:[%s7346_s6 + $0x2c0] ss:$8 sps:$4 sm:$0xff]   ;;  %v5126_v8 = vld [vmem:[%s7346_s6 + $0x104] ss:$8 sps:$4 sm:$0xff]  }
 0x290   : > { %v2525_v25 = vpop.xlane.xlu1 %2524  ;;  %3546 = vmatpush1.bf16.msra.mxu1 %v5088_v11  ;;  %v6627_v18 = vld [vmem:[%s7346_s6 + $0x2d4] ss:$8 sps:$4 sm:$0xff]   ;;  %v6639_v39 = vld [vmem:[%s7346_s6 + $0x2e4] ss:$8 sps:$4 sm:$0xff]  }
 0x291   : > { %v6496_v46 = vsub.f32 %v6294_v47, %v2539_v26  ;;  %v6499_v59 = vsub.f32 %v6297_v56, %v2539_v26  ;;  %v2540_v27 = vmul.f32 0.00390625, %v2525_v25  ;;  %2594 = vadd.xlane.f32.xlu0 %v2593_v15  ;;  %v6513_v47 = vld [vmem:[%s7346_s6 + $0x270] ss:$8 sps:$4 sm:$0xff]   ;;  %3547 = vmatprep.subr.bf16.mxu1 %v5096_v37  ;;  %v6644_v26 = vld [vmem:[%s7346_s6 + $0x2e0] ss:$8 sps:$4 sm:$0xff]  }
 0x292   : > { %3686 = vmatpush1.bf16.msra.mxu0 %v6513_v47  ;;  %v6651_v15 = vld [vmem:[%s7346_s6 + $0x2f4] ss:$8 sps:$4 sm:$0xff]   ;;  %v6656_v25 = vld [vmem:[%s7346_s6 + $0x2f0] ss:$8 sps:$4 sm:$0xff]  }
 0x293   : > { %v6516_v56 = vsub.f32 %v6299_v29, %v2540_v27  ;;  %v6519_v49 = vsub.f32 %v6301_v60, %v2540_v27  ;;  %v2572_v61 = vmul.f32 %v6496_v46, %v6496_v46  ;;  %v2573_v50 = vmul.f32 %v6499_v59, %v6499_v59  ;;  %3687 = vmatprep.subr.bf16.mxu0 %v6540_v7 }
 0x294   : > { %3548 = vmatpush1.bf16.msra.mxu1 %v5094_v4 }
 0x295   : > { %v2596_v1 = vadd.f32 %v2573_v50, %v2572_v61  ;;  %v2574_v29 = vmul.f32 %v6516_v56, %v6516_v56  ;;  %v2575_v60 = vmul.f32 %v6519_v49, %v6519_v49  ;;  %3549 = vmatprep.subr.bf16.mxu1 %v5102_v9  ;;  %v6667_v9 = vstv %s4181_s21 }
 0x296   : > { %3688 = vmatpush1.bf16.msra.mxu0 %v6545_v55 }
 0x297   : > { %2597 = vadd.xlane.f32.xlu1 %v2596_v1  ;;  %v2599_v57 = vadd.f32 %v2575_v60, %v2574_v29  ;;  %3689 = vmatprep.subr.bf16.mxu0 %v6558_v6 }
 0x298   : > { %3550 = vmatpush1.bf16.msra.mxu1 %v5100_v35 }
 0x299   : > { %2600 = vadd.xlane.f32.xlu0 %v2599_v57  ;;  %3551 = vmatprep.subr.bf16.mxu1 %v5108_v20 }
 0x29a   : > { %3690 = vmatpush1.bf16.msra.mxu0 %v6563_v58 }
 0x29b   : > { %3691 = vmatprep.subr.bf16.mxu0 %v6576_v17 }
 0x29c   : > { %3552 = vmatpush1.bf16.msra.mxu1 %v5106_v62 }
 0x29d   : > { %3553 = vmatprep.subr.bf16.mxu1 %v5114_v19  ;;  %v2730_v19 = vadd.s32 8, %v5354_v16 }
 0x29e   : > { %3692 = vmatpush1.bf16.msra.mxu0 %v6581_v52 }
 0x29f   : > { %3693 = vmatprep.subr.bf16.mxu0 %v6594_v41 }
 0x2a0   : > { %3554 = vmatpush1.bf16.msra.mxu1 %v5112_v22 }
 0x2a1   : > { %3555 = vmatprep.subr.bf16.mxu1 %v5120_v33 }
 0x2a2   : > { %3694 = vmatpush1.bf16.msra.mxu0 %v6599_v30 }
 0x2a3   : > { %3695 = vmatprep.subr.bf16.mxu0 %v6612_v38 }
 0x2a4   : > { %3556 = vmatpush1.bf16.msra.mxu1 %v5118_v21 }
 0x2a5   : > { %3598 = vmatprep.subr.bf16.mxu1 %v5126_v8 }
 0x2a6   : > { %3696 = vmatpush1.bf16.msra.mxu0 %v6617_v31 }
 0x2a7   : > { %3697 = vmatprep.subr.bf16.mxu0 %v6627_v18 }
 0x2aa   : > { %3698 = vmatpush1.bf16.msra.mxu0 %v6632_v13 }
 0x2ab   : > { %3699 = vmatprep.subr.bf16.mxu0 %v6639_v39 }
 0x2ae   : > { %3700 = vmatpush1.bf16.msra.mxu0 %v6644_v26 }
 0x2af   : > { %3701 = vmatprep.subr.bf16.mxu0 %v6651_v15 }
 0x2b2   : > { %3702 = vmatpush1.bf16.msra.mxu0 %v6656_v25 }
 0x30c   : > { %v2580_v42 = vpop.xlane.xlu0 %2579 }
 0x30d   : > { %v2607_v27 = vmul.f32 0.00390625, %v2580_v42  ;;  %v2501_v42 = vld [vmem:[%s7345_s5] sm:$0x3] }
 0x30f   : > { %v2616_v11 = vadd.f32 1e-05, %v2607_v27  ;;  %v2739_v27 = vadd.s32 %v6667_v9, %v5354_v16 }
 0x310   : > { %v2583_v61 = vpop.xlane.xlu1 %2582  ;;  %v2531_v50 = vpop.xlane.xlu0 %2530 }
 0x311   : > { %5183 = vrsqrt.f32 %v2616_v11  ;;  %v2608_v37 = vmul.f32 0.00390625, %v2583_v61  ;;  %v2541_v1 = vmul.f32 0.00390625, %v2531_v50  ;;  %v2731_v11 = vadd.s32 16, %v5354_v16 }
 0x312   : > { %vm2748_vm4 = vcmp.ge.s32.totalorder %v2739_v27, 0  ;;  %vm2757_vm6 = vcmp.lt.s32.totalorder %v2739_v27, 136 }
 0x313   : > { %v2617_v29 = vadd.f32 1e-05, %v2608_v37  ;;  %v6662_v60 = vsub.f32 %v6308_v48, %v2541_v1  ;;  %v6665_v4 = vsub.f32 %v6311_v51, %v2541_v1  ;;  %v2500_v51 = vld [vmem:[%s7344_s4] sm:$0x3]  ;;  %v2740_v1 = vadd.s32 %v6667_v9, %v2730_v19  ;;  %vm6730_vm9 = vmand %vm2748_vm4, %vm2757_vm6 }
 0x314   : > { %v2586_v57 = vpop.xlane.xlu1 %2585  ;;  %v6686_v50 = vrot.slane %v2500_v51, %v6241_v34  ;;  %v6689_v37 = vrot.slane %v2500_v51, %v6249_v44  ;;  %v2732_v19 = vadd.s32 24, %v5354_v16 }
 0x315   : > { %7362 = vst [vmem:[#allocation5_spill] sm:$0xff] %v6662_v60  ;;  %7363 = vst [vmem:[#allocation6_spill] sm:$0xff] %v6665_v4  ;;  %5185 = vrsqrt.f32 %v2617_v29  ;;  %v2609_v35 = vmul.f32 0.00390625, %v2586_v57  ;;  %v2576_v20 = vmul.f32 %v6662_v60, %v6662_v60  ;;  %v2577_v62 = vmul.f32 %v6665_v4, %v6665_v4 }
 0x316   : > { %vm2749_vm5 = vcmp.ge.s32.totalorder %v2740_v1, 0  ;;  %vm2758_vm7 = vcmp.lt.s32.totalorder %v2740_v1, 136 }
 0x317   : > { %v2618_v22 = vadd.f32 1e-05, %v2609_v35  ;;  %v2602_v48 = vsel %vm2526_vm3, %v2576_v20, 0.0  ;;  %v2603_v33 = vsel %vm2526_vm3, %v2577_v62, 0.0  ;;  %v6693_v35 = vrot.slane %v2501_v42, %v6241_v34  ;;  %vm6737_vm13 = vmand %vm2749_vm5, %vm2758_vm7 }
 0x318   : > { %v2589_v21 = vpop.xlane.xlu0 %2588  ;;  %v2604_v8 = vadd.f32 %v2603_v33, %v2602_v48  ;;  %v6696_v20 = vrot.slane %v2501_v42, %v6249_v44  ;;  %v6701_v33 = vadd.s32 %v6667_v9, %v2731_v11  ;;  %v2734_v11 = vadd.s32 40, %v5354_v16  ;;  %vm4486_vm4 = vmpackc.low %vm6737_vm13, %vm6730_vm9 }
 0x319   : > { %5187 = vrsqrt.f32 %v2618_v22  ;;  %v2610_v61 = vmul.f32 0.00390625, %v2589_v21  ;;  %v2733_v21 = vadd.s32 32, %v5354_v16 }
 0x31a   : > { %2605 = vadd.xlane.f32.xlu1 %v2604_v8  ;;  %vm2750_vm8 = vcmp.ge.s32.totalorder %v6701_v33, 0  ;;  %vm2759_vm11 = vcmp.lt.s32.totalorder %v6701_v33, 136 }
 0x31b   : > { %v5184_v29 = vpop.eup %5183  ;;  %v2619_v57 = vadd.f32 1e-05, %v2610_v61  ;;  %v6714_v44 = vadd.s32 %v6667_v9, %v2733_v21  ;;  %vm6781_vm5 = vmand %vm2750_vm8, %vm2759_vm11 }
 0x31c   : > { %v2634_v62 = vmul.f32 %v5184_v29, %v6410_v45  ;;  %v2635_v22 = vmul.f32 %v5184_v29, %v6413_v54  ;;  %v2592_v48 = vpop.xlane.xlu1 %2591 }
 0x31d   : > { %5189 = vrsqrt.f32 %v2619_v57  ;;  %v2611_v51 = vmul.f32 0.00390625, %v2592_v48  ;;  %vm2752_vm14 = vcmp.ge.s32.totalorder %v6714_v44, 0  ;;  %vm2761_vm15 = vcmp.lt.s32.totalorder %v6714_v44, 136 }
 0x31e   : > { %v2595_v8 = vpop.xlane.xlu0 %2594  ;;  %v2663_v61 = vmul.f32 %v6686_v50, %v2634_v62  ;;  %v2664_v42 = vmul.f32 %v6689_v37, %v2635_v22  ;;  %v2742_v22 = vadd.s32 %v6667_v9, %v2732_v19  ;;  %vm6856_vm11 = vmand %vm2752_vm14, %vm2761_vm15 }
 0x31f   : > { %v5186_v45 = vpop.eup %5185  ;;  %v2620_v54 = vadd.f32 1e-05, %v2611_v51  ;;  %v2612_v29 = vmul.f32 0.00390625, %v2595_v8 }
 0x320   : > { %v2636_v57 = vmul.f32 %v5186_v45, %v6420_v2  ;;  %v2637_v48 = vmul.f32 %v5186_v45, %v6423_v3  ;;  %v2692_v12 = vadd.f32 %v6693_v35, %v2663_v61  ;;  %v2693_v34 = vadd.f32 %v6696_v20, %v2664_v42 }
 0x321   : > { %5191 = vrsqrt.f32 %v2620_v54  ;;  %v2621_v62 = vadd.f32 1e-05, %v2612_v29  ;;  %v2735_v2 = vadd.s32 48, %v5354_v16  ;;  %v6721_v45 = vadd.s32 %v6667_v9, %v2734_v11 }
 0x322   : > { %v2665_v51 = vmul.f32 %v6686_v50, %v2636_v57  ;;  %v2666_v8 = vmul.f32 %v6689_v37, %v2637_v48  ;;  %v2710_v61 = vmax.f32 %v2692_v12, 0.0  ;;  %v2736_v54 = vadd.s32 56, %v5354_v16 }
 0x323   : > { %v5188_v3 = vpop.eup %5187  ;;  %5193 = vrsqrt.f32 %v2621_v62  ;;  %vm2751_vm10 = vcmp.ge.s32.totalorder %v2742_v22, 0  ;;  %vm2760_vm12 = vcmp.lt.s32.totalorder %v2742_v22, 136  ;;  %v6742_v27 = vadd.s32 %v6667_v9, %v2735_v2 }
 0x324   : > { %v2638_v19 = vmul.f32 %v5188_v3, %v6434_v0  ;;  %v2639_v21 = vmul.f32 %v5188_v3, %v6437_v5  ;;  %v2598_v29 = vpop.xlane.xlu1 %2597  ;;  %v2694_v57 = vadd.f32 %v6693_v35, %v2665_v51  ;;  %v2695_v48 = vadd.f32 %v6696_v20, %v2666_v8  ;;  %vm6796_vm6 = vmand %vm2751_vm10, %vm2760_vm12 }
 0x325   : > { %v2613_v42 = vmul.f32 0.00390625, %v2598_v29  ;;  %v2711_v0 = vmax.f32 %v2693_v34, 0.0  ;;  %vm2753_vm0 = vcmp.ge.s32.totalorder %v6721_v45, 0  ;;  %vm2762_vm3 = vcmp.lt.s32.totalorder %v6721_v45, 136  ;;  %vm4492_vm7 = vmpackc.low %vm6796_vm6, %vm6781_vm5 }
 0x326   : > { %v2601_v12 = vpop.xlane.xlu0 %2600  ;;  %v2712_v11 = vmax.f32 %v2694_v57, 0.0  ;;  %v2713_v5 = vmax.f32 %v2695_v48, 0.0  ;;  %v2667_v4 = vmul.f32 %v6686_v50, %v2638_v19  ;;  %v2668_v60 = vmul.f32 %v6689_v37, %v2639_v21  ;;  %vm6871_vm12 = vmand %vm2753_vm0, %vm2762_vm3 }
 0x327   : > { %v5190_v8 = vpop.eup %5189  ;;  %v2622_v3 = vadd.f32 1e-05, %v2613_v42  ;;  %v2614_v29 = vmul.f32 0.00390625, %v2601_v12  ;;  %v2793_v57 = vsel %vm6730_vm9, %v2710_v61, 0.0  ;;  %v6755_v2 = vadd.s32 %v6667_v9, %v2736_v54  ;;  %v5124_v54 = vld [vmem:[%s7346_s6 + $0x100] ss:$8 sps:$4 sm:$0xff]  }
 0x328   : > { %v2640_v34 = vmul.f32 %v5190_v8, %v6444_v53  ;;  %v2641_v1 = vmul.f32 %v5190_v8, %v6447_v36  ;;  %v2795_v21 = vsel %vm6737_vm13, %v2712_v11, 0.0  ;;  %v2796_v53 = vsel %vm6737_vm13, %v2713_v5, 0.0  ;;  %vm4498_vm13 = vmpackc.low %vm6871_vm12, %vm6856_vm11 }
 0x329   : > { %5195 = vrsqrt.f32 %v2622_v3  ;;  %v2623_v19 = vadd.f32 1e-05, %v2614_v29  ;;  %v4487_v36 = vpack.c.bf16 %v2713_v5, %v2711_v0  ;;  %v4490_v48 = vpack.c.bf16 %v2712_v11, %v2710_v61  ;;  %v5132_v29 = vld [vmem:[%s7346_s6 + $0x114] ss:$8 sps:$4 sm:$0xff]  }
 0x32a   : > { %v2669_v42 = vmul.f32 %v6686_v50, %v2640_v34  ;;  %v2670_v12 = vmul.f32 %v6689_v37, %v2641_v1  ;;  %v2794_v3 = vsel %vm6730_vm9, %v2711_v0, 0.0  ;;  %v2696_v5 = vadd.f32 %v6693_v35, %v2667_v4 }
 0x32b   : > { %v5192_v8 = vpop.eup %5191  ;;  %5197 = vrsqrt.f32 %v2623_v19  ;;  %v2697_v61 = vadd.f32 %v6696_v20, %v2668_v60  ;;  %4488 = vmatprep.mubr.msk.bf16.mxu1 %vm4486_vm4, %v4487_v36  ;;  %vm2754_vm8 = vcmp.ge.s32.totalorder %v6742_v27, 0  ;;  %vm2763_vm9 = vcmp.lt.s32.totalorder %v6742_v27, 136 }
 0x32c   : > { %v2642_v34 = vmul.f32 %v5192_v8, %v6454_v40  ;;  %v2643_v0 = vmul.f32 %v5192_v8, %v6457_v24  ;;  %v2698_v60 = vadd.f32 %v6693_v35, %v2669_v42  ;;  %v2699_v4 = vadd.f32 %v6696_v20, %v2670_v12  ;;  %4491 = vmatmul.mubr.msk.bf16.vlgmr.msra.gmra.mrb[20].mxu1 %vm4486_vm4, %v4490_v48  ;;  %vm6930_vm15 = vmand %vm2754_vm8, %vm2763_vm9 }
 0x32d   : > { %v5194_v1 = vpop.eup %5193  ;;  %v6800_v40 = vpack.c.bf16 %v2795_v21, %v2793_v57  ;;  %v6802_v24 = vpack.c.bf16 %v2796_v53, %v2794_v3  ;;  %v2714_v19 = vmax.f32 %v2696_v5, 0.0  ;;  %v2715_v36 = vmax.f32 %v2697_v61, 0.0  ;;  %3599 = vmatpush1.bf16.msra.mxu1 %v5124_v54  ;;  %v5130_v57 = vld [vmem:[%s7346_s6 + $0x110] ss:$8 sps:$4 sm:$0xff]  }
 0x32e   : > { %v2644_v42 = vmul.f32 %v5194_v1, %v6461_v32  ;;  %v2645_v22 = vmul.f32 %v5194_v1, %v6464_v23  ;;  %v2716_v21 = vmax.f32 %v2698_v60, 0.0  ;;  %v2717_v53 = vmax.f32 %v2699_v4, 0.0  ;;  %3600 = vmatprep.subr.bf16.mxu1 %v5132_v29  ;;  %v5138_v32 = vld [vmem:[%s7346_s6 + $0x124] ss:$8 sps:$4 sm:$0xff]  }
 0x32f   : > { %v2797_v51 = vsel %vm6781_vm5, %v2714_v19, 0.0  ;;  %v2798_v62 = vsel %vm6781_vm5, %v2715_v36, 0.0  ;;  %v2671_v23 = vmul.f32 %v6686_v50, %v2642_v34  ;;  %v2672_v48 = vmul.f32 %v6689_v37, %v2643_v0  ;;  %v5136_v0 = vld [vmem:[%s7346_s6 + $0x120] ss:$8 sps:$4 sm:$0xff]  }
 0x330   : > { %v2799_v54 = vsel %vm6796_vm6, %v2716_v21, 0.0  ;;  %v2800_v12 = vsel %vm6796_vm6, %v2717_v53, 0.0  ;;  %v4493_v8 = vpack.c.bf16 %v2717_v53, %v2715_v36  ;;  %v4496_v3 = vpack.c.bf16 %v2716_v21, %v2714_v19 }
 0x331   : > { %vm2755_vm10 = vcmp.ge.s32.totalorder %v6755_v2, 0  ;;  %v6834_v29 = vpack.c.bf16 %v2799_v54, %v2797_v51  ;;  %v6836_v5 = vpack.c.bf16 %v2800_v12, %v2798_v62  ;;  %v2673_v61 = vmul.f32 %v6686_v50, %v2644_v42  ;;  %3601 = vmatpush1.bf16.msra.mxu1 %v5130_v57 }
 0x332   : > { %v2674_v34 = vmul.f32 %v6689_v37, %v2645_v22  ;;  %4494 = vmatprep.mubr.msk.bf16.mxu1 %vm4492_vm7, %v4493_v8  ;;  %v2914_v60 = vrot.slane %v6802_v24, 1  ;;  %v2911_v4 = vrot.slane %v6800_v40, 1  ;;  %v2700_v1 = vadd.f32 %v6693_v35, %v2671_v23  ;;  %3602 = vmatprep.subr.bf16.mxu1 %v5138_v32  ;;  %v5144_v22 = vld [vmem:[%s7346_s6 + $0x134] ss:$8 sps:$4 sm:$0xff]  }
 0x333   : > { %v2701_v19 = vadd.f32 %v6696_v20, %v2672_v48  ;;  %v5196_v42 = vpop.eup %5195  ;;  %v2915_v57 = vrot.slane %v6836_v5, 1  ;;  %v2912_v21 = vrot.slane %v6834_v29, 1  ;;  %v2702_v53 = vadd.f32 %v6693_v35, %v2673_v61 }
 0x334   : > { %v2703_v51 = vadd.f32 %v6696_v20, %v2674_v34  ;;  %v2646_v62 = vmul.f32 %v5196_v42, %v6496_v46  ;;  %v2647_v32 = vmul.f32 %v5196_v42, %v6499_v59  ;;  %v2718_v23 = vmax.f32 %v2700_v1, 0.0  ;;  %4497 = vmatmul.mubr.msk.bf16.gmra.mrb[24].mxu1 %vm4492_vm7, %v4496_v3  ;;  %v5142_v59 = vld [vmem:[%s7346_s6 + $0x130] ss:$8 sps:$4 sm:$0xff]  }
 0x335   : > { %v2719_v48 = vmax.f32 %v2701_v19, 0.0  ;;  %v5198_v54 = vpop.eup %5197  ;;  %v2916_v12 = vsel %vm793_vm2, %v2914_v60, %v2915_v57  ;;  %v2913_v45 = vsel %vm793_vm2, %v2911_v4, %v2912_v21  ;;  %v2720_v8 = vmax.f32 %v2702_v53, 0.0  ;;  %3603 = vmatpush1.bf16.msra.mxu1 %v5136_v0  ;;  %v5147_v0 = vld [vmem:[%s7346_s6 + $0x144] ss:$8 sps:$4 sm:$0xff]  }
 0x336   : > { %v2721_v61 = vmax.f32 %v2703_v51, 0.0  ;;  %v2648_v34 = vmul.f32 %v5198_v54, %v6516_v56  ;;  %v2649_v46 = vmul.f32 %v5198_v54, %v6519_v49  ;;  %3703 = vmatprep.mubr.bf16.mxu0 %v2916_v12  ;;  %v2801_v11 = vsel %vm6856_vm11, %v2718_v23, 0.0  ;;  %3604 = vmatprep.subr.bf16.mxu1 %v5144_v22  ;;  %v5145_v51 = vld [vmem:[%s7346_s6 + $0x140] ss:$8 sps:$4 sm:$0xff]  }
 0x337   : > { %vm2764_vm14 = vcmp.lt.s32.totalorder %v6755_v2, 136  ;;  %3704 = vmatmul.mubr.bf16.vlgmr.msra.gmra.mrb[20].mxu0 %v2913_v45  ;;  %v2802_v56 = vsel %vm6856_vm11, %v2719_v48, 0.0  ;;  %v2803_v49 = vsel %vm6871_vm12, %v2720_v8, 0.0  ;;  %v2675_v1 = vmul.f32 %v6686_v50, %v2646_v62  ;;  %v5148_v2 = vld [vmem:[%s7346_s6 + $0x150] ss:$8 sps:$4 sm:$0xff]  }
 0x338   : > { %v2804_v33 = vsel %vm6871_vm12, %v2721_v61, 0.0  ;;  %v4499_v3 = vpack.c.bf16 %v2721_v61, %v2719_v48  ;;  %v6905_v60 = vpack.c.bf16 %v2803_v49, %v2801_v11  ;;  %v2676_v19 = vmul.f32 %v6689_v37, %v2647_v32  ;;  %v5150_v61 = vld [vmem:[%s7346_s6 + $0x154] ss:$8 sps:$4 sm:$0xff]   ;;  %vm6943_vm0 = vmand %vm2755_vm10, %vm2764_vm14 }
 0x339   : > { %v6907_v4 = vpack.c.bf16 %v2804_v33, %v2802_v56  ;;  %v2677_v42 = vmul.f32 %v6686_v50, %v2648_v34  ;;  %v2678_v22 = vmul.f32 %v6689_v37, %v2649_v46  ;;  %v2836_v53 = vshll.u32 %v6802_v24, 16  ;;  %3605 = vmatpush1.bf16.msra.mxu1 %v5142_v59  ;;  %vm4504_vm3 = vmpackc.low %vm6943_vm0, %vm6930_vm15 }
 0x33a   : > { %4500 = vmatprep.mubr.msk.bf16.mxu1 %vm4498_vm13, %v4499_v3  ;;  %v2917_v32 = vrot.slane %v6905_v60, 1  ;;  %v2704_v48 = vadd.f32 %v6693_v35, %v2675_v1  ;;  %v2705_v54 = vadd.f32 %v6696_v20, %v2676_v19  ;;  %3606 = vmatprep.subr.bf16.mxu1 %v5147_v0  ;;  %v4502_v45 = vpack.c.bf16 %v2720_v8, %v2718_v23  ;;  %v5153_v1 = vld [vmem:[%s7346_s6 + $0x164] ss:$8 sps:$4 sm:$0xff]  }
 0x33b   : > { %v2919_v62 = vrot.slane %v6907_v4, 1  ;;  %v2706_v34 = vadd.f32 %v6693_v35, %v2677_v42  ;;  %v2707_v46 = vadd.f32 %v6696_v20, %v2678_v22  ;;  %v2841_v49 = vshll.u32 %v6836_v5, 16 }
 0x33c   : > { %v2722_v11 = vmax.f32 %v2704_v48, 0.0  ;;  %v2723_v23 = vmax.f32 %v2705_v54, 0.0  ;;  %4503 = vmatmul.mubr.msk.bf16.gmra.mrb[28].mxu1 %vm4498_vm13, %v4502_v45  ;;  %v2838_v36 = vrot.slane %v2836_v53, 1  ;;  %v2834_v22 = vshrl.u32 %v6802_v24, 16 }
 0x33d   : > { %v2920_v59 = vsel %vm793_vm2, %v2915_v57, %v2919_v62  ;;  %v2724_v8 = vmax.f32 %v2706_v34, 0.0  ;;  %v2725_v56 = vmax.f32 %v2707_v46, 0.0  ;;  %3607 = vmatpush1.bf16.msra.mxu1 %v5145_v51  ;;  %v2918_v57 = vsel %vm793_vm2, %v2912_v21, %v2917_v32  ;;  %v5151_v51 = vld [vmem:[%s7346_s6 + $0x160] ss:$8 sps:$4 sm:$0xff]  }
 0x33e   : > { %3713 = vmatprep.mubr.bf16.mxu0 %v2920_v59  ;;  %v2805_v33 = vsel %vm6930_vm15, %v2722_v11, 0.0  ;;  %3608 = vmatprep.subr.bf16.mxu1 %v5150_v61  ;;  %v2806_v44 = vsel %vm6930_vm15, %v2723_v23, 0.0  ;;  %v6983_v53 = vrot.slane %v2841_v49, 1  ;;  %v2839_v45 = vor.u32 %v2838_v36, %v2834_v22  ;;  %v5156_v61 = vld [vmem:[%s7346_s6 + $0x174] ss:$8 sps:$4 sm:$0xff]  }
 0x33f   : > { %3714 = vmatmul.mubr.bf16.gmra.mrb[24].mxu0 %v2918_v57  ;;  %v2807_v3 = vsel %vm6943_vm0, %v2724_v8, 0.0  ;;  %v2808_v21 = vsel %vm6943_vm0, %v2725_v56, 0.0  ;;  %v4505_v0 = vpack.c.bf16 %v2725_v56, %v2723_v23  ;;  %v4508_v54 = vpack.c.bf16 %v2724_v8, %v2722_v11  ;;  %v5154_v23 = vld [vmem:[%s7346_s6 + $0x170] ss:$8 sps:$4 sm:$0xff]   ;;  %v5159_v49 = vld [vmem:[%s7346_s6 + $0x184] ss:$8 sps:$4 sm:$0xff]  }
 0x340   : > { %v6973_v19 = vpack.c.bf16 %v2807_v3, %v2805_v33  ;;  %v6975_v42 = vpack.c.bf16 %v2808_v21, %v2806_v44  ;;  %v2844_v59 = vsel %vm616_vm1, %v2839_v45, %v6983_v53  ;;  %v5157_v36 = vld [vmem:[%s7346_s6 + $0x180] ss:$8 sps:$4 sm:$0xff]   ;;  %v5162_v44 = vld [vmem:[%s7346_s6 + $0x194] ss:$8 sps:$4 sm:$0xff]   ;;  %vm4076_vm7 = vcmask 261312  }
 0x341   : > { %4506 = vmatprep.mubr.msk.bf16.mxu1 %vm4504_vm3, %v4505_v0  ;;  %3609 = vmatpush1.bf16.msra.mxu1 %v5148_v2  ;;  %v5163_v3 = vld [vmem:[%s7346_s6 + $0x1a0] ss:$8 sps:$4 sm:$0xff]   ;;  %v5168_v21 = vld [vmem:[%s7346_s6 + $0x1b4] ss:$8 sps:$4 sm:$0xff]   ;;  %v5166_v0 = vld [vmem:[%s7346_s6 + $0x1b0] ss:$8 sps:$4 sm:$0xff]  }
 0x342   : > { %v2873_v48 = vshll.u32 %v6975_v42, 16  ;;  %3610 = vmatprep.subr.bf16.mxu1 %v5153_v1  ;;  %v2865_v34 = vshll.u32 %v6973_v19, 16  ;;  %v2885_v24 = vshrl.u32 %v6975_v42, 16  ;;  %v2877_v11 = vshrl.u32 %v6973_v19, 16  ;;  %v5171_v1 = vld [vmem:[%s7346_s6 + $0x1c4] ss:$8 sps:$4 sm:$0xff]  }
 0x343   : > { %v2923_v12 = vrot.slane %v6975_v42, 1  ;;  %v2921_v27 = vrot.slane %v6973_v19, 1  ;;  %v5169_v22 = vld [vmem:[%s7346_s6 + $0x1c0] ss:$8 sps:$4 sm:$0xff]   ;;  %vm4083_vm8 = vcmask 326912   ;;  %vm4090_vm9 = vcmask 392512  }
 0x344   : > { %v6993_v46 = vrot.slane %v2873_v48, 1  ;;  %4509 = vmatmul.mubr.msk.bf16.gmra.mrb[32].mxu1 %vm4504_vm3, %v4508_v54  ;;  %v7007_v8 = vrot.slane %v2865_v34, 1  ;;  %v5172_v48 = vld [vmem:[%s7346_s6 + $0x1d0] ss:$8 sps:$4 sm:$0xff]   ;;  %v5177_v54 = vld [vmem:[%s7346_s6 + $0x1e4] ss:$8 sps:$4 sm:$0xff]  }
 0x345   : > { %3611 = vmatpush1.bf16.msra.mxu1 %v5151_v51  ;;  %3630 = vmatprep.mubr.bf16.mxu1 %v2844_v59  ;;  %v7023_v57 = vsel %vm793_vm2, %v2919_v62, %v2923_v12  ;;  %v7028_v33 = vsel %vm793_vm2, %v2917_v32, %v2921_v27  ;;  %v5160_v62 = vld [vmem:[%s7346_s6 + $0x190] ss:$8 sps:$4 sm:$0xff]   ;;  %v5165_v32 = vld [vmem:[%s7346_s6 + $0x1a4] ss:$8 sps:$4 sm:$0xff]   ;;  %v5174_v51 = vld [vmem:[%s7346_s6 + $0x1d4] ss:$8 sps:$4 sm:$0xff]  }
 0x346   : > { %v7010_v56 = vor.u32 %v2885_v24, %v6993_v46  ;;  %3612 = vmatprep.subr.bf16.mxu1 %v5156_v61  ;;  %v7018_v2 = vor.u32 %v2877_v11, %v7007_v8  ;;  %v5175_v45 = vld [vmem:[%s7346_s6 + $0x1e0] ss:$8 sps:$4 sm:$0xff]   ;;  %v2824_v61 = vshll.u32 %v6800_v40, 16  ;;  %v5180_v34 = vld [vmem:[%s7346_s6 + $0x1f4] ss:$8 sps:$4 sm:$0xff]   ;;  %v2829_v24 = vshll.u32 %v6834_v29, 16 }
 0x347   : > { %v2857_v59 = vshll.u32 %v6907_v4, 16  ;;  %v5178_v11 = vld [vmem:[%s7346_s6 + $0x1f0] ss:$8 sps:$4 sm:$0xff]   ;;  %vm4097_vm10 = vcmask 458112   ;;  %vm4104_vm11 = vcmask 523712   ;;  %vm4107_vm12 = vcmask 516096  }
 0x349   : > { %3613 = vmatpush1.bf16.msra.mxu1 %v5154_v23  ;;  %v2826_v23 = vrot.slane %v2824_v61, 1 }
 0x34a   : > { %3614 = vmatprep.subr.bf16.mxu1 %v5159_v49  ;;  %v2822_v49 = vshrl.u32 %v6800_v40, 16 }
 0x34d   : > { %3615 = vmatpush1.bf16.msra.mxu1 %v5157_v36  ;;  %v2831_v36 = vrot.slane %v2829_v24, 1 }
 0x34e   : > { %3616 = vmatprep.subr.bf16.mxu1 %v5162_v44  ;;  %v2853_v44 = vshrl.u32 %v6836_v5, 16  ;;  %v5218_v5 = vld [vmem:[%s7346_s6 + $0x200] ss:$8 sps:$4 sm:$0xff]  }
 0x351   : > { %3617 = vmatpush1.bf16.msra.mxu1 %v5160_v62  ;;  %v2859_v62 = vrot.slane %v2857_v59, 1  ;;  %v5223_v59 = vld [vmem:[%s7346_s6 + $0x234] ss:$8 sps:$4 sm:$0xff]  }
 0x352   : > { %3618 = vmatprep.subr.bf16.mxu1 %v5165_v32  ;;  %v2827_v32 = vor.u32 %v2826_v23, %v2822_v49  ;;  %v5224_v49 = vld [vmem:[%s7346_s6 + $0x230] ss:$8 sps:$4 sm:$0xff]  }
 0x355   : > { %3619 = vmatpush1.bf16.msra.mxu1 %v5163_v3  ;;  %v2855_v3 = vor.u32 %v2853_v44, %v6983_v53  ;;  %v5219_v53 = vld [vmem:[%s7346_s6 + $0x214] ss:$8 sps:$4 sm:$0xff]   ;;  %v5226_v44 = vld [vmem:[%s7346_s6 + $0x240] ss:$8 sps:$4 sm:$0xff]  }
 0x356   : > { %3620 = vmatprep.subr.bf16.mxu1 %v5168_v21  ;;  %v5217_v21 = vld [vmem:[%s7346_s6 + $0x204] ss:$8 sps:$4 sm:$0xff]  }
 0x357   : > { %v2860_v40 = vsel %vm616_vm1, %v2855_v3, %v2859_v62 }
 0x359   : > { %3621 = vmatpush1.bf16.msra.mxu1 %v5166_v0  ;;  %v2832_v0 = vsel %vm616_vm1, %v2827_v32, %v2831_v36 }
 0x35a   : > { %3622 = vmatprep.subr.bf16.mxu1 %v5171_v1  ;;  %v2849_v1 = vshll.u32 %v6905_v60, 16 }
 0x35d   : > { %3623 = vmatpush1.bf16.msra.mxu1 %v5169_v22  ;;  %v2845_v22 = vshrl.u32 %v6834_v29, 16 }
 0x35e   : > { %3624 = vmatprep.subr.bf16.mxu1 %v5174_v51  ;;  %v2851_v51 = vrot.slane %v2849_v1, 1 }
 0x361   : > { %3625 = vmatpush1.bf16.msra.mxu1 %v5172_v48  ;;  %v2869_v48 = vshrl.u32 %v6907_v4, 16  ;;  %v5222_v4 = vld [vmem:[%s7346_s6 + $0x220] ss:$8 sps:$4 sm:$0xff]  }
 0x362   : > { %3626 = vmatprep.subr.bf16.mxu1 %v5177_v54  ;;  %v2847_v54 = vor.u32 %v2845_v22, %v2831_v36 }
 0x363   : > { %v2871_v61 = vor.u32 %v2869_v48, %v2859_v62 }
 0x364   : > { %v2852_v24 = vsel %vm616_vm1, %v2847_v54, %v2851_v51 }
 0x365   : > { %3627 = vmatpush1.bf16.msra.mxu1 %v5175_v45  ;;  %v5220_v45 = vld [vmem:[%s7346_s6 + $0x210] ss:$8 sps:$4 sm:$0xff]   ;;  %v2876_v29 = vsel %vm616_vm1, %v2871_v61, %v6993_v46  ;;  %v5225_v46 = vld [vmem:[%s7346_s6 + $0x244] ss:$8 sps:$4 sm:$0xff]  }
 0x366   : > { %3628 = vmatprep.subr.bf16.mxu1 %v5180_v34  ;;  %v5221_v34 = vld [vmem:[%s7346_s6 + $0x224] ss:$8 sps:$4 sm:$0xff]  }
 0x369   : > { %3629 = vmatpush1.bf16.msra.mxu1 %v5178_v11  ;;  %v2861_v11 = vshrl.u32 %v6905_v60, 16 }
 0x36a   : > { %4515 = vmatprep.subr.bf16.mxu1 %v5217_v21 }
 0x36b   : > { %v2863_v23 = vor.u32 %v2861_v11, %v2851_v51 }
 0x36c   : > { %3631 = vmatmul.mubr.bf16.vlgmr.msra.gmra.mrb[20].mxu1 %v2832_v0 }
 0x36d   : > { %3640 = vmatprep.mubr.bf16.mxu1 %v2860_v40  ;;  %4531 = vmatpush1.bf16.msra.mxu1 %v5218_v5  ;;  %v2868_v36 = vsel %vm616_vm1, %v2863_v23, %v7007_v8  ;;  %v7383_v40 = vld [vmem:[#allocation4_spill] sm:$0xff] }
 0x36e   : > { %4516 = vmatprep.subr.bf16.mxu1 %v5219_v53 }
 0x371   : > { %4532 = vmatpush1.bf16.msra.mxu1 %v5220_v45 }
 0x372   : > { %4517 = vmatprep.subr.bf16.mxu1 %v5221_v34 }
 0x374   : > { %3641 = vmatmul.mubr.bf16.gmra.mrb[24].mxu1 %v2852_v24 }
 0x375   : > { %3650 = vmatprep.mubr.bf16.mxu1 %v2876_v29  ;;  %4533 = vmatpush1.bf16.msra.mxu1 %v5222_v4 }
 0x376   : > { %4518 = vmatprep.subr.bf16.mxu1 %v5223_v59 }
 0x379   : > { %4534 = vmatpush1.bf16.msra.mxu1 %v5224_v49 }
 0x37a   : > { %4519 = vmatprep.subr.bf16.mxu1 %v5225_v46 }
 0x37c   : > { %3651 = vmatmul.mubr.bf16.gmra.mrb[28].mxu1 %v2868_v36 }
 0x37d   : > { %4535 = vmatpush1.bf16.msra.mxu1 %v5226_v44 }
 0x37e   : > { %4520 = vmatprep.subr.bf16.mxu1 %v6382_v63 }
 0x381   : > { %4536 = vmatpush1.bf16.msra.mxu1 %v6390_v43 }
 0x382   : > { %4521 = vmatprep.subr.bf16.mxu1 %v6484_v10 }
 0x385   : > { %4537 = vmatpush1.bf16.msra.mxu1 %v6489_v14  ;;  %v2737_v14 = vadd.s32 64, %v5354_v16 }
 0x386   : > { %4522 = vmatprep.subr.bf16.mxu1 %v6508_v28 }
 0x389   : > { %4538 = vmatpush1.bf16.msra.mxu1 %v6513_v47  ;;  %v7380_v47 = vld [vmem:[#allocation5_spill] sm:$0xff] }
 0x38a   : > { %4523 = vmatprep.subr.bf16.mxu1 %v6540_v7 }
 0x38d   : > { %4539 = vmatpush1.bf16.msra.mxu1 %v6545_v55  ;;  %v7381_v55 = vld [vmem:[#allocation6_spill] sm:$0xff] }
 0x38e   : > { %4524 = vmatprep.subr.bf16.mxu1 %v6558_v6 }
 0x391   : > { %4540 = vmatpush1.bf16.msra.mxu1 %v6563_v58  ;;  %v2747_v58 = vadd.s32 %v6667_v9, %v2737_v14 }
 0x392   : > { %4525 = vmatprep.subr.bf16.mxu1 %v6576_v17 }
 0x393   : > { %vm2756_vm4 = vcmp.ge.s32.totalorder %v2747_v58, 0  ;;  %vm2765_vm5 = vcmp.lt.s32.totalorder %v2747_v58, 136 }
 0x394   : > { %vm2774_vm6 = vmand %vm2756_vm4, %vm2765_vm5 }
 0x395   : > { %4541 = vmatpush1.bf16.msra.mxu1 %v6581_v52 }
 0x396   : > { %4526 = vmatprep.subr.bf16.mxu1 %v6594_v41 }
 0x399   : > { %4542 = vmatpush1.bf16.msra.mxu1 %v6599_v30 }
 0x39a   : > { %4527 = vmatprep.subr.bf16.mxu1 %v6612_v38 }
 0x39d   : > { %4543 = vmatpush1.bf16.msra.mxu1 %v6617_v31 }
 0x39e   : > { %4528 = vmatprep.subr.bf16.mxu1 %v6627_v18 }
 0x3a1   : > { %4544 = vmatpush1.bf16.msra.mxu1 %v6632_v13 }
 0x3a2   : > { %4529 = vmatprep.subr.bf16.mxu1 %v6639_v39 }
 0x3a5   : > { %4545 = vmatpush1.bf16.msra.mxu1 %v6644_v26 }
 0x3a6   : > { %4530 = vmatprep.subr.bf16.mxu1 %v6651_v15 }
 0x3a7   : > { %v2606_v63 = vpop.xlane.xlu1 %2605 }
 0x3a8   : > { %v2615_v43 = vmul.f32 0.00390625, %v2606_v63 }
 0x3a9   : > { %4546 = vmatpush1.bf16.msra.mxu1 %v6656_v25 }
 0x3aa   : > { %v2624_v10 = vadd.f32 1e-05, %v2615_v43 }
 0x3ac   : > { %5199 = vrsqrt.f32 %v2624_v10 }
 0x3b6   : > { %v5200_v28 = vpop.eup %5199 }
 0x3b7   : > { %v2650_v7 = vmul.f32 %v5200_v28, %v7380_v47  ;;  %v2651_v6 = vmul.f32 %v5200_v28, %v7381_v55 }
 0x3b9   : > { %v2680_v17 = vmul.f32 %v6689_v37, %v2651_v6  ;;  %v2679_v52 = vmul.f32 %v6686_v50, %v2650_v7 }
 0x3bb   : > { %v2709_v41 = vadd.f32 %v6696_v20, %v2680_v17  ;;  %v2708_v30 = vadd.f32 %v6693_v35, %v2679_v52 }
 0x3bd   : > { %v2727_v38 = vmax.f32 %v2709_v41, 0.0  ;;  %v2726_v31 = vmax.f32 %v2708_v30, 0.0 }
 0x3bf   : > { %v2810_v18 = vsel %vm2774_vm6, %v2727_v38, 0.0  ;;  %v2809_v13 = vsel %vm2774_vm6, %v2726_v31, 0.0 }
 0x3c0   : > { %v2820_v39 = vpack.c.bf16 %v2810_v18, %v2810_v18  ;;  %v2819_v26 = vpack.c.bf16 %v2809_v13, %v2809_v13 }
 0x3c2   : > { %v2889_v15 = vshll.u32 %v2820_v39, 16  ;;  %v2881_v25 = vshll.u32 %v2819_v26, 16  ;;  %v2927_v9 = vrot.slane %v2820_v39, 1  ;;  %v2925_v60 = vrot.slane %v2819_v26, 1 }
 0x3c4   : > { %v2891_v37 = vrot.slane %v2889_v15, 1  ;;  %v2883_v8 = vrot.slane %v2881_v25, 1  ;;  %v2928_v50 = vsel %vm793_vm2, %v2923_v12, %v2927_v9  ;;  %v2926_v35 = vsel %vm793_vm2, %v2921_v27, %v2925_v60 }
 0x3c5   : > { %vm4069_vm2 = vcmask 195712  }
 0x3c6   : > { %v2892_v20 = vsel %vm616_vm1, %v7010_v56, %v2891_v37  ;;  %v2884_v62 = vsel %vm616_vm1, %v7018_v2, %v2883_v8  ;;  %v3033_v56 = vld [vmem:[%s7347_s7] sm:$0x3]  ;;  %vm4062_vm1 = vcmask 130112  }
 0x3c7   : > { %3660 = vmatprep.mubr.bf16.mxu1 %v2892_v20  ;;  %v7382_v2 = vld [vmem:[#allocation3_spill] sm:$0xff] }
 0x3c8   : > { %3661 = vmatmul.mubr.bf16.gmra.mrb[32].mxu1 %v2884_v62  ;;  %v3038_v1 = vrot.slane %v3033_v56, %v7382_v2 }
 0x3c9   : > { %3723 = vmatprep.mubr.bf16.mxu1 %v7023_v57  ;;  %v3042_v57 = vrot.slane %v3033_v56, %v7383_v40 }
 0x3d0   : > { %3724 = vmatmul.mubr.bf16.vlgmr.msra.gmra.mrb[28].mxu1 %v7028_v33 }
 0x3d1   : > { %3733 = vmatprep.mubr.bf16.mxu1 %v2928_v50 }
 0x3d8   : > { %3734 = vmatmul.mubr.bf16.gmra.mrb[32].mxu1 %v2926_v35 }
 0x40a   : > { %v3705_v42 = vpop.f32.mrb[20].mxu0 }
 0x40b   : > { %v3707_v12 = vpop.f32.mrb[21].mxu0 }
 0x40c   : > { %v3709_v32 = vpop.f32.mrb[22].mxu0 }
 0x40d   : > { %v3711_v19 = vpop.f32.mrb[23].mxu0 }
 0x412   : > { %v3715_v3 = vpop.f32.mrb[24].mxu0 }
 0x413   : > { %v3717_v27 = vpop.f32.mrb[25].mxu0 }
 0x414   : > { %v3719_v21 = vpop.f32.mrb[26].mxu0 }
 0x415   : > { %v3721_v0 = vpop.f32.mrb[27].mxu0 }
 0x43f   : > { %v3632_v5 = vpop.f32.mrb[20].mxu1 }
 0x440   : > { %v4583_v33 = vadd.f32 %v3632_v5, %v3038_v1  ;;  %v3634_v53 = vpop.f32.mrb[21].mxu1 }
 0x441   : > { %v4585_v22 = vadd.f32 %v3634_v53, %v3042_v57  ;;  %v3636_v51 = vpop.f32.mrb[22].mxu1 }
 0x442   : > { %v4584_v48 = vadd.f32 %v4583_v33, %v3705_v42  ;;  %v4587_v54 = vadd.f32 %v3636_v51, %v3038_v1  ;;  %v3638_v45 = vpop.f32.mrb[23].mxu1 }
 0x443   : > { %v4586_v61 = vadd.f32 %v4585_v22, %v3707_v12  ;;  %v4589_v34 = vadd.f32 %v3638_v45, %v3042_v57 }
 0x444   : > { %v4588_v24 = vadd.f32 %v4587_v54, %v3709_v32 }
 0x445   : > { %v4590_v29 = vadd.f32 %v4589_v34, %v3711_v19  ;;  %v3746_v4 = vadd.f32 %v4586_v61, %v4584_v48 }
 0x447   : > { %3747 = vadd.xlane.f32.xlu0 %v3746_v4  ;;  %v3642_v59 = vpop.f32.mrb[24].mxu1  ;;  %v3749_v11 = vadd.f32 %v4590_v29, %v4588_v24 }
 0x448   : > { %v4591_v23 = vadd.f32 %v3642_v59, %v3038_v1  ;;  %v3644_v49 = vpop.f32.mrb[25].mxu1 }
 0x449   : > { %v4593_v46 = vadd.f32 %v3644_v49, %v3042_v57  ;;  %3750 = vadd.xlane.f32.xlu1 %v3749_v11  ;;  %v3646_v36 = vpop.f32.mrb[26].mxu1 }
 0x44a   : > { %v4592_v44 = vadd.f32 %v4591_v23, %v3715_v3  ;;  %v4595_v63 = vadd.f32 %v3646_v36, %v3038_v1  ;;  %v3648_v43 = vpop.f32.mrb[27].mxu1 }
 0x44b   : > { %v4594_v10 = vadd.f32 %v4593_v46, %v3717_v27  ;;  %v4597_v14 = vadd.f32 %v3648_v43, %v3042_v57 }
 0x44c   : > { %v4596_v28 = vadd.f32 %v4595_v63, %v3719_v21 }
 0x44d   : > { %v4598_v47 = vadd.f32 %v4597_v14, %v3721_v0  ;;  %v3752_v7 = vadd.f32 %v4594_v10, %v4592_v44 }
 0x44f   : > { %3753 = vadd.xlane.f32.xlu0 %v3752_v7  ;;  %v3755_v55 = vadd.f32 %v4598_v47, %v4596_v28 }
 0x451   : > { %3756 = vadd.xlane.f32.xlu1 %v3755_v55 }
 0x4a3   : > { %v3725_v6 = vpop.f32.mrb[28].mxu1 }
 0x4a4   : > { %v4599_v58 = vadd.f32 %v3725_v6, %v3038_v1  ;;  %v3727_v17 = vpop.f32.mrb[29].mxu1 }
 0x4a5   : > { %v4600_v52 = vadd.f32 %v3727_v17, %v3042_v57  ;;  %v3729_v41 = vpop.f32.mrb[30].mxu1 }
 0x4a6   : > { %v4601_v30 = vadd.f32 %v3729_v41, %v3038_v1  ;;  %v3731_v38 = vpop.f32.mrb[31].mxu1 }
 0x4a7   : > { %v4602_v31 = vadd.f32 %v3731_v38, %v3042_v57  ;;  %v3758_v18 = vadd.f32 %v4600_v52, %v4599_v58 }
 0x4a9   : > { %3759 = vadd.xlane.f32.xlu0 %v3758_v18  ;;  %v3761_v13 = vadd.f32 %v4602_v31, %v4601_v30 }
 0x4ab   : > { %v3735_v39 = vpop.f32.mrb[32].mxu1  ;;  %3762 = vadd.xlane.f32.xlu1 %v3761_v13 }
 0x4ac   : > { %v4603_v26 = vadd.f32 %v3735_v39, %v3038_v1  ;;  %v3737_v15 = vpop.f32.mrb[33].mxu1 }
 0x4ad   : > { %v4604_v25 = vadd.f32 %v3737_v15, %v3042_v57  ;;  %v3739_v9 = vpop.f32.mrb[34].mxu1 }
 0x4ae   : > { %v4605_v60 = vadd.f32 %v3739_v9, %v3038_v1  ;;  %v3741_v37 = vpop.f32.mrb[35].mxu1 }
 0x4af   : > { %v4606_v8 = vadd.f32 %v3741_v37, %v3042_v57  ;;  %v3764_v50 = vadd.f32 %v4604_v25, %v4603_v26 }
 0x4b1   : > { %3765 = vadd.xlane.f32.xlu0 %v3764_v50  ;;  %v3767_v35 = vadd.f32 %v4606_v8, %v4605_v60 }
 0x4b3   : > { %3768 = vadd.xlane.f32.xlu1 %v3767_v35 }
 0x4d4   : > { %v3748_v20 = vpop.xlane.xlu0 %3747 }
 0x4d5   : > { %v3770_v62 = vmul.f32 0.00390625, %v3748_v20 }
 0x4d6   : > { %v3751_v42 = vpop.xlane.xlu1 %3750 }
 0x4d7   : > { %v7169_v12 = vsub.f32 %v4584_v48, %v3770_v62  ;;  %v7171_v32 = vsub.f32 %v4586_v61, %v3770_v62  ;;  %v3771_v19 = vmul.f32 0.00390625, %v3751_v42 }
 0x4d9   : > { %v7173_v3 = vsub.f32 %v4588_v24, %v3771_v19  ;;  %v7175_v27 = vsub.f32 %v4590_v29, %v3771_v19  ;;  %v3794_v21 = vmul.f32 %v7169_v12, %v7169_v12  ;;  %v3795_v0 = vmul.f32 %v7171_v32, %v7171_v32 }
 0x4db   : > { %v3810_v56 = vadd.f32 %v3795_v0, %v3794_v21  ;;  %v3796_v1 = vmul.f32 %v7173_v3, %v7173_v3  ;;  %v3797_v57 = vmul.f32 %v7175_v27, %v7175_v27 }
 0x4dc   : > { %v3754_v5 = vpop.xlane.xlu0 %3753 }
 0x4dd   : > { %v3772_v33 = vmul.f32 0.00390625, %v3754_v5  ;;  %3811 = vadd.xlane.f32.xlu0 %v3810_v56  ;;  %v3813_v53 = vadd.f32 %v3797_v57, %v3796_v1  ;;  %v3744_v56 = vld [vmem:[%s7348_s8] sm:$0x3] }
 0x4de   : > { %v3757_v22 = vpop.xlane.xlu1 %3756  ;;  %v3745_v57 = vld [vmem:[%s7349_s9] sm:$0x3]  ;;  %v7240_v5 = vrot.slane %v3744_v56, %v7382_v2 }
 0x4df   : > { %v7185_v51 = vsub.f32 %v4592_v44, %v3772_v33  ;;  %v7187_v48 = vsub.f32 %v4594_v10, %v3772_v33  ;;  %v3773_v54 = vmul.f32 0.00390625, %v3757_v22  ;;  %3814 = vadd.xlane.f32.xlu1 %v3813_v53  ;;  %v7243_v33 = vrot.slane %v3744_v56, %v7383_v40 }
 0x4e1   : > { %v7189_v45 = vsub.f32 %v4596_v28, %v3773_v54  ;;  %v7191_v61 = vsub.f32 %v4598_v47, %v3773_v54  ;;  %v3798_v34 = vmul.f32 %v7185_v51, %v7185_v51  ;;  %v3799_v24 = vmul.f32 %v7187_v48, %v7187_v48 }
 0x4e3   : > { %v3816_v29 = vadd.f32 %v3799_v24, %v3798_v34  ;;  %v3800_v4 = vmul.f32 %v7189_v45, %v7189_v45  ;;  %v3801_v59 = vmul.f32 %v7191_v61, %v7191_v61  ;;  %v7248_v34 = vrot.slane %v3745_v57, %v7382_v2 }
 0x4e4   : > { %v7251_v24 = vrot.slane %v3745_v57, %v7383_v40 }
 0x4e5   : > { %3817 = vadd.xlane.f32.xlu0 %v3816_v29  ;;  %v3819_v11 = vadd.f32 %v3801_v59, %v3800_v4  ;;  %v3944_v29 = vld [vmem:[%s7350_s10] sm:$0x3] }
 0x4e7   : > { %3820 = vadd.xlane.f32.xlu1 %v3819_v11 }
 0x536   : > { %v3760_v23 = vpop.xlane.xlu0 %3759 }
 0x537   : > { %v3774_v49 = vmul.f32 0.00390625, %v3760_v23 }
 0x538   : > { %v3763_v46 = vpop.xlane.xlu1 %3762 }
 0x539   : > { %v7201_v36 = vsub.f32 %v4599_v58, %v3774_v49  ;;  %v7203_v44 = vsub.f32 %v4600_v52, %v3774_v49  ;;  %v3775_v63 = vmul.f32 0.00390625, %v3763_v46  ;;  %v7264_v49 = vrot.slane %v3944_v29, %v7383_v40 }
 0x53b   : > { %v7205_v43 = vsub.f32 %v4601_v30, %v3775_v63  ;;  %v7207_v10 = vsub.f32 %v4602_v31, %v3775_v63  ;;  %v3802_v14 = vmul.f32 %v7201_v36, %v7201_v36  ;;  %v3803_v28 = vmul.f32 %v7203_v44, %v7203_v44 }
 0x53d   : > { %v3822_v47 = vadd.f32 %v3803_v28, %v3802_v14  ;;  %v3804_v7 = vmul.f32 %v7205_v43, %v7205_v43  ;;  %v3805_v55 = vmul.f32 %v7207_v10, %v7207_v10 }
 0x53e   : > { %v3766_v6 = vpop.xlane.xlu0 %3765 }
 0x53f   : > { %v3776_v58 = vmul.f32 0.00390625, %v3766_v6  ;;  %3823 = vadd.xlane.f32.xlu0 %v3822_v47  ;;  %v3825_v17 = vadd.f32 %v3805_v55, %v3804_v7 }
 0x540   : > { %v3769_v52 = vpop.xlane.xlu1 %3768 }
 0x541   : > { %v7217_v41 = vsub.f32 %v4603_v26, %v3776_v58  ;;  %v7219_v30 = vsub.f32 %v4604_v25, %v3776_v58  ;;  %v3777_v38 = vmul.f32 0.00390625, %v3769_v52  ;;  %3826 = vadd.xlane.f32.xlu1 %v3825_v17 }
 0x543   : > { %v7221_v31 = vsub.f32 %v4605_v60, %v3777_v38  ;;  %v7223_v18 = vsub.f32 %v4606_v8, %v3777_v38  ;;  %v3806_v13 = vmul.f32 %v7217_v41, %v7217_v41  ;;  %v3807_v39 = vmul.f32 %v7219_v30, %v7219_v30 }
 0x545   : > { %v3828_v15 = vadd.f32 %v3807_v39, %v3806_v13  ;;  %v3808_v9 = vmul.f32 %v7221_v31, %v7221_v31  ;;  %v3809_v26 = vmul.f32 %v7223_v18, %v7223_v18 }
 0x547   : > { %3829 = vadd.xlane.f32.xlu0 %v3828_v15  ;;  %v3831_v25 = vadd.f32 %v3809_v26, %v3808_v9 }
 0x549   : > { %3832 = vadd.xlane.f32.xlu1 %v3831_v25 }
 0x56a   : > { %v3812_v60 = vpop.xlane.xlu0 %3811 }
 0x56b   : > { %v3834_v37 = vmul.f32 0.00390625, %v3812_v60 }
 0x56c   : > { %v3815_v8 = vpop.xlane.xlu1 %3814 }
 0x56d   : > { %v3842_v50 = vadd.f32 1e-05, %v3834_v37  ;;  %v3835_v35 = vmul.f32 0.00390625, %v3815_v8 }
 0x56f   : > { %5201 = vrsqrt.f32 %v3842_v50  ;;  %v3843_v20 = vadd.f32 1e-05, %v3835_v35 }
 0x571   : > { %5203 = vrsqrt.f32 %v3843_v20 }
 0x572   : > { %v3818_v62 = vpop.xlane.xlu0 %3817 }
 0x573   : > { %v3836_v42 = vmul.f32 0.00390625, %v3818_v62 }
 0x574   : > { %v3821_v19 = vpop.xlane.xlu1 %3820 }
 0x575   : > { %v3844_v21 = vadd.f32 1e-05, %v3836_v42  ;;  %v3837_v0 = vmul.f32 0.00390625, %v3821_v19 }
 0x577   : > { %5205 = vrsqrt.f32 %v3844_v21  ;;  %v3845_v1 = vadd.f32 1e-05, %v3837_v0 }
 0x579   : > { %v5202_v53 = vpop.eup %5201  ;;  %5207 = vrsqrt.f32 %v3845_v1 }
 0x57a   : > { %v3858_v22 = vmul.f32 %v5202_v53, %v7169_v12  ;;  %v3859_v54 = vmul.f32 %v5202_v53, %v7171_v32  ;;  %v7261_v32 = vrot.slane %v3944_v29, %v7382_v2  ;;  %v5236_v53 = vmov 0  }
 0x57b   : > { %v5204_v4 = vpop.eup %5203  ;;  %4722 = vset.pattern.permute.xlu0 %v5236_v53  ;;  %4723 = vset.pattern.permute.xlu1 %v5236_v53 }
 0x57c   : > { %v3885_v59 = vmul.f32 %v7240_v5, %v3858_v22  ;;  %v3886_v11 = vmul.f32 %v7243_v33, %v3859_v54  ;;  %v3860_v23 = vmul.f32 %v5204_v4, %v7173_v3  ;;  %v3861_v12 = vmul.f32 %v5204_v4, %v7175_v27 }
 0x57e   : > { %v3912_v46 = vadd.f32 %v7248_v34, %v3885_v59  ;;  %v3913_v63 = vadd.f32 %v7251_v24, %v3886_v11  ;;  %v3887_v14 = vmul.f32 %v7240_v5, %v3860_v23  ;;  %v3888_v28 = vmul.f32 %v7243_v33, %v3861_v12 }
 0x580   : > { %v3928_v47 = vmax.f32 %v3912_v46, 0.0  ;;  %v3929_v7 = vmax.f32 %v3913_v63, 0.0  ;;  %v3914_v3 = vadd.f32 %v7248_v34, %v3887_v14  ;;  %v3915_v27 = vadd.f32 %v7251_v24, %v3888_v28 }
 0x581   : > { %v5206_v55 = vpop.eup %5205 }
 0x582   : > { %v3956_v2 = vmul.f32 %v7261_v32, %v3928_v47  ;;  %v3957_v40 = vmul.f32 %v7264_v49, %v3929_v7  ;;  %v3930_v6 = vmax.f32 %v3914_v3, 0.0  ;;  %v3931_v58 = vmax.f32 %v3915_v27, 0.0 }
 0x583   : > { %v5208_v17 = vpop.eup %5207  ;;  %v3862_v52 = vmul.f32 %v5206_v55, %v7185_v51  ;;  %v3863_v38 = vmul.f32 %v5206_v55, %v7187_v48 }
 0x584   : > { %v3972_v13 = vadd.f32 %v3957_v40, %v3956_v2  ;;  %v3958_v39 = vmul.f32 %v7261_v32, %v3930_v6  ;;  %v3959_v15 = vmul.f32 %v7264_v49, %v3931_v58  ;;  %v3864_v9 = vmul.f32 %v5208_v17, %v7189_v45 }
 0x585   : > { %v3889_v26 = vmul.f32 %v7240_v5, %v3862_v52  ;;  %v3890_v25 = vmul.f32 %v7243_v33, %v3863_v38  ;;  %v3865_v60 = vmul.f32 %v5208_v17, %v7191_v61 }
 0x586   : > { %3973 = vadd.xlane.f32.xlu0 %v3972_v13  ;;  %v3975_v37 = vadd.f32 %v3959_v15, %v3958_v39  ;;  %v3891_v8 = vmul.f32 %v7240_v5, %v3864_v9 }
 0x587   : > { %v3916_v51 = vadd.f32 %v7248_v34, %v3889_v26  ;;  %v3917_v48 = vadd.f32 %v7251_v24, %v3890_v25  ;;  %v3892_v50 = vmul.f32 %v7243_v33, %v3865_v60 }
 0x588   : > { %3976 = vadd.xlane.f32.xlu1 %v3975_v37  ;;  %v3918_v35 = vadd.f32 %v7248_v34, %v3891_v8 }
 0x589   : > { %v3932_v45 = vmax.f32 %v3916_v51, 0.0  ;;  %v3933_v20 = vmax.f32 %v3917_v48, 0.0  ;;  %v3919_v62 = vadd.f32 %v7251_v24, %v3892_v50 }
 0x58a   : > { %v3934_v42 = vmax.f32 %v3918_v35, 0.0 }
 0x58b   : > { %v3960_v61 = vmul.f32 %v7261_v32, %v3932_v45  ;;  %v3961_v19 = vmul.f32 %v7264_v49, %v3933_v20  ;;  %v3935_v21 = vmax.f32 %v3919_v62, 0.0 }
 0x58c   : > { %v3962_v0 = vmul.f32 %v7261_v32, %v3934_v42 }
 0x58d   : > { %v3978_v56 = vadd.f32 %v3961_v19, %v3960_v61  ;;  %v3963_v1 = vmul.f32 %v7264_v49, %v3935_v21 }
 0x58f   : > { %3979 = vadd.xlane.f32.xlu0 %v3978_v56  ;;  %v3981_v57 = vadd.f32 %v3963_v1, %v3962_v0 }
 0x591   : > { %3982 = vadd.xlane.f32.xlu1 %v3981_v57 }
 0x5cc   : > { %v3824_v22 = vpop.xlane.xlu0 %3823 }
 0x5cd   : > { %v3838_v54 = vmul.f32 0.00390625, %v3824_v22 }
 0x5ce   : > { %v3827_v29 = vpop.xlane.xlu1 %3826 }
 0x5cf   : > { %v3846_v4 = vadd.f32 1e-05, %v3838_v54  ;;  %v3839_v59 = vmul.f32 0.00390625, %v3827_v29  ;;  %v4510_v54 = vld [vmem:[#allocation2] ss:$0 sm:$0xff] }
 0x5d1   : > { %5209 = vrsqrt.f32 %v3846_v4  ;;  %v3847_v11 = vadd.f32 1e-05, %v3839_v59 }
 0x5d3   : > { %5211 = vrsqrt.f32 %v3847_v11 }
 0x5d4   : > { %v3830_v23 = vpop.xlane.xlu0 %3829 }
 0x5d5   : > { %v3840_v12 = vmul.f32 0.00390625, %v3830_v23 }
 0x5d6   : > { %v3833_v46 = vpop.xlane.xlu1 %3832 }
 0x5d7   : > { %v3848_v63 = vadd.f32 1e-05, %v3840_v12  ;;  %v3841_v14 = vmul.f32 0.00390625, %v3833_v46 }
 0x5d9   : > { %5213 = vrsqrt.f32 %v3848_v63  ;;  %v3849_v28 = vadd.f32 1e-05, %v3841_v14 }
 0x5db   : > { %v5210_v47 = vpop.eup %5209  ;;  %5215 = vrsqrt.f32 %v3849_v28 }
 0x5dc   : > { %v3866_v7 = vmul.f32 %v5210_v47, %v7201_v36  ;;  %v3867_v3 = vmul.f32 %v5210_v47, %v7203_v44 }
 0x5dd   : > { %v5212_v27 = vpop.eup %5211 }
 0x5de   : > { %v3893_v55 = vmul.f32 %v7240_v5, %v3866_v7  ;;  %v3894_v2 = vmul.f32 %v7243_v33, %v3867_v3  ;;  %v3868_v40 = vmul.f32 %v5212_v27, %v7205_v43  ;;  %v3869_v6 = vmul.f32 %v5212_v27, %v7207_v10 }
 0x5e0   : > { %v3920_v58 = vadd.f32 %v7248_v34, %v3893_v55  ;;  %v3921_v17 = vadd.f32 %v7251_v24, %v3894_v2  ;;  %v3895_v52 = vmul.f32 %v7240_v5, %v3868_v40  ;;  %v3896_v38 = vmul.f32 %v7243_v33, %v3869_v6 }
 0x5e2   : > { %v3936_v36 = vmax.f32 %v3920_v58, 0.0  ;;  %v3937_v13 = vmax.f32 %v3921_v17, 0.0  ;;  %v3922_v44 = vadd.f32 %v7248_v34, %v3895_v52  ;;  %v3923_v39 = vadd.f32 %v7251_v24, %v3896_v38 }
 0x5e3   : > { %v5214_v15 = vpop.eup %5213 }
 0x5e4   : > { %v3964_v9 = vmul.f32 %v7261_v32, %v3936_v36  ;;  %v3965_v43 = vmul.f32 %v7264_v49, %v3937_v13  ;;  %v3938_v10 = vmax.f32 %v3922_v44, 0.0  ;;  %v3939_v26 = vmax.f32 %v3923_v39, 0.0 }
 0x5e5   : > { %v5216_v25 = vpop.eup %5215  ;;  %v3870_v60 = vmul.f32 %v5214_v15, %v7217_v41  ;;  %v3871_v37 = vmul.f32 %v5214_v15, %v7219_v30  ;;  %v7384_v36 = vlaneseq }
 0x5e6   : > { %v3984_v8 = vadd.f32 %v3965_v43, %v3964_v9  ;;  %v3966_v51 = vmul.f32 %v7261_v32, %v3938_v10  ;;  %v3967_v48 = vmul.f32 %v7264_v49, %v3939_v26  ;;  %v3872_v50 = vmul.f32 %v5216_v25, %v7221_v31 }
 0x5e7   : > { %v3897_v35 = vmul.f32 %v7240_v5, %v3870_v60  ;;  %v3898_v45 = vmul.f32 %v7243_v33, %v3871_v37  ;;  %v3873_v20 = vmul.f32 %v5216_v25, %v7223_v18  ;;  %v4052_v13 = vand.u32 127, %v7384_v36 }
 0x5e8   : > { %3985 = vadd.xlane.f32.xlu0 %v3984_v8  ;;  %v3987_v62 = vadd.f32 %v3967_v48, %v3966_v51  ;;  %v3899_v42 = vmul.f32 %v7240_v5, %v3872_v50 }
 0x5e9   : > { %v3924_v41 = vadd.f32 %v7248_v34, %v3897_v35  ;;  %v3925_v30 = vadd.f32 %v7251_v24, %v3898_v45  ;;  %v3900_v61 = vmul.f32 %v7243_v33, %v3873_v20  ;;  %v4057_v39 = vadd.s32 4294967288, %v4052_v13 }
 0x5ea   : > { %3988 = vadd.xlane.f32.xlu1 %v3987_v62  ;;  %v3926_v19 = vadd.f32 %v7248_v34, %v3899_v42  ;;  %v4064_v15 = vadd.s32 4294967280, %v4052_v13  ;;  %v4071_v9 = vadd.s32 4294967272, %v4052_v13  ;;  %v4078_v10 = vadd.s32 4294967264, %v4052_v13 }
 0x5eb   : > { %v3940_v31 = vmax.f32 %v3924_v41, 0.0  ;;  %v3941_v21 = vmax.f32 %v3925_v30, 0.0  ;;  %v3927_v0 = vadd.f32 %v7251_v24, %v3900_v61  ;;  %v4060_v26 = vsub.s32 %v4057_v39, %v5354_v16 }
 0x5ec   : > { %v3942_v56 = vmax.f32 %v3926_v19, 0.0  ;;  %v4085_v25 = vadd.s32 4294967256, %v4052_v13  ;;  %v4067_v60 = vsub.s32 %v4064_v15, %v5354_v16  ;;  %v4092_v37 = vadd.s32 4294967248, %v4052_v13 }
 0x5ed   : > { %v3968_v18 = vmul.f32 %v7261_v32, %v3940_v31  ;;  %v3969_v1 = vmul.f32 %v7264_v49, %v3941_v21  ;;  %v3943_v57 = vmax.f32 %v3927_v0, 0.0  ;;  %v4055_v8 = vsub.s32 %v4052_v13, %v5354_v16 }
 0x5ee   : > { %v3970_v5 = vmul.f32 %v7261_v32, %v3942_v56  ;;  %v4074_v51 = vsub.s32 %v4071_v9, %v5354_v16  ;;  %v4081_v35 = vsub.s32 %v4078_v10, %v5354_v16  ;;  %v4088_v20 = vsub.s32 %v4085_v25, %v5354_v16 }
 0x5ef   : > { %v3990_v53 = vadd.f32 %v3969_v1, %v3968_v18  ;;  %v3971_v22 = vmul.f32 %v7264_v49, %v3943_v57  ;;  %v4099_v62 = vadd.s32 4294967240, %v4052_v13  ;;  %v4095_v41 = vsub.s32 %v4092_v37, %v5354_v16 }
 0x5f1   : > { %3991 = vadd.xlane.f32.xlu0 %v3990_v53  ;;  %v3993_v33 = vadd.f32 %v3971_v22, %v3970_v5  ;;  %v4102_v56 = vsub.s32 %v4099_v62, %v5354_v16 }
 0x5f3   : > { %3994 = vadd.xlane.f32.xlu1 %v3993_v33 }
 0x613   : > { %v3974_v34 = vpop.xlane.xlu0 %3973 }
 0x614   : > { %v4003_v29 = vadd.f32 %v4510_v54, %v3974_v34 }
 0x615   : > { %v3977_v4 = vpop.xlane.xlu1 %3976 }
 0x616   : > { %v4011_v59 = vmax.f32 %v4003_v29, 0.0  ;;  %v4004_v24 = vadd.f32 %v4510_v54, %v3977_v4 }
 0x618   : > { %v4012_v11 = vmax.f32 %v4004_v24, 0.0  ;;  %4028 = vperm.xlu0 %4722, %v4011_v59  }
 0x61a   : > { %4031 = vperm.xlu1 %4723, %v4012_v11  }
 0x61c   : > { %v3980_v23 = vpop.xlane.xlu0 %3979 }
 0x61d   : > { %v4005_v12 = vadd.f32 %v4510_v54, %v3980_v23 }
 0x61e   : > { %v3983_v46 = vpop.xlane.xlu1 %3982 }
 0x61f   : > { %v4013_v63 = vmax.f32 %v4005_v12, 0.0  ;;  %v4006_v32 = vadd.f32 %v4510_v54, %v3983_v46 }
 0x621   : > { %4034 = vperm.xlu1 %4723, %v4013_v63   ;;  %v4014_v14 = vmax.f32 %v4006_v32, 0.0 }
 0x625   : > { %4037 = vperm.xlu1 %4723, %v4014_v14  }
 0x675   : > { %v3986_v49 = vpop.xlane.xlu0 %3985 }
 0x676   : > { %v4007_v28 = vadd.f32 %v4510_v54, %v3986_v49 }
 0x677   : > { %v3989_v47 = vpop.xlane.xlu1 %3988 }
 0x678   : > { %v4015_v7 = vmax.f32 %v4007_v28, 0.0  ;;  %v4008_v3 = vadd.f32 %v4510_v54, %v3989_v47 }
 0x67a   : > { %4040 = vperm.xlu1 %4723, %v4015_v7   ;;  %v4016_v27 = vmax.f32 %v4008_v3, 0.0 }
 0x67e   : > { %v3992_v55 = vpop.xlane.xlu0 %3991  ;;  %4043 = vperm.xlu1 %4723, %v4016_v27  }
 0x67f   : > { %v4009_v2 = vadd.f32 %v4510_v54, %v3992_v55 }
 0x680   : > { %v3995_v40 = vpop.xlane.xlu1 %3994 }
 0x681   : > { %v4017_v6 = vmax.f32 %v4009_v2, 0.0  ;;  %v4010_v58 = vadd.f32 %v4510_v54, %v3995_v40 }
 0x683   : > { %4046 = vperm.xlu1 %4723, %v4017_v6   ;;  %v4018_v17 = vmax.f32 %v4010_v58, 0.0 }
 0x687   : > { %4049 = vperm.xlu1 %4723, %v4018_v17  }
 0x697   : > { %v4029_v50 = vpop.permute.xlu0 %4028 }
 0x698   : > { %v4056_v30 = vrot.slane %v4029_v50, %v4055_v8 }
 0x699   : > { %v4032_v52 = vpop.permute.xlu1 %4031 }
 0x69a   : > { %v4061_v45 = vrot.slane %v4032_v52, %v4060_v26 }
 0x69c   : > { %v4063_v21 = vsel %vm4062_vm1, %v4061_v45, %v4056_v30 }
 0x6a0   : > { %v4035_v38 = vpop.permute.xlu1 %4034 }
 0x6a1   : > { %v4068_v42 = vrot.slane %v4035_v38, %v4067_v60 }
 0x6a3   : > { %v4070_v18 = vsel %vm4069_vm2, %v4068_v42, %v4063_v21 }
 0x6a4   : > { %v4038_v44 = vpop.permute.xlu1 %4037 }
 0x6a5   : > { %v4075_v61 = vrot.slane %v4038_v44, %v4074_v51 }
 0x6a7   : > { %v4077_v57 = vsel %vm4076_vm7, %v4075_v61, %v4070_v18 }
 0x6f9   : > { %v4041_v43 = vpop.permute.xlu1 %4040 }
 0x6fa   : > { %v4082_v19 = vrot.slane %v4041_v43, %v4081_v35 }
 0x6fc   : > { %v4084_v5 = vsel %vm4083_vm8, %v4082_v19, %v4077_v57 }
 0x6fd   : > { %v4044_v48 = vpop.permute.xlu1 %4043 }
 0x6fe   : > { %v4089_v0 = vrot.slane %v4044_v48, %v4088_v20 }
 0x700   : > { %v4091_v22 = vsel %vm4090_vm9, %v4089_v0, %v4084_v5 }
 0x702   : > { %v4047_v31 = vpop.permute.xlu1 %4046 }
 0x703   : > { %v4096_v1 = vrot.slane %v4047_v31, %v4095_v41 }
 0x705   : > { %v4098_v54 = vsel %vm4097_vm10, %v4096_v1, %v4091_v22 }
 0x706   : > { %v4050_v53 = vpop.permute.xlu1 %4049 }
 0x707   : > { %v4103_v33 = vrot.slane %v4050_v53, %v4102_v56 }
 0x709   : > { %v4105_v34 = vsel %vm4104_vm11, %v4103_v33, %v4098_v54 }
 0x70a   : > { %4108 = vst.msk [vmem:[%s431_s18] sm:$0x1] %vm4107_vm12, %v4105_v34 }
 0x70b PF: > { %s24_s23 = sadd.s32 1, %s5233_s23  }
 0x70c   : > { %p21_p6 = scmp.ge.s32.totalorder %s24_s23, 8  }
 0x70e   :  { %23 = sbr.rel (!%p21_p6) target bundleno = 3 (0x3), region = 101 }

</bundles_post_ra>
